<compile_context>
chip_gen: v7x
topology: tpu7x:2x2x1
jax: 0.10.0
libtpu: 0.0.40
codegen_flags: <defaults>
</compile_context>

<pallas_src>
import jax
import jax.numpy as jnp
from jax.experimental import pallas as pl
from jax.experimental.pallas import tpu as pltpu

# ---- logical model dims (MNIST config of MLP_VAE) ---------------------------
IN_DIM = 784          # 1 * 28 * 28
H_DIM = 400
Z_DIM = 20

# ---- lane-padded dims (multiples of 128) ------------------------------------
H_P = 512             # 400 -> 4 * 128
Z_P = 128             # 20  -> 1 * 128
OUT_P = 896           # 784 -> 7 * 128  (decoder matmul N; store is 784)

MAX_BATCH_TILE = 512  # ~17 MiB VMEM/step with bf16 weights; fine on v5e/v6e/v7x


def _round_up(n, m):
    return ((n + m - 1) // m) * m


def _vae_kernel(x_ref, u_ref,
                w_enc_ref, b_enc_ref,
                w_mulv_ref, b_mulv_ref,
                w_d1_ref, b_d1_ref,
                w_d2_ref, b_d2_ref,
                xbar_ref, mu_ref, logvar_ref):
    cdt = w_enc_ref.dtype        # matmul-input dtype (bf16 default, f32 fallback)

    x = x_ref[...]                                               # (TB, 784)

    # encoder: Linear(784 -> 512pad) + ReLU   (f32 accumulation / elementwise)
    h = jnp.dot(x.astype(cdt), w_enc_ref[...],
                preferred_element_type=jnp.float32)
    h = jnp.maximum(h + b_enc_ref[...], 0.0)                     # (TB, 512) f32

    # fused bottleneck: one (512, 256) matmul = [fc_mu | fc_logvar]
    mulv = jnp.dot(h.astype(cdt), w_mulv_ref[...],
                   preferred_element_type=jnp.float32) + b_mulv_ref[...]
    mu = mulv[:, :Z_P]                                           # (TB, 128)
    logvar = mulv[:, Z_P:]                                       # (TB, 128)

    # reparameterize: z = mu + u * exp(0.5 * logvar)   (f32 elementwise)
    z = mu + u_ref[...].astype(jnp.float32) * jnp.exp(0.5 * logvar)

    # decoder: Linear(128pad -> 512pad) + ReLU, Linear(512pad -> 896pad) + Sigmoid
    d1 = jnp.dot(z.astype(cdt), w_d1_ref[...],
                 preferred_element_type=jnp.float32)
    d1 = jnp.maximum(d1 + b_d1_ref[...], 0.0)                    # (TB, 512) f32
    logits = jnp.dot(d1.astype(cdt), w_d2_ref[...],
                     preferred_element_type=jnp.float32) + b_d2_ref[...]

    # store X_bar un-padded: 6 dense vregs + one masked 16-lane tail per row
    xbar_ref[...] = jax.nn.sigmoid(logits[:, :IN_DIM])           # (TB, 784)
    mu_ref[...] = mu                                             # lane-dense
    logvar_ref[...] = logvar                                     # lane-dense


@jax.jit
def mlp_vae_forward(x_nchw, u, padded_params):
    """x_nchw: (B, 1, 28, 28) f32 (or bf16);  u: (B, Z_DIM) standard-normal noise.

    padded_params: output of prepare_params().
    Returns (X_bar (B, 784), mu (B, 20), logvar (B, 20)), all f32.
    """
    B = x_nchw.shape[0]
    x = x_nchw.reshape(B, IN_DIM)          # same as torch .view(B, -1), row-major

    # tiny noise tensor padded to a full 128-lane block (padded z columns hit
    # all-zero rows of w_d1, so the math stays exact)
    u_p = jnp.pad(u, ((0, 0), (0, Z_P - Z_DIM)))

    (w_enc, b_enc, w_mulv, b_mulv, w_d1, b_d1, w_d2, b_d2) = padded_params

    # >= 2 grid steps whenever B > 8 (keeps both v7x TCs busy), capped at 512
    # rows to amortize per-step overhead on v5e/v6e; Pallas masks the ragged
    # boundary block, so no full-batch jnp.pad of x is needed.
    tb = min(MAX_BATCH_TILE, _round_up(pl.cdiv(B, 2), 8))
    grid = (pl.cdiv(B, tb),)

    def batch_spec(feat):
        return pl.BlockSpec((tb, feat), lambda i: (i, 0))

    def weight_spec(shape):
        # Constant index_map -> DMA'd once, resident in VMEM across the grid;
        # Buffered(1) drops the never-used second pipeline buffer.
        return pl.BlockSpec(shape, lambda i: (0, 0),
                            pipeline_mode=pl.Buffered(1))

    out_shapes = (
        jax.ShapeDtypeStruct((B, IN_DIM), jnp.float32),  # X_bar (un-padded)
        jax.ShapeDtypeStruct((B, Z_P), jnp.float32),     # mu     (lane-padded)
        jax.ShapeDtypeStruct((B, Z_P), jnp.float32),     # logvar (lane-padded)
    )

    xbar, mu, logvar = pl.pallas_call(
        _vae_kernel,
        out_shape=out_shapes,
        grid_spec=pltpu.PrefetchScalarGridSpec(
            num_scalar_prefetch=0,
            grid=grid,
            in_specs=[
                batch_spec(IN_DIM),                    # x   (K = 784, exact)
                batch_spec(Z_P),                       # u   (padded to 128)
                weight_spec((IN_DIM, H_P)),            # w_enc
                weight_spec((1, H_P)),                 # b_enc
                weight_spec((H_P, 2 * Z_P)),           # w_mulv = [mu | logvar]
                weight_spec((1, 2 * Z_P)),             # b_mulv
                weight_spec((Z_P, H_P)),               # w_d1
                weight_spec((1, H_P)),                 # b_d1
                weight_spec((H_P, OUT_P)),             # w_d2
                weight_spec((1, OUT_P)),               # b_d2
            ],
            out_specs=[
                batch_spec(IN_DIM),
                batch_spec(Z_P),
                batch_spec(Z_P),
            ],
        ),
        compiler_params=pltpu.CompilerParams(
            dimension_semantics=("parallel",),   # batch axis -> megacore / 2-TC
            vmem_limit_bytes=48 * 1024 * 1024,   # covers tb=512 (v5e default is 16 MiB)
        ),
    )(x, u_p, w_enc, b_enc, w_mulv, b_mulv, w_d1, b_d1, w_d2, b_d2)

    # slice only the tiny lane padding of mu/logvar back off
    return xbar, mu[:, :Z_DIM], logvar[:, :Z_DIM]


def init_params(key):
    """PyTorch-default init: U(-1/sqrt(fan_in), 1/sqrt(fan_in)).

    Weights are stored as (in_features, out_features) — i.e. torch W.T.
    Biases are stored as (1, out_features) for in-kernel broadcasting.
    """
    def linear(key, fan_in, fan_out):
        kw, kb = jax.random.split(key)
        bound = 1.0 / jnp.sqrt(jnp.float32(fan_in))
        w = jax.random.uniform(kw, (fan_in, fan_out), jnp.float32, -bound, bound)
        b = jax.random.uniform(kb, (1, fan_out), jnp.float32, -bound, bound)
        return w, b

    keys = jax.random.split(key, 5)
    w_enc, b_enc = linear(keys[0], IN_DIM, H_DIM)   # encoder Linear(784, 400)
    w_mu, b_mu = linear(keys[1], H_DIM, Z_DIM)      # fc_mu
    w_lv, b_lv = linear(keys[2], H_DIM, Z_DIM)      # fc_logvar
    w_d1, b_d1 = linear(keys[3], Z_DIM, H_DIM)      # decoder Linear(20, 400)
    w_d2, b_d2 = linear(keys[4], H_DIM, IN_DIM)     # decoder Linear(400, 784)
    return (w_enc, b_enc, w_mu, b_mu, w_lv, b_lv, w_d1, b_d1, w_d2, b_d2)


def prepare_params(params, weight_dtype=jnp.bfloat16):
    """One-time prep: zero-pad feature dims to 128-lane multiples, fuse
    fc_mu/fc_logvar, and cast weight matrices to the matmul-input dtype
    (bf16 default — native MXU dtype on v5e/v6e/v7x, halves weight DMA).
    Biases stay f32 (elementwise math runs in f32)."""
    (w_enc, b_enc, w_mu, b_mu, w_lv, b_lv, w_d1, b_d1, w_d2, b_d2) = params

    def pad2(a, rows, cols):
        return jnp.pad(a, ((0, rows - a.shape[0]), (0, cols - a.shape[1])))

    w_enc_p = pad2(w_enc, IN_DIM, H_P)                               # (784, 512)
    b_enc_p = pad2(b_enc, 1, H_P)
    w_mulv = pad2(jnp.concatenate([pad2(w_mu, H_DIM, Z_P),
                                   pad2(w_lv, H_DIM, Z_P)], axis=1),
                  H_P, 2 * Z_P)                                      # (512, 256)
    b_mulv = jnp.concatenate([pad2(b_mu, 1, Z_P), pad2(b_lv, 1, Z_P)], axis=1)
    w_d1_p = pad2(w_d1, Z_P, H_P)                                    # (128, 512)
    b_d1_p = pad2(b_d1, 1, H_P)
    w_d2_p = pad2(w_d2, H_P, OUT_P)                                  # (512, 896)
    b_d2_p = pad2(b_d2, 1, OUT_P)

    cast = lambda w: w.astype(weight_dtype)
    return (cast(w_enc_p), b_enc_p, cast(w_mulv), b_mulv,
            cast(w_d1_p), b_d1_p, cast(w_d2_p), b_d2_p)


if __name__ == "__main__":
    key = jax.random.PRNGKey(0)
    k_x, k_u, k_p = jax.random.split(key, 3)

    B = 2
    x = jax.random.normal(k_x, (B, 1, 28, 28), jnp.float32)   # NCHW, MNIST-shaped
    u = jax.random.normal(k_u, (B, Z_DIM), jnp.float32)       # reparam. noise
    params = init_params(k_p)

    # ---- pure-JAX reference (logical, unpadded f32 weights) ----
    (w_enc, b_enc, w_mu, b_mu, w_lv, b_lv, w_d1, b_d1, w_d2, b_d2) = params
    xf = x.reshape(B, -1)
    h = jnp.maximum(xf @ w_enc + b_enc, 0.0)
    mu_r = h @ w_mu + b_mu
    lv_r = h @ w_lv + b_lv
    z_r = mu_r + u * jnp.exp(0.5 * lv_r)
    d1 = jnp.maximum(z_r @ w_d1 + b_d1, 0.0)
    xbar_r = jax.nn.sigmoid(d1 @ w_d2 + b_d2)

    # ---- f32-weight kernel (exactness check) ----
    pp32 = prepare_params(params, jnp.float32)
    xbar, mu, logvar = mlp_vae_forward(x, u, pp32)
    jax.block_until_ready((xbar, mu, logvar))
    assert xbar.shape == (B, IN_DIM)
    assert mu.shape == (B, Z_DIM)
    assert logvar.shape == (B, Z_DIM)
    assert jnp.allclose(xbar, xbar_r, atol=1e-4)
    assert jnp.allclose(mu, mu_r, atol=1e-4)
    assert jnp.allclose(logvar, lv_r, atol=1e-4)

    # ---- default bf16-weight kernel, meaningful (non-vacuous) tolerances ----
    pp16 = prepare_params(params)                      # bf16 default
    xbar_b, mu_b, lv_b = mlp_vae_forward(x, u, pp16)
    jax.block_until_ready((xbar_b, mu_b, lv_b))
    assert jnp.allclose(xbar_b, xbar_r, atol=2e-2)     # sigmoid outputs in (0,1)
    assert jnp.allclose(mu_b, mu_r, atol=5e-2)
    assert jnp.allclose(lv_b, lv_r, atol=5e-2)

    print("KERNEL_OK")
</pallas_src>

<mosaic_0001>
module attributes {stable_mosaic.version = 11 : i64} {
  func.func @_vae_kernel(%arg0: i32, %arg1: memref<8x784xf32, #tpu.memory_space<vmem>>, %arg2: memref<8x128xf32, #tpu.memory_space<vmem>>, %arg3: memref<784x512xf32, #tpu.memory_space<vmem>>, %arg4: memref<1x512xf32, #tpu.memory_space<vmem>>, %arg5: memref<512x256xf32, #tpu.memory_space<vmem>>, %arg6: memref<1x256xf32, #tpu.memory_space<vmem>>, %arg7: memref<128x512xf32, #tpu.memory_space<vmem>>, %arg8: memref<1x512xf32, #tpu.memory_space<vmem>>, %arg9: memref<512x896xf32, #tpu.memory_space<vmem>>, %arg10: memref<1x896xf32, #tpu.memory_space<vmem>>, %arg11: memref<8x784xf32, #tpu.memory_space<vmem>>, %arg12: memref<8x128xf32, #tpu.memory_space<vmem>>, %arg13: memref<8x128xf32, #tpu.memory_space<vmem>>) attributes {dimension_semantics = [#tpu.dimension_semantics<parallel>], iteration_bounds = array<i64: 1>, scalar_prefetch = 0 : i64, scratch_operands = 0 : i64, tpu.core_type = #tpu.core_type<tc>, window_params = [{transform_indices = @transform_0, window_bounds = array<i64: 8, 784>}, {transform_indices = @transform_1, window_bounds = array<i64: 8, 128>}, {pipeline_mode = #tpu.pipeline_mode<synchronous>, transform_indices = @transform_2, window_bounds = array<i64: 784, 512>}, {pipeline_mode = #tpu.pipeline_mode<synchronous>, transform_indices = @transform_3, window_bounds = array<i64: 1, 512>}, {pipeline_mode = #tpu.pipeline_mode<synchronous>, transform_indices = @transform_4, window_bounds = array<i64: 512, 256>}, {pipeline_mode = #tpu.pipeline_mode<synchronous>, transform_indices = @transform_5, window_bounds = array<i64: 1, 256>}, {pipeline_mode = #tpu.pipeline_mode<synchronous>, transform_indices = @transform_6, window_bounds = array<i64: 128, 512>}, {pipeline_mode = #tpu.pipeline_mode<synchronous>, transform_indices = @transform_7, window_bounds = array<i64: 1, 512>}, {pipeline_mode = #tpu.pipeline_mode<synchronous>, transform_indices = @transform_8, window_bounds = array<i64: 512, 896>}, {pipeline_mode = #tpu.pipeline_mode<synchronous>, transform_indices = @transform_9, window_bounds = array<i64: 1, 896>}, {transform_indices = @transform_10, window_bounds = array<i64: 8, 784>}, {transform_indices = @transform_11, window_bounds = array<i64: 8, 128>}, {transform_indices = @transform_12, window_bounds = array<i64: 8, 128>}]} {
    %c0 = arith.constant 0 : index
    %c0_0 = arith.constant 0 : index
    %0 = vector.load %arg1[%c0, %c0_0] : memref<8x784xf32, #tpu.memory_space<vmem>>, vector<8x784xf32>
    %c0_1 = arith.constant 0 : index
    %c0_2 = arith.constant 0 : index
    %1 = vector.load %arg3[%c0_1, %c0_2] : memref<784x512xf32, #tpu.memory_space<vmem>>, vector<784x512xf32>
    %cst = arith.constant dense<0.000000e+00> : vector<8x512xf32>
    %2 = tpu.matmul %0, %1, %cst {dimension_numbers = #tpu.dot_dimension_numbers<[1], [0], [0], [1], [0, 0, 1, 1], [], []>} : vector<8x784xf32>, vector<784x512xf32>, vector<8x512xf32> -> vector<8x512xf32>
    %c0_3 = arith.constant 0 : index
    %c0_4 = arith.constant 0 : index
    %3 = vector.load %arg4[%c0_3, %c0_4] : memref<1x512xf32, #tpu.memory_space<vmem>>, vector<1x512xf32>
    %4 = vector.broadcast %3 : vector<1x512xf32> to vector<8x512xf32>
    %5 = arith.addf %2, %4 : vector<8x512xf32>
    %cst_5 = arith.constant 0.000000e+00 : f32
    %6 = vector.broadcast %cst_5 : f32 to vector<8x512xf32>
    %7 = arith.maximumf %5, %6 : vector<8x512xf32>
    %c0_6 = arith.constant 0 : index
    %c0_7 = arith.constant 0 : index
    %8 = vector.load %arg5[%c0_6, %c0_7] : memref<512x256xf32, #tpu.memory_space<vmem>>, vector<512x256xf32>
    %cst_8 = arith.constant dense<0.000000e+00> : vector<8x256xf32>
    %9 = tpu.matmul %7, %8, %cst_8 {dimension_numbers = #tpu.dot_dimension_numbers<[1], [0], [0], [1], [0, 0, 1, 1], [], []>} : vector<8x512xf32>, vector<512x256xf32>, vector<8x256xf32> -> vector<8x256xf32>
    %c0_9 = arith.constant 0 : index
    %c0_10 = arith.constant 0 : index
    %10 = vector.load %arg6[%c0_9, %c0_10] : memref<1x256xf32, #tpu.memory_space<vmem>>, vector<1x256xf32>
    %11 = vector.broadcast %10 : vector<1x256xf32> to vector<8x256xf32>
    %12 = arith.addf %9, %11 : vector<8x256xf32>
    %13 = vector.extract_strided_slice %12 {offsets = [0, 0], sizes = [8, 128], strides = [1, 1]} : vector<8x256xf32> to vector<8x128xf32>
    %14 = vector.extract_strided_slice %12 {offsets = [0, 128], sizes = [8, 128], strides = [1, 1]} : vector<8x256xf32> to vector<8x128xf32>
    %c0_11 = arith.constant 0 : index
    %c0_12 = arith.constant 0 : index
    %15 = vector.load %arg2[%c0_11, %c0_12] : memref<8x128xf32, #tpu.memory_space<vmem>>, vector<8x128xf32>
    %cst_13 = arith.constant 5.000000e-01 : f32
    %16 = vector.broadcast %cst_13 : f32 to vector<8x128xf32>
    %17 = arith.mulf %16, %14 : vector<8x128xf32>
    %18 = math.exp %17 : vector<8x128xf32>
    %19 = arith.mulf %15, %18 : vector<8x128xf32>
    %20 = arith.addf %13, %19 : vector<8x128xf32>
    %c0_14 = arith.constant 0 : index
    %c0_15 = arith.constant 0 : index
    %21 = vector.load %arg7[%c0_14, %c0_15] : memref<128x512xf32, #tpu.memory_space<vmem>>, vector<128x512xf32>
    %cst_16 = arith.constant dense<0.000000e+00> : vector<8x512xf32>
    %22 = tpu.matmul %20, %21, %cst_16 {dimension_numbers = #tpu.dot_dimension_numbers<[1], [0], [0], [1], [0, 0, 1, 1], [], []>} : vector<8x128xf32>, vector<128x512xf32>, vector<8x512xf32> -> vector<8x512xf32>
    %c0_17 = arith.constant 0 : index
    %c0_18 = arith.constant 0 : index
    %23 = vector.load %arg8[%c0_17, %c0_18] : memref<1x512xf32, #tpu.memory_space<vmem>>, vector<1x512xf32>
    %24 = vector.broadcast %23 : vector<1x512xf32> to vector<8x512xf32>
    %25 = arith.addf %22, %24 : vector<8x512xf32>
    %cst_19 = arith.constant 0.000000e+00 : f32
    %26 = vector.broadcast %cst_19 : f32 to vector<8x512xf32>
    %27 = arith.maximumf %25, %26 : vector<8x512xf32>
    %c0_20 = arith.constant 0 : index
    %c0_21 = arith.constant 0 : index
    %28 = vector.load %arg9[%c0_20, %c0_21] : memref<512x896xf32, #tpu.memory_space<vmem>>, vector<512x896xf32>
    %cst_22 = arith.constant dense<0.000000e+00> : vector<8x896xf32>
    %29 = tpu.matmul %27, %28, %cst_22 {dimension_numbers = #tpu.dot_dimension_numbers<[1], [0], [0], [1], [0, 0, 1, 1], [], []>} : vector<8x512xf32>, vector<512x896xf32>, vector<8x896xf32> -> vector<8x896xf32>
    %c0_23 = arith.constant 0 : index
    %c0_24 = arith.constant 0 : index
    %30 = vector.load %arg10[%c0_23, %c0_24] : memref<1x896xf32, #tpu.memory_space<vmem>>, vector<1x896xf32>
    %31 = vector.broadcast %30 : vector<1x896xf32> to vector<8x896xf32>
    %32 = arith.addf %29, %31 : vector<8x896xf32>
    %33 = vector.extract_strided_slice %32 {offsets = [0, 0], sizes = [8, 784], strides = [1, 1]} : vector<8x896xf32> to vector<8x784xf32>
    %34 = arith.negf %33 : vector<8x784xf32>
    %35 = math.exp %34 : vector<8x784xf32>
    %cst_25 = arith.constant 1.000000e+00 : f32
    %36 = vector.broadcast %cst_25 : f32 to vector<8x784xf32>
    %37 = arith.addf %36, %35 : vector<8x784xf32>
    %38 = arith.divf %36, %37 : vector<8x784xf32>
    %c0_26 = arith.constant 0 : index
    %c0_27 = arith.constant 0 : index
    %39 = vector.load %arg11[%c0_26, %c0_27] : memref<8x784xf32, #tpu.memory_space<vmem>>, vector<8x784xf32>
    tpu.vector_store %arg11[%c0_26, %c0_27], %38 {strides = array<i32>} : memref<8x784xf32, #tpu.memory_space<vmem>>, vector<8x784xf32>,
    %c0_28 = arith.constant 0 : index
    %c0_29 = arith.constant 0 : index
    %40 = vector.load %arg12[%c0_28, %c0_29] : memref<8x128xf32, #tpu.memory_space<vmem>>, vector<8x128xf32>
    tpu.vector_store %arg12[%c0_28, %c0_29], %13 {strides = array<i32>} : memref<8x128xf32, #tpu.memory_space<vmem>>, vector<8x128xf32>,
    %c0_30 = arith.constant 0 : index
    %c0_31 = arith.constant 0 : index
    %41 = vector.load %arg13[%c0_30, %c0_31] : memref<8x128xf32, #tpu.memory_space<vmem>>, vector<8x128xf32>
    tpu.vector_store %arg13[%c0_30, %c0_31], %14 {strides = array<i32>} : memref<8x128xf32, #tpu.memory_space<vmem>>, vector<8x128xf32>,
    return
  }
  func.func @transform_0(%arg0: i32) -> (i32, i32) {
    %c0_i32 = arith.constant 0 : i32
    %c0_i32_0 = arith.constant 0 : i32
    return %arg0, %c0_i32 : i32, i32
  }
  func.func @transform_1(%arg0: i32) -> (i32, i32) {
    %c0_i32 = arith.constant 0 : i32
    %c0_i32_0 = arith.constant 0 : i32
    return %arg0, %c0_i32 : i32, i32
  }
  func.func @transform_2(%arg0: i32) -> (i32, i32) {
    %c0_i32 = arith.constant 0 : i32
    %c0_i32_0 = arith.constant 0 : i32
    %c0_i32_1 = arith.constant 0 : i32
    return %c0_i32, %c0_i32_0 : i32, i32
  }
  func.func @transform_3(%arg0: i32) -> (i32, i32) {
    %c0_i32 = arith.constant 0 : i32
    %c0_i32_0 = arith.constant 0 : i32
    %c0_i32_1 = arith.constant 0 : i32
    return %c0_i32, %c0_i32_0 : i32, i32
  }
  func.func @transform_4(%arg0: i32) -> (i32, i32) {
    %c0_i32 = arith.constant 0 : i32
    %c0_i32_0 = arith.constant 0 : i32
    %c0_i32_1 = arith.constant 0 : i32
    return %c0_i32, %c0_i32_0 : i32, i32
  }
  func.func @transform_5(%arg0: i32) -> (i32, i32) {
    %c0_i32 = arith.constant 0 : i32
    %c0_i32_0 = arith.constant 0 : i32
    %c0_i32_1 = arith.constant 0 : i32
    return %c0_i32, %c0_i32_0 : i32, i32
  }
  func.func @transform_6(%arg0: i32) -> (i32, i32) {
    %c0_i32 = arith.constant 0 : i32
    %c0_i32_0 = arith.constant 0 : i32
    %c0_i32_1 = arith.constant 0 : i32
    return %c0_i32, %c0_i32_0 : i32, i32
  }
  func.func @transform_7(%arg0: i32) -> (i32, i32) {
    %c0_i32 = arith.constant 0 : i32
    %c0_i32_0 = arith.constant 0 : i32
    %c0_i32_1 = arith.constant 0 : i32
    return %c0_i32, %c0_i32_0 : i32, i32
  }
  func.func @transform_8(%arg0: i32) -> (i32, i32) {
    %c0_i32 = arith.constant 0 : i32
    %c0_i32_0 = arith.constant 0 : i32
    %c0_i32_1 = arith.constant 0 : i32
    return %c0_i32, %c0_i32_0 : i32, i32
  }
  func.func @transform_9(%arg0: i32) -> (i32, i32) {
    %c0_i32 = arith.constant 0 : i32
    %c0_i32_0 = arith.constant 0 : i32
    %c0_i32_1 = arith.constant 0 : i32
    return %c0_i32, %c0_i32_0 : i32, i32
  }
  func.func @transform_10(%arg0: i32) -> (i32, i32) {
    %c0_i32 = arith.constant 0 : i32
    %c0_i32_0 = arith.constant 0 : i32
    return %arg0, %c0_i32 : i32, i32
  }
  func.func @transform_11(%arg0: i32) -> (i32, i32) {
    %c0_i32 = arith.constant 0 : i32
    %c0_i32_0 = arith.constant 0 : i32
    return %arg0, %c0_i32 : i32, i32
  }
  func.func @transform_12(%arg0: i32) -> (i32, i32) {
    %c0_i32 = arith.constant 0 : i32
    %c0_i32_0 = arith.constant 0 : i32
    return %arg0, %c0_i32 : i32, i32
  }
}

</mosaic_0001>

<bundles_post_ra>
// kernel: mlp_vae_forward.1
= control target key start
LH: loop header
LB: loop body
LE: loop exit
PB: predicated region body
PF: predicated region fallthrough
CT: control target
= control target key end

     0   :  { %18 = vsyncpa [#allocation3], 0  ;;  %s4848_s0 = inlined_call_operand.vmem [shape: f32[2,784], index: 0, kind: input, shape index: {}]   ;;  %s4849_s1 = inlined_call_operand.vmem [shape: f32[2,128], index: 1, kind: input, shape index: {}]   ;;  %s4850_s2 = inlined_call_operand.hbm [shape: f32[784,512], index: 2, kind: input, shape index: {}]   ;;  %s4851_s3 = inlined_call_operand.hbm [shape: f32[1,512], index: 3, kind: input, shape index: {}]   ;;  %s4852_s4 = inlined_call_operand.hbm [shape: f32[512,256], index: 4, kind: input, shape index: {}]   ;;  %s4853_s5 = inlined_call_operand.hbm [shape: f32[1,256], index: 5, kind: input, shape index: {}]   ;;  %s4854_s6 = inlined_call_operand.hbm [shape: f32[128,512], index: 6, kind: input, shape index: {}]   ;;  %s4855_s7 = inlined_call_operand.hbm [shape: f32[1,512], index: 7, kind: input, shape index: {}]   ;;  %s4856_s8 = inlined_call_operand.hbm [shape: f32[512,896], index: 8, kind: input, shape index: {}]   ;;  %s4857_s9 = inlined_call_operand.hbm [shape: f32[1,896], index: 9, kind: input, shape index: {}]   ;;  %s4858_s10 = inlined_call_operand.hbm [shape: f32[2,784], index: 10, kind: output, shape index: {0}]   ;;  %s4859_s11 = inlined_call_operand.hbm [shape: f32[2,128], index: 11, kind: output, shape index: {1}]   ;;  %s4860_s12 = inlined_call_operand.hbm [shape: f32[2,128], index: 12, kind: output, shape index: {2}]  }
   0x1   :  { %19 = vsyncpa [#allocation6], 0 }
   0x2   :  { %20 = vsyncpa [#allocation9], 0 }
   0x3   :  { %21 = vsyncpa [#allocation12], 0 }
   0x4   :  { %22 = vsyncpa [#allocation15], 0 }
   0x5   :  { %23 = vsyncpa [#allocation4], 0 }
   0x6   :  { %24 = vsyncpa [#allocation18], 0  ;;  %s4452_s21 = smov [#allocation5]   ;;  %s4453_s23 = smov [#allocation8]  }
   0x7   :  { %s47_s22 = sshll.u32 %s4452_s21, 4  ;;  %s69_s24 = sshll.u32 %s4453_s23, 4  ;;  %s48_s22 = int_to_ptr.vmem [resolvable:$true] %s47_s22  ;;  %s70_s24 = int_to_ptr.vmem [resolvable:$true] %s69_s24 }
   0x8   :  { %s4196_s27 = scalar_lea.hbm %s4851_s3, 64 }
   0x9   :  { %p4197_p0 = scmp.ne.s32.totalorder %s4851_s3, %s4196_s27  ;;  %p4200_p1 = scmp.lt.u32.totalorder %s4196_s27, %s4851_s3 }
   0xb   :  { %p4202_p2 = pnand %p4200_p1, %p4197_p0 }
   0xd   :  { %4205 = shalt.err (!%p4202_p2)
}
   0xe   :  { %s4206_s14 = scalar_lea.vmem %s48_s22, 64  ;;  %p4211_p4 = scmp.lt.s32.totalorder %s48_s22, %s48_s22 }
   0xf   :  { %p4207_p3 = scmp.ne.s32.totalorder %s48_s22, %s4206_s14  ;;  %p4212_p5 = scmp.lt.s32.totalorder %s4206_s14, %s4206_s14 }
  0x11   :  { %p4213_p6 = por %p4212_p5, %p4211_p4 }
  0x13   :  { %p4214_p7 = pnand %p4213_p6, %p4207_p3 }
  0x15   :  { %4217 = shalt.err (!%p4214_p7)
}
  0x16   :  { %50 = dma.hbm_to_vmem [thread:$0]  %s4851_s3, 64, %s48_s22, [#allocation6]  }
  0x17   :  { %s4218_s19 = scalar_lea.hbm %s4853_s5, 32 }
  0x18   :  { %p4219_p8 = scmp.ne.s32.totalorder %s4853_s5, %s4218_s19  ;;  %p4222_p9 = scmp.lt.u32.totalorder %s4218_s19, %s4853_s5 }
  0x1a   :  { %p4224_p10 = pnand %p4222_p9, %p4219_p8 }
  0x1c   :  { %4227 = shalt.err (!%p4224_p10)
}
  0x1d   :  { %s4228_s26 = scalar_lea.vmem %s70_s24, 32  ;;  %p4233_p12 = scmp.lt.s32.totalorder %s70_s24, %s70_s24 }
  0x1e   :  { %p4229_p11 = scmp.ne.s32.totalorder %s70_s24, %s4228_s26  ;;  %p4234_p13 = scmp.lt.s32.totalorder %s4228_s26, %s4228_s26 }
  0x20   :  { %p4235_p0 = por %p4234_p13, %p4233_p12 }
  0x22   :  { %p4236_p1 = pnand %p4235_p0, %p4229_p11 }
  0x24   :  { %4239 = shalt.err (!%p4236_p1)
}
  0x25   :  { %72 = dma.hbm_to_vmem [thread:$0]  %s4853_s5, 32, %s70_s24, [#allocation9]  }
  0x26   :  { %s4454_s27 = smov [#allocation11]   ;;  %s4455_s29 = smov [#allocation2]  }
  0x27   :  { %s91_s28 = sshll.u32 %s4454_s27, 4  ;;  %s34_s30 = sshll.u32 %s4455_s29, 4  ;;  %s92_s28 = int_to_ptr.vmem [resolvable:$true] %s91_s28  ;;  %s4563_s30 = int_to_ptr.vmem [resolvable:$true] %s34_s30 }
  0x28   :  { %s4240_s15 = scalar_lea.hbm %s4855_s7, 64 }
  0x29   :  { %p4241_p2 = scmp.ne.s32.totalorder %s4855_s7, %s4240_s15  ;;  %p4244_p3 = scmp.lt.u32.totalorder %s4240_s15, %s4855_s7 }
  0x2b   :  { %p4246_p4 = pnand %p4244_p3, %p4241_p2 }
  0x2d   :  { %4249 = shalt.err (!%p4246_p4)
}
  0x2e   :  { %s4250_s5 = scalar_lea.vmem %s92_s28, 64  ;;  %p4255_p6 = scmp.lt.s32.totalorder %s92_s28, %s92_s28 }
  0x2f   :  { %p4251_p5 = scmp.ne.s32.totalorder %s92_s28, %s4250_s5  ;;  %p4256_p7 = scmp.lt.s32.totalorder %s4250_s5, %s4250_s5 }
  0x31   :  { %p4257_p8 = por %p4256_p7, %p4255_p6 }
  0x33   :  { %p4258_p9 = pnand %p4257_p8, %p4251_p5 }
  0x35   :  { %4261 = shalt.err (!%p4258_p9)
}
  0x36   :  { %94 = dma.hbm_to_vmem [thread:$0]  %s4855_s7, 64, %s92_s28, [#allocation12]  }
  0x37   :  { %s4262_s25 = scalar_lea.hbm %s4850_s2, 50176 }
  0x38   :  { %p4263_p10 = scmp.ne.s32.totalorder %s4850_s2, %s4262_s25  ;;  %p4266_p11 = scmp.lt.u32.totalorder %s4262_s25, %s4850_s2 }
  0x3a   :  { %p4268_p12 = pnand %p4266_p11, %p4263_p10 }
  0x3c   :  { %4271 = shalt.err (!%p4268_p12)
}
  0x3d   :  { %s4272_s29 = scalar_lea.vmem %s4563_s30, 50176  ;;  %p4277_p0 = scmp.lt.s32.totalorder %s4563_s30, %s4563_s30 }
  0x3e   :  { %p4273_p13 = scmp.ne.s32.totalorder %s4563_s30, %s4272_s29  ;;  %p4278_p1 = scmp.lt.s32.totalorder %s4272_s29, %s4272_s29 }
  0x40   :  { %p4279_p2 = por %p4278_p1, %p4277_p0 }
  0x42   :  { %p4280_p3 = pnand %p4279_p2, %p4273_p13 }
  0x44   :  { %4283 = shalt.err (!%p4280_p3)
}
  0x45   :  { %s4456_s7 = smov 512   ;;  %s4457_s28 = smov 32  }
  0x46   :  { %40 = dma.hbm_to_vmem [thread:$0]  %s4850_s2, 50176, %s4563_s30, [#allocation3], %s4456_s7, %s4456_s7, %s4457_s28  }
  0x47   :  { %s4458_s15 = smov [#allocation7]   ;;  %s4284_s19 = scalar_lea.hbm %s4852_s4, 16384 }
  0x48   :  { %s56_s16 = sshll.u32 %s4458_s15, 4  ;;  %p4285_p4 = scmp.ne.s32.totalorder %s4852_s4, %s4284_s19  ;;  %s57_s16 = int_to_ptr.vmem [resolvable:$true] %s56_s16 }
  0x49   :  { %p4288_p5 = scmp.lt.u32.totalorder %s4284_s19, %s4852_s4 }
  0x4b   :  { %p4290_p6 = pnand %p4288_p5, %p4285_p4 }
  0x4d   :  { %4293 = shalt.err (!%p4290_p6)
}
  0x4e   :  { %s4294_s23 = scalar_lea.vmem %s57_s16, 16384  ;;  %p4299_p8 = scmp.lt.s32.totalorder %s57_s16, %s57_s16 }
  0x4f   :  { %p4295_p7 = scmp.ne.s32.totalorder %s57_s16, %s4294_s23  ;;  %p4300_p9 = scmp.lt.s32.totalorder %s4294_s23, %s4294_s23 }
  0x51   :  { %p4301_p10 = por %p4300_p9, %p4299_p8 }
  0x53   :  { %p4302_p11 = pnand %p4301_p10, %p4295_p7 }
  0x55   :  { %4305 = shalt.err (!%p4302_p11)
}
  0x56   :  { %s4459_s2 = smov 256   ;;  %s4460_s30 = smov 16  }
  0x57   :  { %62 = dma.hbm_to_vmem [thread:$0]  %s4852_s4, 16384, %s57_s16, [#allocation6], %s4459_s2, %s4459_s2, %s4460_s30  }
  0x58   :  { %s4461_s3 = smov [#allocation10]   ;;  %s4462_s27 = smov [#allocation13]  }
  0x59   :  { %s78_s22 = sshll.u32 %s4461_s3, 4  ;;  %s100_s29 = sshll.u32 %s4462_s27, 4  ;;  %s79_s22 = int_to_ptr.vmem [resolvable:$true] %s78_s22  ;;  %s101_s29 = int_to_ptr.vmem [resolvable:$true] %s100_s29 }
  0x5a   :  { %s4306_s15 = scalar_lea.hbm %s4854_s6, 8192 }
  0x5b   :  { %p4307_p12 = scmp.ne.s32.totalorder %s4854_s6, %s4306_s15  ;;  %p4310_p13 = scmp.lt.u32.totalorder %s4306_s15, %s4854_s6 }
  0x5d   :  { %p4312_p0 = pnand %p4310_p13, %p4307_p12 }
  0x5f   :  { %4315 = shalt.err (!%p4312_p0)
}
  0x60   :  { %s4316_s4 = scalar_lea.vmem %s79_s22, 8192  ;;  %p4321_p2 = scmp.lt.s32.totalorder %s79_s22, %s79_s22 }
  0x61   :  { %p4317_p1 = scmp.ne.s32.totalorder %s79_s22, %s4316_s4  ;;  %p4322_p3 = scmp.lt.s32.totalorder %s4316_s4, %s4316_s4 }
  0x63   :  { %p4323_p4 = por %p4322_p3, %p4321_p2 }
  0x65   :  { %p4324_p5 = pnand %p4323_p4, %p4317_p1 }
  0x67   :  { %4327 = shalt.err (!%p4324_p5)
}
  0x68   :  { %84 = dma.hbm_to_vmem [thread:$0]  %s4854_s6, 8192, %s79_s22, [#allocation9], %s4456_s7, %s4456_s7, %s4457_s28  }
  0x69   :  { %s4328_s23 = scalar_lea.hbm %s4856_s8, 57344 }
  0x6a   :  { %p4329_p6 = scmp.ne.s32.totalorder %s4856_s8, %s4328_s23  ;;  %p4332_p7 = scmp.lt.u32.totalorder %s4328_s23, %s4856_s8 }
  0x6c   :  { %p4334_p8 = pnand %p4332_p7, %p4329_p6 }
  0x6e   :  { %4337 = shalt.err (!%p4334_p8)
}
  0x6f   :  { %s4338_s3 = scalar_lea.vmem %s101_s29, 57344  ;;  %p4343_p10 = scmp.lt.s32.totalorder %s101_s29, %s101_s29 }
  0x70   :  { %p4339_p9 = scmp.ne.s32.totalorder %s101_s29, %s4338_s3  ;;  %p4344_p11 = scmp.lt.s32.totalorder %s4338_s3, %s4338_s3 }
  0x72   :  { %p4345_p12 = por %p4344_p11, %p4343_p10 }
  0x74   :  { %p4346_p13 = pnand %p4345_p12, %p4339_p9 }
  0x76   :  { %4349 = shalt.err (!%p4346_p13)
}
  0x77   :  { %s4463_s6 = smov 896   ;;  %s4464_s7 = smov 56  }
  0x78   :  { %106 = dma.hbm_to_vmem [thread:$0]  %s4856_s8, 57344, %s101_s29, [#allocation12], %s4463_s6, %s4463_s6, %s4464_s7  }
  0x79   :  { %s4465_s13 = smov [#allocation14]   ;;  %s4350_s18 = scalar_lea.hbm %s4857_s9, 112 }
  0x7a   :  { %s113_s14 = sshll.u32 %s4465_s13, 4  ;;  %p4351_p0 = scmp.ne.s32.totalorder %s4857_s9, %s4350_s18  ;;  %s114_s14 = int_to_ptr.vmem [resolvable:$true] %s113_s14 }
  0x7b   :  { %p4354_p1 = scmp.lt.u32.totalorder %s4350_s18, %s4857_s9 }
  0x7d   :  { %p4356_p2 = pnand %p4354_p1, %p4351_p0 }
  0x7f   :  { %4359 = shalt.err (!%p4356_p2)
}
  0x80   :  { %s4360_s24 = scalar_lea.vmem %s114_s14, 112  ;;  %s4364_s8 = scalar_lea.vmem %s114_s14, 128 }
  0x81   :  { %p4361_p3 = scmp.ne.s32.totalorder %s114_s14, %s4360_s24  ;;  %p4365_p4 = scmp.lt.s32.totalorder %s114_s14, %s114_s14 }
  0x82   :  { %p4366_p5 = scmp.lt.s32.totalorder %s4364_s8, %s4360_s24 }
  0x84   :  { %p4367_p6 = por %p4366_p5, %p4365_p4 }
  0x86   :  { %p4368_p7 = pnand %p4367_p6, %p4361_p3 }
  0x88   :  { %4371 = shalt.err (!%p4368_p7)
}
  0x89   :  { %116 = dma.hbm_to_vmem [thread:$0]  %s4857_s9, 112, %s114_s14, [#allocation15]  }
  0x8a   :  { %4438 = dma.done.wait [#allocation3], 50176  }
  0x8b   :  { %4439 = vsyncadd [#allocation3], 4294917120 }
  0x8c   :  { %4440 = dma.done.wait [#allocation6], 16448  }
  0x8d   :  { %4441 = vsyncadd [#allocation6], 4294950848 }
  0x8e   :  { %4442 = dma.done.wait [#allocation9], 8224  }
  0x8f   :  { %4443 = vsyncadd [#allocation9], 4294959072 }
  0x90   :  { %4444 = dma.done.wait [#allocation12], 57408  }
  0x91   :  { %4445 = vsyncadd [#allocation12], 4294909888 }
  0x92   :  { %4446 = dma.done.wait [#allocation15], 112  }
  0x93   :  { %4447 = vsyncadd [#allocation15], 4294967184  ;;  %v150_v0 = vld [vmem:[#allocation2 + $0x8] sm:$0xff]  ;;  %v152_v2 = vld [vmem:[#allocation2 + $0x18] sm:$0xff]  ;;  %vm648_vm0 = vcmask 130048   ;;  %vm2923_vm1 = vcmask 1041408  }
  0x94   :  { %v154_v1 = vld [vmem:[#allocation2 + $0x28] sm:$0xff]  ;;  %v156_v4 = vld [vmem:[#allocation2 + $0x38] sm:$0xff]  ;;  %v149_v5 = vld [vmem:[#allocation2] sm:$0xff]  ;;  %vm2924_vm2 = vcmask 1043458   ;;  %vm2926_vm4 = vcmask 128004  }
  0x95   :  { %v3068_v3 = vpack.c.bf16 %v154_v1, %v150_v0  ;;  %v153_v6 = vld [vmem:[#allocation2 + $0x20] sm:$0xff]  ;;  %v3264_v7 = vpack.c.bf16 %v156_v4, %v152_v2  ;;  %v151_v9 = vld [vmem:[#allocation2 + $0x10] sm:$0xff]  ;;  %v158_v11 = vld [vmem:[#allocation2 + $0x48] sm:$0xff] }
  0x96   :  { %v3070_v8 = vpack.c.bf16 %v153_v6, %v149_v5  ;;  %v155_v10 = vld [vmem:[#allocation2 + $0x30] sm:$0xff]  ;;  %v162_v13 = vld [vmem:[#allocation2 + $0x68] sm:$0xff]  ;;  %v160_v14 = vld [vmem:[#allocation2 + $0x58] sm:$0xff] }
  0x97   :  { %3069 = vmatprep.subr.bf16.mxu0 %v3068_v3  ;;  %v3266_v12 = vpack.c.bf16 %v155_v10, %v151_v9  ;;  %v164_v15 = vld [vmem:[#allocation2 + $0x78] sm:$0xff]  ;;  %3265 = vmatprep.subr.bf16.mxu1 %v3264_v7  ;;  %v3072_v16 = vpack.c.bf16 %v162_v13, %v158_v11  ;;  %v157_v18 = vld [vmem:[#allocation2 + $0x40] sm:$0xff]  ;;  %v159_v20 = vld [vmem:[#allocation2 + $0x50] sm:$0xff] }
  0x98   :  { %3071 = vmatpush1.bf16.msra.mxu0 %v3070_v8  ;;  %v3268_v17 = vpack.c.bf16 %v164_v15, %v160_v14  ;;  %v161_v19 = vld [vmem:[#allocation2 + $0x60] sm:$0xff]  ;;  %v163_v22 = vld [vmem:[#allocation2 + $0x70] sm:$0xff]  ;;  %v166_v23 = vld [vmem:[#allocation2 + $0x88] sm:$0xff] }
  0x99   :  { %3267 = vmatpush1.bf16.msra.mxu1 %v3266_v12  ;;  %v3074_v21 = vpack.c.bf16 %v161_v19, %v157_v18  ;;  %v170_v24 = vld [vmem:[#allocation2 + $0xa8] sm:$0xff]  ;;  %3073 = vmatprep.subr.bf16.mxu0 %v3072_v16  ;;  %v3270_v25 = vpack.c.bf16 %v163_v22, %v159_v20  ;;  %v168_v27 = vld [vmem:[#allocation2 + $0x98] sm:$0xff]  ;;  %v165_v29 = vld [vmem:[#allocation2 + $0x80] sm:$0xff] }
  0x9a   :  { %3269 = vmatprep.subr.bf16.mxu1 %v3268_v17  ;;  %v3076_v26 = vpack.c.bf16 %v170_v24, %v166_v23  ;;  %v172_v28 = vld [vmem:[#allocation2 + $0xb8] sm:$0xff]  ;;  %v169_v31 = vld [vmem:[#allocation2 + $0xa0] sm:$0xff]  ;;  %v167_v32 = vld [vmem:[#allocation2 + $0x90] sm:$0xff] }
  0x9b   :  { %v3272_v30 = vpack.c.bf16 %v172_v28, %v168_v27  ;;  %v171_v33 = vld [vmem:[#allocation2 + $0xb0] sm:$0xff]  ;;  %v3078_v34 = vpack.c.bf16 %v169_v31, %v165_v29  ;;  %v174_v35 = vld [vmem:[#allocation2 + $0xc8] sm:$0xff]  ;;  %v176_v37 = vld [vmem:[#allocation2 + $0xd8] sm:$0xff] }
  0x9c   :  { %3075 = vmatpush1.bf16.msra.mxu0 %v3074_v21  ;;  %v178_v36 = vld [vmem:[#allocation2 + $0xe8] sm:$0xff]  ;;  %v3274_v38 = vpack.c.bf16 %v171_v33, %v167_v32  ;;  %v180_v40 = vld [vmem:[#allocation2 + $0xf8] sm:$0xff]  ;;  %v173_v41 = vld [vmem:[#allocation2 + $0xc0] sm:$0xff] }
  0x9d   :  { %3271 = vmatpush1.bf16.msra.mxu1 %v3270_v25  ;;  %3077 = vmatprep.subr.bf16.mxu0 %v3076_v26  ;;  %v3080_v39 = vpack.c.bf16 %v178_v36, %v174_v35  ;;  %v177_v42 = vld [vmem:[#allocation2 + $0xe0] sm:$0xff]  ;;  %v3276_v43 = vpack.c.bf16 %v180_v40, %v176_v37  ;;  %v175_v44 = vld [vmem:[#allocation2 + $0xd0] sm:$0xff]  ;;  %v182_v46 = vld [vmem:[#allocation2 + $0x108] sm:$0xff] }
  0x9e   :  { %3273 = vmatprep.subr.bf16.mxu1 %v3272_v30  ;;  %v179_v45 = vld [vmem:[#allocation2 + $0xf0] sm:$0xff]  ;;  %v186_v47 = vld [vmem:[#allocation2 + $0x128] sm:$0xff]  ;;  %v184_v48 = vld [vmem:[#allocation2 + $0x118] sm:$0xff]  ;;  %v3082_v50 = vpack.c.bf16 %v177_v42, %v173_v41 }
  0x9f   :  { %v188_v49 = vld [vmem:[#allocation2 + $0x138] sm:$0xff]  ;;  %v3278_v51 = vpack.c.bf16 %v179_v45, %v175_v44  ;;  %v3084_v52 = vpack.c.bf16 %v186_v47, %v182_v46  ;;  %v181_v53 = vld [vmem:[#allocation2 + $0x100] sm:$0xff]  ;;  %v183_v55 = vld [vmem:[#allocation2 + $0x110] sm:$0xff] }
  0xa0   :  { %3079 = vmatpush1.bf16.msra.mxu0 %v3078_v34  ;;  %v185_v54 = vld [vmem:[#allocation2 + $0x120] sm:$0xff]  ;;  %v3280_v56 = vpack.c.bf16 %v188_v49, %v184_v48  ;;  %v187_v57 = vld [vmem:[#allocation2 + $0x130] sm:$0xff]  ;;  %v190_v58 = vld [vmem:[#allocation2 + $0x148] sm:$0xff] }
  0xa1   :  { %3275 = vmatpush1.bf16.msra.mxu1 %v3274_v38  ;;  %3081 = vmatprep.subr.bf16.mxu0 %v3080_v39  ;;  %v194_v59 = vld [vmem:[#allocation2 + $0x168] sm:$0xff]  ;;  %v192_v60 = vld [vmem:[#allocation2 + $0x158] sm:$0xff]  ;;  %v3086_v62 = vpack.c.bf16 %v185_v54, %v181_v53  ;;  %v3282_v63 = vpack.c.bf16 %v187_v57, %v183_v55  ;;  %v189_v1 = vld [vmem:[#allocation2 + $0x140] sm:$0xff]  ;;  %v4466_v57 = vmov 1983009808  }
  0xa2   :  { %3277 = vmatprep.subr.bf16.mxu1 %v3276_v43  ;;  %v196_v61 = vld [vmem:[#allocation2 + $0x178] sm:$0xff]  ;;  %v3088_v0 = vpack.c.bf16 %v194_v59, %v190_v58  ;;  %v193_v2 = vld [vmem:[#allocation2 + $0x160] sm:$0xff]  ;;  %v191_v3 = vld [vmem:[#allocation2 + $0x150] sm:$0xff]  ;;  %v576_v58 = vunpack.c.l.s4 %v4466_v57 }
  0xa3   :  { %v3284_v4 = vpack.c.bf16 %v196_v61, %v192_v60  ;;  %v195_v5 = vld [vmem:[#allocation2 + $0x170] sm:$0xff]  ;;  %v198_v6 = vld [vmem:[#allocation2 + $0x188] sm:$0xff]  ;;  %v200_v8 = vld [vmem:[#allocation2 + $0x198] sm:$0xff]  ;;  %v3090_v10 = vpack.c.bf16 %v193_v2, %v189_v1 }
  0xa4   :  { %3083 = vmatpush1.bf16.msra.mxu0 %v3082_v50  ;;  %v202_v7 = vld [vmem:[#allocation2 + $0x1a8] sm:$0xff]  ;;  %v204_v9 = vld [vmem:[#allocation2 + $0x1b8] sm:$0xff]  ;;  %v3286_v11 = vpack.c.bf16 %v195_v5, %v191_v3  ;;  %v197_v13 = vld [vmem:[#allocation2 + $0x180] sm:$0xff] }
  0xa5   :  { %3279 = vmatpush1.bf16.msra.mxu1 %v3278_v51  ;;  %3085 = vmatprep.subr.bf16.mxu0 %v3084_v52  ;;  %v3092_v12 = vpack.c.bf16 %v202_v7, %v198_v6  ;;  %v201_v14 = vld [vmem:[#allocation2 + $0x1a0] sm:$0xff]  ;;  %v199_v15 = vld [vmem:[#allocation2 + $0x190] sm:$0xff]  ;;  %v3288_v16 = vpack.c.bf16 %v204_v9, %v200_v8  ;;  %v206_v18 = vld [vmem:[#allocation2 + $0x1c8] sm:$0xff]  ;;  %v577_v8 = vunpack.c.0.s8 %v576_v58 }
  0xa6   :  { %3281 = vmatprep.subr.bf16.mxu1 %v3280_v56  ;;  %v203_v17 = vld [vmem:[#allocation2 + $0x1b0] sm:$0xff]  ;;  %v210_v19 = vld [vmem:[#allocation2 + $0x1e8] sm:$0xff]  ;;  %v208_v20 = vld [vmem:[#allocation2 + $0x1d8] sm:$0xff]  ;;  %v3094_v22 = vpack.c.bf16 %v201_v14, %v197_v13  ;;  %v543_v56 = vlaneseq }
  0xa7   :  { %v212_v21 = vld [vmem:[#allocation2 + $0x1f8] sm:$0xff]  ;;  %v3290_v23 = vpack.c.bf16 %v203_v17, %v199_v15  ;;  %v3096_v24 = vpack.c.bf16 %v210_v19, %v206_v18  ;;  %v205_v25 = vld [vmem:[#allocation2 + $0x1c0] sm:$0xff]  ;;  %v207_v27 = vld [vmem:[#allocation2 + $0x1d0] sm:$0xff] }
  0xa8   :  { %3087 = vmatpush1.bf16.msra.mxu0 %v3086_v62  ;;  %v209_v26 = vld [vmem:[#allocation2 + $0x1e0] sm:$0xff]  ;;  %v3292_v28 = vpack.c.bf16 %v212_v21, %v208_v20  ;;  %v211_v29 = vld [vmem:[#allocation2 + $0x1f0] sm:$0xff]  ;;  %v214_v30 = vld [vmem:[#allocation2 + $0x208] sm:$0xff]  ;;  %v4648_v7 = vshrl.u32 %v543_v56, 7 }
  0xa9   :  { %3283 = vmatpush1.bf16.msra.mxu1 %v3282_v63  ;;  %3089 = vmatprep.subr.bf16.mxu0 %v3088_v0  ;;  %v218_v31 = vld [vmem:[#allocation2 + $0x228] sm:$0xff]  ;;  %v216_v32 = vld [vmem:[#allocation2 + $0x218] sm:$0xff]  ;;  %v3098_v34 = vpack.c.bf16 %v209_v26, %v205_v25  ;;  %v3294_v35 = vpack.c.bf16 %v211_v29, %v207_v27  ;;  %v213_v37 = vld [vmem:[#allocation2 + $0x200] sm:$0xff] }
  0xaa   :  { %3285 = vmatprep.subr.bf16.mxu1 %v3284_v4  ;;  %v220_v33 = vld [vmem:[#allocation2 + $0x238] sm:$0xff]  ;;  %v3100_v36 = vpack.c.bf16 %v218_v31, %v214_v30  ;;  %v217_v38 = vld [vmem:[#allocation2 + $0x220] sm:$0xff]  ;;  %v215_v39 = vld [vmem:[#allocation2 + $0x210] sm:$0xff] }
  0xab   :  { %v3296_v40 = vpack.c.bf16 %v220_v33, %v216_v32  ;;  %v219_v41 = vld [vmem:[#allocation2 + $0x230] sm:$0xff]  ;;  %v222_v42 = vld [vmem:[#allocation2 + $0x248] sm:$0xff]  ;;  %v224_v44 = vld [vmem:[#allocation2 + $0x258] sm:$0xff]  ;;  %v3102_v46 = vpack.c.bf16 %v217_v38, %v213_v37 }
  0xac   :  { %3091 = vmatpush1.bf16.msra.mxu0 %v3090_v10  ;;  %v226_v43 = vld [vmem:[#allocation2 + $0x268] sm:$0xff]  ;;  %v228_v45 = vld [vmem:[#allocation2 + $0x278] sm:$0xff]  ;;  %v3298_v47 = vpack.c.bf16 %v219_v41, %v215_v39  ;;  %v221_v49 = vld [vmem:[#allocation2 + $0x240] sm:$0xff] }
  0xad   :  { %3287 = vmatpush1.bf16.msra.mxu1 %v3286_v11  ;;  %3093 = vmatprep.subr.bf16.mxu0 %v3092_v12  ;;  %v3104_v48 = vpack.c.bf16 %v226_v43, %v222_v42  ;;  %v225_v50 = vld [vmem:[#allocation2 + $0x260] sm:$0xff]  ;;  %v223_v51 = vld [vmem:[#allocation2 + $0x250] sm:$0xff]  ;;  %v3300_v52 = vpack.c.bf16 %v228_v45, %v224_v44  ;;  %v230_v54 = vld [vmem:[#allocation2 + $0x288] sm:$0xff] }
  0xae   :  { %3289 = vmatprep.subr.bf16.mxu1 %v3288_v16  ;;  %v227_v53 = vld [vmem:[#allocation2 + $0x270] sm:$0xff]  ;;  %v234_v55 = vld [vmem:[#allocation2 + $0x2a8] sm:$0xff]  ;;  %v232_v59 = vld [vmem:[#allocation2 + $0x298] sm:$0xff]  ;;  %v3106_v61 = vpack.c.bf16 %v225_v50, %v221_v49 }
  0xaf   :  { %v236_v60 = vld [vmem:[#allocation2 + $0x2b8] sm:$0xff]  ;;  %v3302_v62 = vpack.c.bf16 %v227_v53, %v223_v51  ;;  %v3108_v63 = vpack.c.bf16 %v234_v55, %v230_v54  ;;  %v229_v0 = vld [vmem:[#allocation2 + $0x280] sm:$0xff]  ;;  %v231_v2 = vld [vmem:[#allocation2 + $0x290] sm:$0xff] }
  0xb0   :  { %3095 = vmatpush1.bf16.msra.mxu0 %v3094_v22  ;;  %v233_v1 = vld [vmem:[#allocation2 + $0x2a0] sm:$0xff]  ;;  %v3304_v3 = vpack.c.bf16 %v236_v60, %v232_v59  ;;  %v235_v4 = vld [vmem:[#allocation2 + $0x2b0] sm:$0xff]  ;;  %v238_v5 = vld [vmem:[#allocation2 + $0x2c8] sm:$0xff] }
  0xb1   :  { %3291 = vmatpush1.bf16.msra.mxu1 %v3290_v23  ;;  %3097 = vmatprep.subr.bf16.mxu0 %v3096_v24  ;;  %v242_v6 = vld [vmem:[#allocation2 + $0x2e8] sm:$0xff]  ;;  %v240_v9 = vld [vmem:[#allocation2 + $0x2d8] sm:$0xff]  ;;  %v3110_v11 = vpack.c.bf16 %v233_v1, %v229_v0  ;;  %v237_v12 = vld [vmem:[#allocation2 + $0x2c0] sm:$0xff]  ;;  %v3306_v15 = vpack.c.bf16 %v235_v4, %v231_v2  ;;  %v4651_v23 = vsub.s32 %v577_v8, %v4648_v7 }
  0xb2   :  { %3293 = vmatprep.subr.bf16.mxu1 %v3292_v28  ;;  %v244_v10 = vld [vmem:[#allocation2 + $0x2f8] sm:$0xff]  ;;  %v241_v13 = vld [vmem:[#allocation2 + $0x2e0] sm:$0xff]  ;;  %v239_v14 = vld [vmem:[#allocation2 + $0x2d0] sm:$0xff]  ;;  %v3112_v16 = vpack.c.bf16 %v242_v6, %v238_v5 }
  0xb3   :  { %v243_v17 = vld [vmem:[#allocation2 + $0x2f0] sm:$0xff]  ;;  %v246_v18 = vld [vmem:[#allocation2 + $0x308] sm:$0xff]  ;;  %v3308_v20 = vpack.c.bf16 %v244_v10, %v240_v9  ;;  %v248_v21 = vld [vmem:[#allocation2 + $0x318] sm:$0xff]  ;;  %v3114_v24 = vpack.c.bf16 %v241_v13, %v237_v12 }
  0xb4   :  { %3099 = vmatpush1.bf16.msra.mxu0 %v3098_v34  ;;  %v250_v19 = vld [vmem:[#allocation2 + $0x328] sm:$0xff]  ;;  %v252_v22 = vld [vmem:[#allocation2 + $0x338] sm:$0xff]  ;;  %v3310_v27 = vpack.c.bf16 %v243_v17, %v239_v14  ;;  %v245_v29 = vld [vmem:[#allocation2 + $0x300] sm:$0xff] }
  0xb5   :  { %3295 = vmatpush1.bf16.msra.mxu1 %v3294_v35  ;;  %3101 = vmatprep.subr.bf16.mxu0 %v3100_v36  ;;  %v4154_v25 = vld [vmem:[%s4848_s0] ss:$14 sps:$4 sm:$0xff]   ;;  %v4157_v26 = vld [vmem:[%s4848_s0 + $0x1c] ss:$14 sps:$4 sm:$0xff]   ;;  %v3116_v28 = vpack.c.bf16 %v250_v19, %v246_v18  ;;  %v3312_v32 = vpack.c.bf16 %v252_v22, %v248_v21  ;;  %v4156_v9 = vld [vmem:[%s4848_s0 + $0x4] ss:$14 sps:$4 sm:$0xff]  }
  0xb6   :  { %3297 = vmatprep.subr.bf16.mxu1 %v3296_v40  ;;  %v249_v30 = vld [vmem:[#allocation2 + $0x320] sm:$0xff]  ;;  %v247_v31 = vld [vmem:[#allocation2 + $0x310] sm:$0xff]  ;;  %v254_v34 = vld [vmem:[#allocation2 + $0x348] sm:$0xff]  ;;  %v4660_v36 = vrot.slane %v4154_v25, %v4651_v23  ;;  %v4663_v37 = vrot.slane %v4157_v26, %v4651_v23 }
  0xb7   :  { %v251_v33 = vld [vmem:[#allocation2 + $0x330] sm:$0xff]  ;;  %v258_v35 = vld [vmem:[#allocation2 + $0x368] sm:$0xff]  ;;  %v256_v38 = vld [vmem:[#allocation2 + $0x358] sm:$0xff]  ;;  %v3118_v40 = vpack.c.bf16 %v249_v30, %v245_v29 }
  0xb8   :  { %3103 = vmatpush1.bf16.msra.mxu0 %v3102_v46  ;;  %v260_v39 = vld [vmem:[#allocation2 + $0x378] sm:$0xff]  ;;  %v604_v41 = vcombine.high %v4660_v36, %v4663_v37  ;;  %v3314_v42 = vpack.c.bf16 %v251_v33, %v247_v31  ;;  %v3120_v43 = vpack.c.bf16 %v258_v35, %v254_v34  ;;  %v253_v44 = vld [vmem:[#allocation2 + $0x340] sm:$0xff]  ;;  %v255_v46 = vld [vmem:[#allocation2 + $0x350] sm:$0xff]  ;;  %v603_v29 = vcombine.low %v4660_v36, %v4663_v37 }
  0xb9   :  { %3299 = vmatpush1.bf16.msra.mxu1 %v3298_v47  ;;  %3105 = vmatprep.subr.bf16.mxu0 %v3104_v48  ;;  %v257_v45 = vld [vmem:[#allocation2 + $0x360] sm:$0xff]  ;;  %v3316_v47 = vpack.c.bf16 %v260_v39, %v256_v38  ;;  %v259_v48 = vld [vmem:[#allocation2 + $0x370] sm:$0xff]  ;;  %v262_v49 = vld [vmem:[#allocation2 + $0x388] sm:$0xff] }
  0xba   :  { %3301 = vmatprep.subr.bf16.mxu1 %v3300_v52  ;;  %v266_v50 = vld [vmem:[#allocation2 + $0x3a8] sm:$0xff]  ;;  %715 = vmatprep.mubr.f32.mxu0 %v604_v41  ;;  %v264_v51 = vld [vmem:[#allocation2 + $0x398] sm:$0xff]  ;;  %v3122_v53 = vpack.c.bf16 %v257_v45, %v253_v44  ;;  %v3318_v54 = vpack.c.bf16 %v259_v48, %v255_v46  ;;  %v261_v56 = vld [vmem:[#allocation2 + $0x380] sm:$0xff] }
  0xbb   :  { %v268_v52 = vld [vmem:[#allocation2 + $0x3b8] sm:$0xff]  ;;  %999 = vmatprep.mubr.f32.mxu1 %v604_v41  ;;  %v3124_v55 = vpack.c.bf16 %v266_v50, %v262_v49  ;;  %v265_v57 = vld [vmem:[#allocation2 + $0x3a0] sm:$0xff]  ;;  %v263_v58 = vld [vmem:[#allocation2 + $0x390] sm:$0xff] }
  0xbc   :  { %3107 = vmatpush1.bf16.msra.mxu0 %v3106_v61  ;;  %v3320_v59 = vpack.c.bf16 %v268_v52, %v264_v51  ;;  %v267_v60 = vld [vmem:[#allocation2 + $0x3b0] sm:$0xff]  ;;  %v270_v61 = vld [vmem:[#allocation2 + $0x3c8] sm:$0xff]  ;;  %v276_v0 = vld [vmem:[#allocation2 + $0x3f8] sm:$0xff]  ;;  %v3126_v1 = vpack.c.bf16 %v265_v57, %v261_v56 }
  0xbd   :  { %3303 = vmatpush1.bf16.msra.mxu1 %v3302_v62  ;;  %3109 = vmatprep.subr.bf16.mxu0 %v3108_v63  ;;  %v274_v62 = vld [vmem:[#allocation2 + $0x3e8] sm:$0xff]  ;;  %v272_v63 = vld [vmem:[#allocation2 + $0x3d8] sm:$0xff]  ;;  %v269_v2 = vld [vmem:[#allocation2 + $0x3c0] sm:$0xff]  ;;  %v3322_v4 = vpack.c.bf16 %v267_v60, %v263_v58 }
  0xbe   :  { %3305 = vmatprep.subr.bf16.mxu1 %v3304_v3  ;;  %v273_v3 = vld [vmem:[#allocation2 + $0x3e0] sm:$0xff]  ;;  %v3128_v5 = vpack.c.bf16 %v274_v62, %v270_v61  ;;  %v271_v6 = vld [vmem:[#allocation2 + $0x3d0] sm:$0xff]  ;;  %v3324_v10 = vpack.c.bf16 %v276_v0, %v272_v63  ;;  %v278_v12 = vld [vmem:[#allocation2 + $0x408] sm:$0xff] }
  0xbf   :  { %v275_v8 = vld [vmem:[#allocation2 + $0x3f0] sm:$0xff]  ;;  %v282_v13 = vld [vmem:[#allocation2 + $0x428] sm:$0xff]  ;;  %v280_v14 = vld [vmem:[#allocation2 + $0x418] sm:$0xff] }
  0xc0   :  { %3111 = vmatpush1.bf16.msra.mxu0 %v3110_v11  ;;  %v4159_v11 = vld [vmem:[%s4848_s0 + $0x20] ss:$14 sps:$4 sm:$0xff]   ;;  %v3326_v17 = vpack.c.bf16 %v275_v8, %v271_v6  ;;  %v3132_v18 = vpack.c.bf16 %v282_v13, %v278_v12  ;;  %v288_v30 = vld [vmem:[#allocation2 + $0x458] sm:$0xff]  ;;  %vm2925_vm3 = vmor %vm2924_vm2, %vm2923_vm1 }
  0xc1   :  { %3307 = vmatpush1.bf16.msra.mxu1 %v3306_v15  ;;  %3113 = vmatprep.subr.bf16.mxu0 %v3112_v16  ;;  %v284_v15 = vld [vmem:[#allocation2 + $0x438] sm:$0xff]  ;;  %v3130_v16 = vpack.c.bf16 %v273_v3, %v269_v2  ;;  %v277_v19 = vld [vmem:[#allocation2 + $0x400] sm:$0xff]  ;;  %v279_v21 = vld [vmem:[#allocation2 + $0x410] sm:$0xff] }
  0xc2   :  { %3309 = vmatprep.subr.bf16.mxu1 %v3308_v20  ;;  %v281_v20 = vld [vmem:[#allocation2 + $0x420] sm:$0xff]  ;;  %v3328_v22 = vpack.c.bf16 %v284_v15, %v280_v14  ;;  %v286_v25 = vld [vmem:[#allocation2 + $0x448] sm:$0xff]  ;;  %v292_v31 = vld [vmem:[#allocation2 + $0x478] sm:$0xff] }
  0xc3   :  { %v290_v26 = vld [vmem:[#allocation2 + $0x468] sm:$0xff]  ;;  %v285_v35 = vld [vmem:[#allocation2 + $0x440] sm:$0xff]  ;;  %v287_v39 = vld [vmem:[#allocation2 + $0x450] sm:$0xff] }
  0xc4   :  { %3115 = vmatpush1.bf16.msra.mxu0 %v3114_v24  ;;  %v283_v24 = vld [vmem:[#allocation2 + $0x430] sm:$0xff]  ;;  %v3136_v34 = vpack.c.bf16 %v290_v26, %v286_v25  ;;  %v289_v38 = vld [vmem:[#allocation2 + $0x460] sm:$0xff]  ;;  %v296_v36 = vld [vmem:[#allocation2 + $0x498] sm:$0xff] }
  0xc5   :  { %3311 = vmatpush1.bf16.msra.mxu1 %v3310_v27  ;;  %3117 = vmatprep.subr.bf16.mxu0 %v3116_v28  ;;  %v4674_v27 = vrot.slane %v4156_v9, %v4651_v23  ;;  %v4677_v28 = vrot.slane %v4159_v11, %v4651_v23  ;;  %v3330_v33 = vpack.c.bf16 %v283_v24, %v279_v21  ;;  %v291_v41 = vld [vmem:[#allocation2 + $0x470] sm:$0xff]  ;;  %v300_v37 = vld [vmem:[#allocation2 + $0x4b8] sm:$0xff]  ;;  %v293_v48 = vld [vmem:[#allocation2 + $0x480] sm:$0xff] }
  0xc6   :  { %3313 = vmatprep.subr.bf16.mxu1 %v3312_v32  ;;  %v3134_v32 = vpack.c.bf16 %v281_v20, %v277_v19  ;;  %v3138_v45 = vpack.c.bf16 %v289_v38, %v285_v35  ;;  %v3334_v46 = vpack.c.bf16 %v291_v41, %v287_v39  ;;  %v297_v49 = vld [vmem:[#allocation2 + $0x4a0] sm:$0xff]  ;;  %v295_v50 = vld [vmem:[#allocation2 + $0x490] sm:$0xff]  ;;  %v3336_v51 = vpack.c.bf16 %v300_v37, %v296_v36  ;;  %v308_v56 = vld [vmem:[#allocation2 + $0x4f8] sm:$0xff] }
  0xc7   :  { %v606_v44 = vcombine.high %v4674_v27, %v4677_v28  ;;  %v299_v52 = vld [vmem:[#allocation2 + $0x4b0] sm:$0xff]  ;;  %v3142_v57 = vpack.c.bf16 %v297_v49, %v293_v48  ;;  %v301_v60 = vld [vmem:[#allocation2 + $0x4c0] sm:$0xff]  ;;  %v314_v2 = vld [vmem:[#allocation2 + $0x528] sm:$0xff] }
  0xc8   :  { %3119 = vmatpush1.bf16.msra.mxu0 %v3118_v40  ;;  %v3332_v40 = vpack.c.bf16 %v292_v31, %v288_v30  ;;  %v3338_v58 = vpack.c.bf16 %v299_v52, %v295_v50  ;;  %v305_v61 = vld [vmem:[#allocation2 + $0x4e0] sm:$0xff]  ;;  %v303_v62 = vld [vmem:[#allocation2 + $0x4d0] sm:$0xff]  ;;  %v312_v3 = vld [vmem:[#allocation2 + $0x518] sm:$0xff] }
  0xc9   :  { %3315 = vmatpush1.bf16.msra.mxu1 %v3314_v42  ;;  %3121 = vmatprep.subr.bf16.mxu0 %v3120_v43  ;;  %v294_v42 = vld [vmem:[#allocation2 + $0x488] sm:$0xff]  ;;  %v307_v0 = vld [vmem:[#allocation2 + $0x4f0] sm:$0xff]  ;;  %v309_v9 = vld [vmem:[#allocation2 + $0x500] sm:$0xff] }
  0xca   :  { %3317 = vmatprep.subr.bf16.mxu1 %v3316_v47  ;;  %v298_v43 = vld [vmem:[#allocation2 + $0x4a8] sm:$0xff]  ;;  %v3342_v6 = vpack.c.bf16 %v307_v0, %v303_v62  ;;  %v311_v11 = vld [vmem:[#allocation2 + $0x510] sm:$0xff]  ;;  %v317_v21 = vld [vmem:[#allocation2 + $0x540] sm:$0xff] }
  0xcb   :  { %v3140_v47 = vpack.c.bf16 %v298_v43, %v294_v42  ;;  %v315_v13 = vld [vmem:[#allocation2 + $0x530] sm:$0xff]  ;;  %v318_v14 = vld [vmem:[#allocation2 + $0x548] sm:$0xff]  ;;  %v328_v31 = vld [vmem:[#allocation2 + $0x598] sm:$0xff] }
  0xcc   :  { %3123 = vmatpush1.bf16.msra.mxu0 %v3122_v53  ;;  %v302_v53 = vld [vmem:[#allocation2 + $0x4c8] sm:$0xff]  ;;  %v3346_v19 = vpack.c.bf16 %v315_v13, %v311_v11  ;;  %v319_v24 = vld [vmem:[#allocation2 + $0x550] sm:$0xff]  ;;  %v325_v38 = vld [vmem:[#allocation2 + $0x580] sm:$0xff] }
  0xcd   :  { %3319 = vmatpush1.bf16.msra.mxu1 %v3318_v54  ;;  %3125 = vmatprep.subr.bf16.mxu0 %v3124_v55  ;;  %v306_v54 = vld [vmem:[#allocation2 + $0x4e8] sm:$0xff]  ;;  %v304_v55 = vld [vmem:[#allocation2 + $0x4d8] sm:$0xff]  ;;  %v323_v26 = vld [vmem:[#allocation2 + $0x570] sm:$0xff] }
  0xce   :  { %3321 = vmatprep.subr.bf16.mxu1 %v3320_v59  ;;  %v3144_v59 = vpack.c.bf16 %v306_v54, %v302_v53  ;;  %v3340_v63 = vpack.c.bf16 %v308_v56, %v304_v55  ;;  %v322_v15 = vld [vmem:[#allocation2 + $0x568] sm:$0xff]  ;;  %v329_v39 = vld [vmem:[#allocation2 + $0x5a0] sm:$0xff]  ;;  %v331_v42 = vld [vmem:[#allocation2 + $0x5b0] sm:$0xff] }
  0xcf   :  { %v3152_v20 = vpack.c.bf16 %v322_v15, %v318_v14  ;;  %v330_v30 = vld [vmem:[#allocation2 + $0x5a8] sm:$0xff]  ;;  %v336_v36 = vld [vmem:[#allocation2 + $0x5d8] sm:$0xff]  ;;  %v333_v48 = vld [vmem:[#allocation2 + $0x5c0] sm:$0xff] }
  0xd0   :  { %3127 = vmatpush1.bf16.msra.mxu0 %v3126_v1  ;;  %v310_v1 = vld [vmem:[#allocation2 + $0x508] sm:$0xff]  ;;  %v340_v37 = vld [vmem:[#allocation2 + $0x5f8] sm:$0xff]  ;;  %v337_v49 = vld [vmem:[#allocation2 + $0x5e0] sm:$0xff] }
  0xd1   :  { %3323 = vmatpush1.bf16.msra.mxu1 %v3322_v4  ;;  %3129 = vmatprep.subr.bf16.mxu0 %v3128_v5  ;;  %v316_v4 = vld [vmem:[#allocation2 + $0x538] sm:$0xff]  ;;  %v3146_v5 = vpack.c.bf16 %v305_v61, %v301_v60  ;;  %v3148_v8 = vpack.c.bf16 %v314_v2, %v310_v1  ;;  %v334_v43 = vld [vmem:[#allocation2 + $0x5c8] sm:$0xff]  ;;  %v335_v50 = vld [vmem:[#allocation2 + $0x5d0] sm:$0xff] }
  0xd2   :  { %3325 = vmatprep.subr.bf16.mxu1 %v3324_v10  ;;  %v313_v10 = vld [vmem:[#allocation2 + $0x520] sm:$0xff]  ;;  %v3344_v12 = vpack.c.bf16 %v316_v4, %v312_v3  ;;  %v339_v52 = vld [vmem:[#allocation2 + $0x5f0] sm:$0xff]  ;;  %v342_v53 = vld [vmem:[#allocation2 + $0x608] sm:$0xff] }
  0xd3   :  { %v346_v54 = vld [vmem:[#allocation2 + $0x628] sm:$0xff]  ;;  %v344_v55 = vld [vmem:[#allocation2 + $0x618] sm:$0xff]  ;;  %v341_v60 = vld [vmem:[#allocation2 + $0x600] sm:$0xff] }
  0xd4   :  { %3131 = vmatpush1.bf16.msra.mxu0 %v3130_v16  ;;  %v320_v16 = vld [vmem:[#allocation2 + $0x558] sm:$0xff]  ;;  %v345_v61 = vld [vmem:[#allocation2 + $0x620] sm:$0xff]  ;;  %v343_v62 = vld [vmem:[#allocation2 + $0x610] sm:$0xff] }
  0xd5   :  { %3327 = vmatpush1.bf16.msra.mxu1 %v3326_v17  ;;  %3133 = vmatprep.subr.bf16.mxu0 %v3132_v18  ;;  %v324_v17 = vld [vmem:[#allocation2 + $0x578] sm:$0xff]  ;;  %v3150_v18 = vpack.c.bf16 %v313_v10, %v309_v9  ;;  %v347_v0 = vld [vmem:[#allocation2 + $0x630] sm:$0xff]  ;;  %v350_v1 = vld [vmem:[#allocation2 + $0x648] sm:$0xff] }
  0xd6   :  { %3329 = vmatprep.subr.bf16.mxu1 %v3328_v22  ;;  %v321_v22 = vld [vmem:[#allocation2 + $0x560] sm:$0xff]  ;;  %v3348_v25 = vpack.c.bf16 %v324_v17, %v320_v16  ;;  %v348_v56 = vld [vmem:[#allocation2 + $0x638] sm:$0xff]  ;;  %v354_v2 = vld [vmem:[#allocation2 + $0x668] sm:$0xff] }
  0xd7   :  { %716 = vmatmul.mubr.f32.vlgmr.msra.gmra.mrb[0].mxu0 %v603_v29  ;;  %v352_v3 = vld [vmem:[#allocation2 + $0x658] sm:$0xff]  ;;  %v349_v9 = vld [vmem:[#allocation2 + $0x640] sm:$0xff]  ;;  %v351_v11 = vld [vmem:[#allocation2 + $0x650] sm:$0xff] }
  0xd8   :  { %3135 = vmatpush1.bf16.msra.mxu0 %v3134_v32  ;;  %1000 = vmatmul.mubr.f32.vlgmr.msra.gmra.mrb[0].mxu1 %v603_v29  ;;  %v326_v29 = vld [vmem:[#allocation2 + $0x588] sm:$0xff]  ;;  %v332_v32 = vld [vmem:[#allocation2 + $0x5b8] sm:$0xff]  ;;  %v353_v10 = vld [vmem:[#allocation2 + $0x660] sm:$0xff] }
  0xd9   :  { %3331 = vmatpush1.bf16.msra.mxu1 %v3330_v33  ;;  %3137 = vmatprep.subr.bf16.mxu0 %v3136_v34  ;;  %v3154_v33 = vpack.c.bf16 %v321_v22, %v317_v21  ;;  %v3350_v34 = vpack.c.bf16 %v323_v26, %v319_v24  ;;  %v3156_v35 = vpack.c.bf16 %v330_v30, %v326_v29  ;;  %v356_v4 = vld [vmem:[#allocation2 + $0x678] sm:$0xff]  ;;  %v355_v13 = vld [vmem:[#allocation2 + $0x670] sm:$0xff]  ;;  %v358_v14 = vld [vmem:[#allocation2 + $0x688] sm:$0xff] }
  0xda   :  { %3333 = vmatprep.subr.bf16.mxu1 %v3332_v40  ;;  %786 = vmatprep.mubr.f32.mxu0 %v606_v44  ;;  %v327_v40 = vld [vmem:[#allocation2 + $0x590] sm:$0xff]  ;;  %v3352_v41 = vpack.c.bf16 %v332_v32, %v328_v31  ;;  %v362_v15 = vld [vmem:[#allocation2 + $0x6a8] sm:$0xff]  ;;  %v360_v16 = vld [vmem:[#allocation2 + $0x698] sm:$0xff] }
  0xdb   :  { %1070 = vmatprep.mubr.f32.mxu1 %v606_v44  ;;  %v338_v44 = vld [vmem:[#allocation2 + $0x5e8] sm:$0xff]  ;;  %v364_v17 = vld [vmem:[#allocation2 + $0x6b8] sm:$0xff]  ;;  %v357_v21 = vld [vmem:[#allocation2 + $0x680] sm:$0xff] }
  0xdc   :  { %3139 = vmatpush1.bf16.msra.mxu0 %v3138_v45  ;;  %v3158_v45 = vpack.c.bf16 %v329_v39, %v325_v38  ;;  %v361_v22 = vld [vmem:[#allocation2 + $0x6a0] sm:$0xff]  ;;  %v359_v24 = vld [vmem:[#allocation2 + $0x690] sm:$0xff]  ;;  %v366_v29 = vld [vmem:[#allocation2 + $0x6c8] sm:$0xff] }
  0xdd   :  { %3335 = vmatpush1.bf16.msra.mxu1 %v3334_v46  ;;  %3141 = vmatprep.subr.bf16.mxu0 %v3140_v47  ;;  %v3354_v46 = vpack.c.bf16 %v331_v42, %v327_v40  ;;  %v3160_v47 = vpack.c.bf16 %v338_v44, %v334_v43  ;;  %v363_v26 = vld [vmem:[#allocation2 + $0x6b0] sm:$0xff]  ;;  %v370_v30 = vld [vmem:[#allocation2 + $0x6e8] sm:$0xff]  ;;  %v368_v31 = vld [vmem:[#allocation2 + $0x6d8] sm:$0xff] }
  0xde   :  { %3337 = vmatprep.subr.bf16.mxu1 %v3336_v51  ;;  %v3356_v51 = vpack.c.bf16 %v340_v37, %v336_v36  ;;  %v372_v32 = vld [vmem:[#allocation2 + $0x6f8] sm:$0xff]  ;;  %v365_v38 = vld [vmem:[#allocation2 + $0x6c0] sm:$0xff]  ;;  %v367_v40 = vld [vmem:[#allocation2 + $0x6d0] sm:$0xff] }
  0xdf   :  { %v369_v39 = vld [vmem:[#allocation2 + $0x6e0] sm:$0xff]  ;;  %v371_v42 = vld [vmem:[#allocation2 + $0x6f0] sm:$0xff]  ;;  %v374_v43 = vld [vmem:[#allocation2 + $0x708] sm:$0xff] }
  0xe0   :  { %3143 = vmatpush1.bf16.msra.mxu0 %v3142_v57  ;;  %v3162_v57 = vpack.c.bf16 %v337_v49, %v333_v48  ;;  %v378_v44 = vld [vmem:[#allocation2 + $0x728] sm:$0xff]  ;;  %v376_v36 = vld [vmem:[#allocation2 + $0x718] sm:$0xff]  ;;  %v373_v48 = vld [vmem:[#allocation2 + $0x700] sm:$0xff] }
  0xe1   :  { %3339 = vmatpush1.bf16.msra.mxu1 %v3338_v58  ;;  %3145 = vmatprep.subr.bf16.mxu0 %v3144_v59  ;;  %v3358_v58 = vpack.c.bf16 %v339_v52, %v335_v50  ;;  %v3164_v59 = vpack.c.bf16 %v346_v54, %v342_v53  ;;  %v380_v37 = vld [vmem:[#allocation2 + $0x738] sm:$0xff]  ;;  %v377_v49 = vld [vmem:[#allocation2 + $0x720] sm:$0xff]  ;;  %v375_v50 = vld [vmem:[#allocation2 + $0x710] sm:$0xff] }
  0xe2   :  { %3341 = vmatprep.subr.bf16.mxu1 %v3340_v63  ;;  %v3360_v63 = vpack.c.bf16 %v348_v56, %v344_v55  ;;  %v379_v52 = vld [vmem:[#allocation2 + $0x730] sm:$0xff]  ;;  %v382_v53 = vld [vmem:[#allocation2 + $0x748] sm:$0xff]  ;;  %v384_v55 = vld [vmem:[#allocation2 + $0x758] sm:$0xff] }
  0xe3   :  { %v386_v54 = vld [vmem:[#allocation2 + $0x768] sm:$0xff]  ;;  %v388_v56 = vld [vmem:[#allocation2 + $0x778] sm:$0xff]  ;;  %vm2927_vm5 = vmor %vm2926_vm4, %vm2925_vm3 }
  0xe4   :  { %3147 = vmatpush1.bf16.msra.mxu0 %v3146_v5  ;;  %v3166_v5 = vpack.c.bf16 %v345_v61, %v341_v60  ;;  %v381_v60 = vld [vmem:[#allocation2 + $0x740] sm:$0xff] }
  0xe5   :  { %3343 = vmatpush1.bf16.msra.mxu1 %v3342_v6  ;;  %3149 = vmatprep.subr.bf16.mxu0 %v3148_v8  ;;  %v3362_v6 = vpack.c.bf16 %v347_v0, %v343_v62  ;;  %v3168_v8 = vpack.c.bf16 %v354_v2, %v350_v1  ;;  %v385_v61 = vld [vmem:[#allocation2 + $0x760] sm:$0xff]  ;;  %v383_v62 = vld [vmem:[#allocation2 + $0x750] sm:$0xff]  ;;  %v390_v1 = vld [vmem:[#allocation2 + $0x788] sm:$0xff] }
  0xe6   :  { %3345 = vmatprep.subr.bf16.mxu1 %v3344_v12  ;;  %v3364_v12 = vpack.c.bf16 %v356_v4, %v352_v3  ;;  %v387_v0 = vld [vmem:[#allocation2 + $0x770] sm:$0xff]  ;;  %v394_v2 = vld [vmem:[#allocation2 + $0x7a8] sm:$0xff]  ;;  %v392_v3 = vld [vmem:[#allocation2 + $0x798] sm:$0xff] }
  0xe7   :  { %v396_v4 = vld [vmem:[#allocation2 + $0x7b8] sm:$0xff] }
  0xe8   :  { %3151 = vmatpush1.bf16.msra.mxu0 %v3150_v18  ;;  %v3170_v18 = vpack.c.bf16 %v353_v10, %v349_v9  ;;  %v389_v9 = vld [vmem:[#allocation2 + $0x780] sm:$0xff] }
  0xe9   :  { %3347 = vmatpush1.bf16.msra.mxu1 %v3346_v19  ;;  %3153 = vmatprep.subr.bf16.mxu0 %v3152_v20  ;;  %v3366_v19 = vpack.c.bf16 %v355_v13, %v351_v11  ;;  %v3172_v20 = vpack.c.bf16 %v362_v15, %v358_v14  ;;  %v393_v10 = vld [vmem:[#allocation2 + $0x7a0] sm:$0xff]  ;;  %v391_v11 = vld [vmem:[#allocation2 + $0x790] sm:$0xff]  ;;  %v398_v14 = vld [vmem:[#allocation2 + $0x7c8] sm:$0xff] }
  0xea   :  { %3349 = vmatprep.subr.bf16.mxu1 %v3348_v25  ;;  %v3368_v25 = vpack.c.bf16 %v364_v17, %v360_v16  ;;  %v395_v13 = vld [vmem:[#allocation2 + $0x7b0] sm:$0xff]  ;;  %v402_v15 = vld [vmem:[#allocation2 + $0x7e8] sm:$0xff]  ;;  %v400_v16 = vld [vmem:[#allocation2 + $0x7d8] sm:$0xff] }
  0xeb   :  { %v404_v17 = vld [vmem:[#allocation2 + $0x7f8] sm:$0xff] }
  0xec   :  { %3155 = vmatpush1.bf16.msra.mxu0 %v3154_v33  ;;  %v3174_v33 = vpack.c.bf16 %v361_v22, %v357_v21  ;;  %v397_v21 = vld [vmem:[#allocation2 + $0x7c0] sm:$0xff] }
  0xed   :  { %3351 = vmatpush1.bf16.msra.mxu1 %v3350_v34  ;;  %3157 = vmatprep.subr.bf16.mxu0 %v3156_v35  ;;  %v3370_v34 = vpack.c.bf16 %v363_v26, %v359_v24  ;;  %v3176_v35 = vpack.c.bf16 %v370_v30, %v366_v29  ;;  %v401_v22 = vld [vmem:[#allocation2 + $0x7e0] sm:$0xff]  ;;  %v399_v24 = vld [vmem:[#allocation2 + $0x7d0] sm:$0xff]  ;;  %v406_v29 = vld [vmem:[#allocation2 + $0x808] sm:$0xff] }
  0xee   :  { %3353 = vmatprep.subr.bf16.mxu1 %v3352_v41  ;;  %v3372_v41 = vpack.c.bf16 %v372_v32, %v368_v31  ;;  %v403_v26 = vld [vmem:[#allocation2 + $0x7f0] sm:$0xff]  ;;  %v410_v30 = vld [vmem:[#allocation2 + $0x828] sm:$0xff]  ;;  %v408_v31 = vld [vmem:[#allocation2 + $0x818] sm:$0xff] }
  0xef   :  { %v412_v32 = vld [vmem:[#allocation2 + $0x838] sm:$0xff] }
  0xf0   :  { %3159 = vmatpush1.bf16.msra.mxu0 %v3158_v45  ;;  %v3178_v45 = vpack.c.bf16 %v369_v39, %v365_v38  ;;  %v405_v38 = vld [vmem:[#allocation2 + $0x800] sm:$0xff] }
  0xf1   :  { %3355 = vmatpush1.bf16.msra.mxu1 %v3354_v46  ;;  %3161 = vmatprep.subr.bf16.mxu0 %v3160_v47  ;;  %v3374_v46 = vpack.c.bf16 %v371_v42, %v367_v40  ;;  %v3180_v47 = vpack.c.bf16 %v378_v44, %v374_v43  ;;  %v409_v39 = vld [vmem:[#allocation2 + $0x820] sm:$0xff]  ;;  %v407_v40 = vld [vmem:[#allocation2 + $0x810] sm:$0xff]  ;;  %v414_v43 = vld [vmem:[#allocation2 + $0x848] sm:$0xff] }
  0xf2   :  { %3357 = vmatprep.subr.bf16.mxu1 %v3356_v51  ;;  %v3376_v51 = vpack.c.bf16 %v380_v37, %v376_v36  ;;  %v411_v42 = vld [vmem:[#allocation2 + $0x830] sm:$0xff]  ;;  %v418_v44 = vld [vmem:[#allocation2 + $0x868] sm:$0xff]  ;;  %v605_v36 = vcombine.low %v4674_v27, %v4677_v28  ;;  %v416_v37 = vld [vmem:[#allocation2 + $0x858] sm:$0xff] }
  0xf3   :  { %v421_v28 = vld [vmem:[#allocation2 + $0x880] sm:$0xff] }
  0xf4   :  { %3163 = vmatpush1.bf16.msra.mxu0 %v3162_v57  ;;  %v3182_v57 = vpack.c.bf16 %v377_v49, %v373_v48  ;;  %v417_v48 = vld [vmem:[#allocation2 + $0x860] sm:$0xff]  ;;  %v415_v49 = vld [vmem:[#allocation2 + $0x850] sm:$0xff] }
  0xf5   :  { %3359 = vmatpush1.bf16.msra.mxu1 %v3358_v58  ;;  %3165 = vmatprep.subr.bf16.mxu0 %v3164_v59  ;;  %v3378_v58 = vpack.c.bf16 %v379_v52, %v375_v50  ;;  %v3184_v59 = vpack.c.bf16 %v386_v54, %v382_v53  ;;  %v3394_v50 = vpack.c.bf16 %v411_v42, %v407_v40  ;;  %v419_v52 = vld [vmem:[#allocation2 + $0x870] sm:$0xff]  ;;  %v422_v53 = vld [vmem:[#allocation2 + $0x888] sm:$0xff]  ;;  %v445_v42 = vld [vmem:[#allocation2 + $0x940] sm:$0xff] }
  0xf6   :  { %3361 = vmatprep.subr.bf16.mxu1 %v3360_v63  ;;  %v3380_v63 = vpack.c.bf16 %v388_v56, %v384_v55  ;;  %v426_v54 = vld [vmem:[#allocation2 + $0x8a8] sm:$0xff]  ;;  %v424_v56 = vld [vmem:[#allocation2 + $0x898] sm:$0xff] }
  0xf8   :  { %3167 = vmatpush1.bf16.msra.mxu0 %v3166_v5  ;;  %v3186_v5 = vpack.c.bf16 %v385_v61, %v381_v60  ;;  %v3204_v60 = vpack.c.bf16 %v426_v54, %v422_v53  ;;  %v425_v61 = vld [vmem:[#allocation2 + $0x8a0] sm:$0xff]  ;;  %v455_v54 = vld [vmem:[#allocation2 + $0x990] sm:$0xff] }
  0xf9   :  { %3363 = vmatpush1.bf16.msra.mxu1 %v3362_v6  ;;  %3169 = vmatprep.subr.bf16.mxu0 %v3168_v8  ;;  %v3382_v6 = vpack.c.bf16 %v387_v0, %v383_v62  ;;  %v3188_v8 = vpack.c.bf16 %v394_v2, %v390_v1  ;;  %v423_v62 = vld [vmem:[#allocation2 + $0x890] sm:$0xff]  ;;  %v430_v2 = vld [vmem:[#allocation2 + $0x8c8] sm:$0xff]  ;;  %v457_v53 = vld [vmem:[#allocation2 + $0x9a0] sm:$0xff] }
  0xfa   :  { %3365 = vmatprep.subr.bf16.mxu1 %v3364_v12  ;;  %v3384_v12 = vpack.c.bf16 %v396_v4, %v392_v3  ;;  %v427_v1 = vld [vmem:[#allocation2 + $0x8b0] sm:$0xff]  ;;  %v434_v3 = vld [vmem:[#allocation2 + $0x8e8] sm:$0xff] }
  0xfc   :  { %3171 = vmatpush1.bf16.msra.mxu0 %v3170_v18  ;;  %v3190_v18 = vpack.c.bf16 %v393_v10, %v389_v9  ;;  %v3206_v9 = vpack.c.bf16 %v425_v61, %v421_v28  ;;  %v3402_v10 = vpack.c.bf16 %v427_v1, %v423_v62  ;;  %v464_v28 = vld [vmem:[#allocation2 + $0x9d8] sm:$0xff]  ;;  %v461_v62 = vld [vmem:[#allocation2 + $0x9c0] sm:$0xff] }
  0xfd   :  { %3367 = vmatpush1.bf16.msra.mxu1 %v3366_v19  ;;  %3173 = vmatprep.subr.bf16.mxu0 %v3172_v20  ;;  %v3386_v19 = vpack.c.bf16 %v395_v13, %v391_v11  ;;  %v3192_v20 = vpack.c.bf16 %v402_v15, %v398_v14  ;;  %v3208_v11 = vpack.c.bf16 %v434_v3, %v430_v2  ;;  %v433_v13 = vld [vmem:[#allocation2 + $0x8e0] sm:$0xff]  ;;  %v431_v14 = vld [vmem:[#allocation2 + $0x8d0] sm:$0xff]  ;;  %v470_v3 = vld [vmem:[#allocation2 + $0xa08] sm:$0xff] }
  0xfe   :  { %3369 = vmatprep.subr.bf16.mxu1 %v3368_v25  ;;  %v3388_v25 = vpack.c.bf16 %v404_v17, %v400_v16  ;;  %v435_v17 = vld [vmem:[#allocation2 + $0x8f0] sm:$0xff] }
  0xff   :  { %v467_v2 = vld [vmem:[#allocation2 + $0x9f0] sm:$0xff] }
 0x100   :  { %3175 = vmatpush1.bf16.msra.mxu0 %v3174_v33  ;;  %v3194_v33 = vpack.c.bf16 %v401_v22, %v397_v21  ;;  %v444_v21 = vld [vmem:[#allocation2 + $0x938] sm:$0xff] }
 0x101   :  { %3371 = vmatpush1.bf16.msra.mxu1 %v3370_v34  ;;  %3177 = vmatprep.subr.bf16.mxu0 %v3176_v35  ;;  %v3390_v34 = vpack.c.bf16 %v403_v26, %v399_v24  ;;  %v3196_v35 = vpack.c.bf16 %v410_v30, %v406_v29  ;;  %v3406_v24 = vpack.c.bf16 %v435_v17, %v431_v14  ;;  %v437_v26 = vld [vmem:[#allocation2 + $0x900] sm:$0xff]  ;;  %v439_v30 = vld [vmem:[#allocation2 + $0x910] sm:$0xff] }
 0x102   :  { %3373 = vmatprep.subr.bf16.mxu1 %v3372_v41  ;;  %v3392_v41 = vpack.c.bf16 %v412_v32, %v408_v31  ;;  %v441_v29 = vld [vmem:[#allocation2 + $0x920] sm:$0xff]  ;;  %v443_v32 = vld [vmem:[#allocation2 + $0x930] sm:$0xff] }
 0x103   :  { %v3410_v40 = vpack.c.bf16 %v443_v32, %v439_v30  ;;  %v473_v14 = vld [vmem:[#allocation2 + $0xa20] sm:$0xff]  ;;  %v475_v17 = vld [vmem:[#allocation2 + $0xa30] sm:$0xff] }
 0x104   :  { %3179 = vmatpush1.bf16.msra.mxu0 %v3178_v45  ;;  %v420_v45 = vld [vmem:[#allocation2 + $0x878] sm:$0xff]  ;;  %v479_v30 = vld [vmem:[#allocation2 + $0xa50] sm:$0xff] }
 0x105   :  { %3375 = vmatpush1.bf16.msra.mxu1 %v3374_v46  ;;  %3181 = vmatprep.subr.bf16.mxu0 %v3180_v47  ;;  %v3198_v46 = vpack.c.bf16 %v409_v39, %v405_v38  ;;  %v413_v47 = vld [vmem:[#allocation2 + $0x840] sm:$0xff]  ;;  %v3396_v55 = vpack.c.bf16 %v420_v45, %v416_v37  ;;  %v452_v38 = vld [vmem:[#allocation2 + $0x978] sm:$0xff]  ;;  %v3214_v39 = vpack.c.bf16 %v441_v29, %v437_v26  ;;  %v451_v37 = vld [vmem:[#allocation2 + $0x970] sm:$0xff] }
 0x106   :  { %3377 = vmatprep.subr.bf16.mxu1 %v3376_v51  ;;  %v3200_v51 = vpack.c.bf16 %v418_v44, %v414_v43  ;;  %v3202_v27 = vpack.c.bf16 %v417_v48, %v413_v47  ;;  %v449_v43 = vld [vmem:[#allocation2 + $0x960] sm:$0xff]  ;;  %v447_v44 = vld [vmem:[#allocation2 + $0x950] sm:$0xff]  ;;  %v454_v45 = vld [vmem:[#allocation2 + $0x988] sm:$0xff] }
 0x107   :  { %v456_v47 = vld [vmem:[#allocation2 + $0x998] sm:$0xff]  ;;  %v477_v26 = vld [vmem:[#allocation2 + $0xa40] sm:$0xff]  ;;  %v483_v32 = vld [vmem:[#allocation2 + $0xa70] sm:$0xff] }
 0x108   :  { %3183 = vmatpush1.bf16.msra.mxu0 %v3182_v57  ;;  %v428_v57 = vld [vmem:[#allocation2 + $0x8b8] sm:$0xff]  ;;  %v481_v29 = vld [vmem:[#allocation2 + $0xa60] sm:$0xff] }
 0x109   :  { %3379 = vmatpush1.bf16.msra.mxu1 %v3378_v58  ;;  %3185 = vmatprep.subr.bf16.mxu0 %v3184_v59  ;;  %v4160_v58 = vld [vmem:[%s4848_s0 + $0x8] ss:$14 sps:$4 sm:$0xff]   ;;  %v3398_v59 = vpack.c.bf16 %v419_v52, %v415_v49  ;;  %v3400_v0 = vpack.c.bf16 %v428_v57, %v424_v56  ;;  %v3218_v49 = vpack.c.bf16 %v449_v43, %v445_v42  ;;  %v453_v52 = vld [vmem:[#allocation2 + $0x980] sm:$0xff] }
 0x10a   :  { %3381 = vmatprep.subr.bf16.mxu1 %v3380_v63  ;;  %v4163_v63 = vld [vmem:[%s4848_s0 + $0x24] ss:$14 sps:$4 sm:$0xff]   ;;  %v4692_v4 = vrot.slane %v4160_v58, %v4651_v23  ;;  %v460_v48 = vld [vmem:[#allocation2 + $0x9b8] sm:$0xff]  ;;  %v462_v57 = vld [vmem:[#allocation2 + $0x9c8] sm:$0xff] }
 0x10b   :  { %v459_v56 = vld [vmem:[#allocation2 + $0x9b0] sm:$0xff]  ;;  %v468_v58 = vld [vmem:[#allocation2 + $0x9f8] sm:$0xff]  ;;  %v485_v42 = vld [vmem:[#allocation2 + $0xa80] sm:$0xff] }
 0x10c   :  { %3187 = vmatpush1.bf16.msra.mxu0 %v3186_v5  ;;  %v432_v5 = vld [vmem:[#allocation2 + $0x8d8] sm:$0xff]  ;;  %v3420_v1 = vpack.c.bf16 %v468_v58, %v464_v28  ;;  %v489_v43 = vld [vmem:[#allocation2 + $0xaa0] sm:$0xff] }
 0x10d   :  { %3383 = vmatpush1.bf16.msra.mxu1 %v3382_v6  ;;  %3189 = vmatprep.subr.bf16.mxu0 %v3188_v8  ;;  %v436_v6 = vld [vmem:[#allocation2 + $0x8f8] sm:$0xff]  ;;  %v4695_v8 = vrot.slane %v4163_v63, %v4651_v23  ;;  %v465_v63 = vld [vmem:[#allocation2 + $0x9e0] sm:$0xff] }
 0x10e   :  { %3385 = vmatprep.subr.bf16.mxu1 %v3384_v12  ;;  %v429_v12 = vld [vmem:[#allocation2 + $0x8c0] sm:$0xff]  ;;  %v3404_v16 = vpack.c.bf16 %v436_v6, %v432_v5  ;;  %v474_v5 = vld [vmem:[#allocation2 + $0xa28] sm:$0xff]  ;;  %v472_v6 = vld [vmem:[#allocation2 + $0xa18] sm:$0xff] }
 0x10f   :  { %v640_v15 = vcombine.high %v4692_v4, %v4695_v8  ;;  %v3210_v22 = vpack.c.bf16 %v433_v13, %v429_v12  ;;  %v3228_v12 = vpack.c.bf16 %v474_v5, %v470_v3  ;;  %v469_v13 = vld [vmem:[#allocation2 + $0xa00] sm:$0xff]  ;;  %v504_v28 = vld [vmem:[#allocation2 + $0xb18] sm:$0xff]  ;;  %v510_v3 = vld [vmem:[#allocation2 + $0xb48] sm:$0xff] }
 0x110   :  { %3191 = vmatpush1.bf16.msra.mxu0 %v3190_v18  ;;  %v438_v18 = vld [vmem:[#allocation2 + $0x908] sm:$0xff]  ;;  %v508_v58 = vld [vmem:[#allocation2 + $0xb38] sm:$0xff] }
 0x111   :  { %3387 = vmatpush1.bf16.msra.mxu1 %v3386_v19  ;;  %3193 = vmatprep.subr.bf16.mxu0 %v3192_v20  ;;  %v442_v19 = vld [vmem:[#allocation2 + $0x928] sm:$0xff]  ;;  %v440_v20 = vld [vmem:[#allocation2 + $0x918] sm:$0xff] }
 0x112   :  { %3389 = vmatprep.subr.bf16.mxu1 %v3388_v25  ;;  %v3212_v25 = vpack.c.bf16 %v442_v19, %v438_v18  ;;  %v3408_v31 = vpack.c.bf16 %v444_v21, %v440_v20  ;;  %v478_v18 = vld [vmem:[#allocation2 + $0xa48] sm:$0xff]  ;;  %v480_v20 = vld [vmem:[#allocation2 + $0xa58] sm:$0xff] }
 0x113   :  { %v482_v19 = vld [vmem:[#allocation2 + $0xa68] sm:$0xff]  ;;  %v484_v21 = vld [vmem:[#allocation2 + $0xa78] sm:$0xff] }
 0x114   :  { %3195 = vmatpush1.bf16.msra.mxu0 %v3194_v33  ;;  %v446_v33 = vld [vmem:[#allocation2 + $0x948] sm:$0xff] }
 0x115   :  { %3391 = vmatpush1.bf16.msra.mxu1 %v3390_v34  ;;  %3197 = vmatprep.subr.bf16.mxu0 %v3196_v35  ;;  %v450_v34 = vld [vmem:[#allocation2 + $0x968] sm:$0xff]  ;;  %v448_v35 = vld [vmem:[#allocation2 + $0x958] sm:$0xff] }
 0x116   :  { %3393 = vmatprep.subr.bf16.mxu1 %v3392_v41  ;;  %v3216_v41 = vpack.c.bf16 %v450_v34, %v446_v33  ;;  %v486_v33 = vld [vmem:[#allocation2 + $0xa88] sm:$0xff] }
 0x117   :  { %787 = vmatmul.mubr.f32.vlgmr.msra.gmra.mrb[0].mxu0 %v605_v36  ;;  %v490_v34 = vld [vmem:[#allocation2 + $0xaa8] sm:$0xff] }
 0x118   :  { %3199 = vmatpush1.bf16.msra.mxu0 %v3198_v46  ;;  %1071 = vmatmul.mubr.f32.vlgmr.msra.gmra.mrb[0].mxu1 %v605_v36  ;;  %v3412_v36 = vpack.c.bf16 %v452_v38, %v448_v35  ;;  %v458_v46 = vld [vmem:[#allocation2 + $0x9a8] sm:$0xff]  ;;  %v488_v35 = vld [vmem:[#allocation2 + $0xa98] sm:$0xff] }
 0x119   :  { %3395 = vmatpush1.bf16.msra.mxu1 %v3394_v50  ;;  %3201 = vmatprep.subr.bf16.mxu0 %v3200_v51  ;;  %v3414_v50 = vpack.c.bf16 %v451_v37, %v447_v44  ;;  %v3220_v51 = vpack.c.bf16 %v458_v46, %v454_v45  ;;  %v492_v38 = vld [vmem:[#allocation2 + $0xab8] sm:$0xff]  ;;  %v487_v44 = vld [vmem:[#allocation2 + $0xa90] sm:$0xff]  ;;  %v494_v45 = vld [vmem:[#allocation2 + $0xac8] sm:$0xff] }
 0x11a   :  { %3397 = vmatprep.subr.bf16.mxu1 %v3396_v55  ;;  %857 = vmatprep.mubr.f32.mxu0 %v640_v15  ;;  %v3416_v55 = vpack.c.bf16 %v460_v48, %v456_v47  ;;  %v491_v37 = vld [vmem:[#allocation2 + $0xab0] sm:$0xff]  ;;  %v498_v46 = vld [vmem:[#allocation2 + $0xae8] sm:$0xff]  ;;  %v496_v47 = vld [vmem:[#allocation2 + $0xad8] sm:$0xff] }
 0x11b   :  { %1141 = vmatprep.mubr.f32.mxu1 %v640_v15  ;;  %v471_v15 = vld [vmem:[#allocation2 + $0xa10] sm:$0xff]  ;;  %v500_v48 = vld [vmem:[#allocation2 + $0xaf8] sm:$0xff]  ;;  %v514_v5 = vld [vmem:[#allocation2 + $0xb68] sm:$0xff] }
 0x11c   :  { %3203 = vmatpush1.bf16.msra.mxu0 %v3202_v27  ;;  %v466_v27 = vld [vmem:[#allocation2 + $0x9e8] sm:$0xff] }
 0x11d   :  { %3399 = vmatpush1.bf16.msra.mxu1 %v3398_v59  ;;  %3205 = vmatprep.subr.bf16.mxu0 %v3204_v60  ;;  %v3222_v59 = vpack.c.bf16 %v457_v53, %v453_v52  ;;  %v3418_v60 = vpack.c.bf16 %v459_v56, %v455_v54  ;;  %v3224_v61 = vpack.c.bf16 %v466_v27, %v462_v57  ;;  %v493_v52 = vld [vmem:[#allocation2 + $0xac0] sm:$0xff]  ;;  %v495_v54 = vld [vmem:[#allocation2 + $0xad0] sm:$0xff]  ;;  %v502_v57 = vld [vmem:[#allocation2 + $0xb08] sm:$0xff] }
 0x11e   :  { %3401 = vmatprep.subr.bf16.mxu1 %v3400_v0  ;;  %v463_v0 = vld [vmem:[#allocation2 + $0x9d0] sm:$0xff]  ;;  %v497_v53 = vld [vmem:[#allocation2 + $0xae0] sm:$0xff]  ;;  %v506_v27 = vld [vmem:[#allocation2 + $0xb28] sm:$0xff] }
 0x11f   :  { %v499_v56 = vld [vmem:[#allocation2 + $0xaf0] sm:$0xff] }
 0x120   :  { %3207 = vmatpush1.bf16.msra.mxu0 %v3206_v9  ;;  %v476_v9 = vld [vmem:[#allocation2 + $0xa38] sm:$0xff] }
 0x121   :  { %3403 = vmatpush1.bf16.msra.mxu1 %v3402_v10  ;;  %3209 = vmatprep.subr.bf16.mxu0 %v3208_v11  ;;  %v3226_v10 = vpack.c.bf16 %v465_v63, %v461_v62  ;;  %v3422_v11 = vpack.c.bf16 %v467_v2, %v463_v0  ;;  %v501_v62 = vld [vmem:[#allocation2 + $0xb00] sm:$0xff]  ;;  %v503_v0 = vld [vmem:[#allocation2 + $0xb10] sm:$0xff] }
 0x122   :  { %3405 = vmatprep.subr.bf16.mxu1 %v3404_v16  ;;  %v3424_v16 = vpack.c.bf16 %v476_v9, %v472_v6  ;;  %v505_v63 = vld [vmem:[#allocation2 + $0xb20] sm:$0xff]  ;;  %v507_v2 = vld [vmem:[#allocation2 + $0xb30] sm:$0xff]  ;;  %v512_v6 = vld [vmem:[#allocation2 + $0xb58] sm:$0xff] }
 0x123   :  { %v516_v9 = vld [vmem:[#allocation2 + $0xb78] sm:$0xff] }
 0x124   :  { %3211 = vmatpush1.bf16.msra.mxu0 %v3210_v22  ;;  %v3230_v22 = vpack.c.bf16 %v473_v14, %v469_v13  ;;  %v509_v13 = vld [vmem:[#allocation2 + $0xb40] sm:$0xff] }
 0x125   :  { %3407 = vmatpush1.bf16.msra.mxu1 %v3406_v24  ;;  %3213 = vmatprep.subr.bf16.mxu0 %v3212_v25  ;;  %v3426_v24 = vpack.c.bf16 %v475_v17, %v471_v15  ;;  %v3232_v25 = vpack.c.bf16 %v482_v19, %v478_v18  ;;  %v513_v14 = vld [vmem:[#allocation2 + $0xb60] sm:$0xff]  ;;  %v511_v15 = vld [vmem:[#allocation2 + $0xb50] sm:$0xff]  ;;  %v518_v18 = vld [vmem:[#allocation2 + $0xb88] sm:$0xff] }
 0x126   :  { %3409 = vmatprep.subr.bf16.mxu1 %v3408_v31  ;;  %v3428_v31 = vpack.c.bf16 %v484_v21, %v480_v20  ;;  %v515_v17 = vld [vmem:[#allocation2 + $0xb70] sm:$0xff]  ;;  %v522_v19 = vld [vmem:[#allocation2 + $0xba8] sm:$0xff]  ;;  %v520_v20 = vld [vmem:[#allocation2 + $0xb98] sm:$0xff] }
 0x127   :  { %v524_v21 = vld [vmem:[#allocation2 + $0xbb8] sm:$0xff] }
 0x128   :  { %3215 = vmatpush1.bf16.msra.mxu0 %v3214_v39  ;;  %v3234_v39 = vpack.c.bf16 %v481_v29, %v477_v26  ;;  %v517_v26 = vld [vmem:[#allocation2 + $0xb80] sm:$0xff] }
 0x129   :  { %3411 = vmatpush1.bf16.msra.mxu1 %v3410_v40  ;;  %3217 = vmatprep.subr.bf16.mxu0 %v3216_v41  ;;  %v3430_v40 = vpack.c.bf16 %v483_v32, %v479_v30  ;;  %v3236_v41 = vpack.c.bf16 %v490_v34, %v486_v33  ;;  %v521_v29 = vld [vmem:[#allocation2 + $0xba0] sm:$0xff]  ;;  %v519_v30 = vld [vmem:[#allocation2 + $0xb90] sm:$0xff]  ;;  %v526_v33 = vld [vmem:[#allocation2 + $0xbc8] sm:$0xff] }
 0x12a   :  { %3413 = vmatprep.subr.bf16.mxu1 %v3412_v36  ;;  %v3432_v36 = vpack.c.bf16 %v492_v38, %v488_v35  ;;  %v523_v32 = vld [vmem:[#allocation2 + $0xbb0] sm:$0xff]  ;;  %v530_v34 = vld [vmem:[#allocation2 + $0xbe8] sm:$0xff]  ;;  %v528_v35 = vld [vmem:[#allocation2 + $0xbd8] sm:$0xff] }
 0x12b   :  { %v532_v38 = vld [vmem:[#allocation2 + $0xbf8] sm:$0xff] }
 0x12c   :  { %3219 = vmatpush1.bf16.msra.mxu0 %v3218_v49  ;;  %v3238_v49 = vpack.c.bf16 %v489_v43, %v485_v42  ;;  %v525_v42 = vld [vmem:[#allocation2 + $0xbc0] sm:$0xff] }
 0x12d   :  { %3415 = vmatpush1.bf16.msra.mxu1 %v3414_v50  ;;  %3221 = vmatprep.subr.bf16.mxu0 %v3220_v51  ;;  %v3434_v50 = vpack.c.bf16 %v491_v37, %v487_v44  ;;  %v3240_v51 = vpack.c.bf16 %v498_v46, %v494_v45  ;;  %v529_v43 = vld [vmem:[#allocation2 + $0xbe0] sm:$0xff]  ;;  %v527_v44 = vld [vmem:[#allocation2 + $0xbd0] sm:$0xff]  ;;  %v534_v45 = vld [vmem:[#allocation2 + $0xc08] sm:$0xff] }
 0x12e   :  { %3417 = vmatprep.subr.bf16.mxu1 %v3416_v55  ;;  %v3436_v55 = vpack.c.bf16 %v500_v48, %v496_v47  ;;  %v531_v37 = vld [vmem:[#allocation2 + $0xbf0] sm:$0xff]  ;;  %v538_v46 = vld [vmem:[#allocation2 + $0xc28] sm:$0xff]  ;;  %v536_v47 = vld [vmem:[#allocation2 + $0xc18] sm:$0xff] }
 0x12f   :  { %v540_v48 = vld [vmem:[#allocation2 + $0xc38] sm:$0xff] }
 0x130   :  { %3223 = vmatpush1.bf16.msra.mxu0 %v3222_v59  ;;  %v3242_v59 = vpack.c.bf16 %v497_v53, %v493_v52  ;;  %v533_v52 = vld [vmem:[#allocation2 + $0xc00] sm:$0xff] }
 0x131   :  { %3419 = vmatpush1.bf16.msra.mxu1 %v3418_v60  ;;  %3225 = vmatprep.subr.bf16.mxu0 %v3224_v61  ;;  %v3438_v60 = vpack.c.bf16 %v499_v56, %v495_v54  ;;  %v3244_v61 = vpack.c.bf16 %v506_v27, %v502_v57  ;;  %v537_v53 = vld [vmem:[#allocation2 + $0xc20] sm:$0xff]  ;;  %v4162_v54 = vld [vmem:[%s4848_s0 + $0xc] ss:$14 sps:$4 sm:$0x33]   ;;  %v535_v56 = vld [vmem:[#allocation2 + $0xc10] sm:$0xff] }
 0x132   :  { %3421 = vmatprep.subr.bf16.mxu1 %v3420_v1  ;;  %v3440_v1 = vpack.c.bf16 %v508_v58, %v504_v28  ;;  %v539_v57 = vld [vmem:[#allocation2 + $0xc30] sm:$0xff]  ;;  %v639_v28 = vcombine.low %v4692_v4, %v4695_v8  ;;  %v1223_v4 = vld [vmem:[#allocation7] sm:$0xff] }
 0x133   :  { %v4165_v27 = vld [vmem:[%s4848_s0 + $0x28] ss:$14 sps:$4 sm:$0x33]   ;;  %v1224_v58 = vld [vmem:[#allocation7 + $0x8] sm:$0xff] }
 0x134   :  { %3227 = vmatpush1.bf16.msra.mxu0 %v3226_v10  ;;  %v3246_v10 = vpack.c.bf16 %v505_v63, %v501_v62  ;;  %v624_v63 = vrot.slane %v4162_v54, %v4651_v23  ;;  %v1225_v8 = vld [vmem:[#allocation7 + $0x10] sm:$0xff] }
 0x135   :  { %3423 = vmatpush1.bf16.msra.mxu1 %v3422_v11  ;;  %3229 = vmatprep.subr.bf16.mxu0 %v3228_v12  ;;  %v3442_v11 = vpack.c.bf16 %v507_v2, %v503_v0  ;;  %v3248_v12 = vpack.c.bf16 %v514_v5, %v510_v3  ;;  %v638_v0 = vrot.slane %v4165_v27, %v4651_v23  ;;  %v1228_v2 = vld [vmem:[#allocation7 + $0x28] sm:$0xff]  ;;  %v1230_v3 = vld [vmem:[#allocation7 + $0x38] sm:$0xff] }
 0x136   :  { %3425 = vmatprep.subr.bf16.mxu1 %v3424_v16  ;;  %v3444_v16 = vpack.c.bf16 %v516_v9, %v512_v6  ;;  %v3462_v6 = vpack.c.bf16 %v1225_v8, %v1223_v4  ;;  %v3464_v9 = vpack.c.bf16 %v1230_v3, %v1228_v2  ;;  %v1262_v27 = vld [vmem:[#allocation7 + $0x138] sm:$0xff]  ;;  %v1263_v4 = vld [vmem:[#allocation7 + $0x140] sm:$0xff]  ;;  %v1265_v8 = vld [vmem:[#allocation7 + $0x150] sm:$0xff] }
 0x137   :  { %v641_v5 = vcombine.low %v624_v63, %v638_v0  ;;  %v1268_v2 = vld [vmem:[#allocation7 + $0x168] sm:$0xff]  ;;  %v1270_v3 = vld [vmem:[#allocation7 + $0x178] sm:$0xff] }
 0x138   :  { %3231 = vmatpush1.bf16.msra.mxu0 %v3230_v22  ;;  %v3250_v22 = vpack.c.bf16 %v513_v14, %v509_v13  ;;  %v1234_v13 = vld [vmem:[#allocation7 + $0x58] sm:$0xff] }
 0x139   :  { %3427 = vmatpush1.bf16.msra.mxu1 %v3426_v24  ;;  %3233 = vmatprep.subr.bf16.mxu0 %v3232_v25  ;;  %v3446_v24 = vpack.c.bf16 %v515_v17, %v511_v15  ;;  %v3252_v25 = vpack.c.bf16 %v522_v19, %v518_v18  ;;  %v1233_v17 = vld [vmem:[#allocation7 + $0x50] sm:$0xff]  ;;  %v1236_v18 = vld [vmem:[#allocation7 + $0x68] sm:$0xff]  ;;  %v1238_v19 = vld [vmem:[#allocation7 + $0x78] sm:$0xff] }
 0x13a   :  { %3429 = vmatprep.subr.bf16.mxu1 %v3428_v31  ;;  %v3448_v31 = vpack.c.bf16 %v524_v21, %v520_v20  ;;  %v3472_v21 = vpack.c.bf16 %v1238_v19, %v1236_v18  ;;  %v1278_v18 = vld [vmem:[#allocation7 + $0x1b8] sm:$0xff] }
 0x13c   :  { %3235 = vmatpush1.bf16.msra.mxu0 %v3234_v39  ;;  %v3254_v39 = vpack.c.bf16 %v521_v29, %v517_v26  ;;  %v1242_v26 = vld [vmem:[#allocation7 + $0x98] sm:$0xff] }
 0x13d   :  { %3431 = vmatpush1.bf16.msra.mxu1 %v3430_v40  ;;  %3237 = vmatprep.subr.bf16.mxu0 %v3236_v41  ;;  %v3450_v40 = vpack.c.bf16 %v523_v32, %v519_v30  ;;  %v3256_v41 = vpack.c.bf16 %v530_v34, %v526_v33  ;;  %v1241_v32 = vld [vmem:[#allocation7 + $0x90] sm:$0xff]  ;;  %v1244_v33 = vld [vmem:[#allocation7 + $0xa8] sm:$0xff]  ;;  %v1246_v34 = vld [vmem:[#allocation7 + $0xb8] sm:$0xff] }
 0x13e   :  { %3433 = vmatprep.subr.bf16.mxu1 %v3432_v36  ;;  %v3452_v36 = vpack.c.bf16 %v532_v38, %v528_v35  ;;  %v3480_v38 = vpack.c.bf16 %v1246_v34, %v1244_v33  ;;  %v1284_v33 = vld [vmem:[#allocation7 + $0x1e8] sm:$0xff]  ;;  %v1286_v34 = vld [vmem:[#allocation7 + $0x1f8] sm:$0xff] }
 0x140   :  { %3239 = vmatpush1.bf16.msra.mxu0 %v3238_v49  ;;  %v3258_v49 = vpack.c.bf16 %v529_v43, %v525_v42  ;;  %v1250_v42 = vld [vmem:[#allocation7 + $0xd8] sm:$0xff] }
 0x141   :  { %3435 = vmatpush1.bf16.msra.mxu1 %v3434_v50  ;;  %3241 = vmatprep.subr.bf16.mxu0 %v3240_v51  ;;  %v3454_v50 = vpack.c.bf16 %v531_v37, %v527_v44  ;;  %v3260_v51 = vpack.c.bf16 %v538_v46, %v534_v45  ;;  %v1249_v37 = vld [vmem:[#allocation7 + $0xd0] sm:$0xff]  ;;  %v1252_v45 = vld [vmem:[#allocation7 + $0xe8] sm:$0xff]  ;;  %v1254_v46 = vld [vmem:[#allocation7 + $0xf8] sm:$0xff] }
 0x142   :  { %3437 = vmatprep.subr.bf16.mxu1 %v3436_v55  ;;  %v3456_v55 = vpack.c.bf16 %v540_v48, %v536_v47  ;;  %v3488_v48 = vpack.c.bf16 %v1254_v46, %v1252_v45  ;;  %v1515_v46 = vld [vmem:[#allocation10 + $0x20] sm:$0xff] }
 0x144   :  { %3243 = vmatpush1.bf16.msra.mxu0 %v3242_v59  ;;  %v1226_v59 = vld [vmem:[#allocation7 + $0x18] sm:$0xff] }
 0x145   :  { %3439 = vmatpush1.bf16.msra.mxu1 %v3438_v60  ;;  %3245 = vmatprep.subr.bf16.mxu0 %v3244_v61  ;;  %v3262_v60 = vpack.c.bf16 %v537_v53, %v533_v52  ;;  %v3458_v61 = vpack.c.bf16 %v539_v57, %v535_v56  ;;  %v3460_v62 = vpack.c.bf16 %v1226_v59, %v1224_v58  ;;  %v1258_v52 = vld [vmem:[#allocation7 + $0x118] sm:$0xff]  ;;  %v1257_v56 = vld [vmem:[#allocation7 + $0x110] sm:$0xff]  ;;  %v1260_v57 = vld [vmem:[#allocation7 + $0x128] sm:$0xff] }
 0x146   :  { %3441 = vmatprep.subr.bf16.mxu1 %v3440_v1  ;;  %v4467_v1 = vmov 0.0   ;;  %v3496_v58 = vpack.c.bf16 %v1262_v27, %v1260_v57  ;;  %v1259_v59 = vld [vmem:[#allocation7 + $0x120] sm:$0xff] }
 0x147   :  { %v1527_v57 = vld [vmem:[#allocation10 + $0x80] sm:$0xff] }
 0x148   :  { %3247 = vmatpush1.bf16.msra.mxu0 %v3246_v10  ;;  %v1227_v10 = vld [vmem:[#allocation7 + $0x20] sm:$0xff] }
 0x149   :  { %3443 = vmatpush1.bf16.msra.mxu1 %v3442_v11  ;;  %3249 = vmatprep.subr.bf16.mxu0 %v3248_v12  ;;  %v1229_v11 = vld [vmem:[#allocation7 + $0x30] sm:$0xff]  ;;  %v1232_v12 = vld [vmem:[#allocation7 + $0x48] sm:$0xff] }
 0x14a   :  { %3445 = vmatprep.subr.bf16.mxu1 %v3444_v16  ;;  %v3466_v14 = vpack.c.bf16 %v1229_v11, %v1227_v10  ;;  %v3468_v15 = vpack.c.bf16 %v1234_v13, %v1232_v12  ;;  %v1231_v16 = vld [vmem:[#allocation7 + $0x40] sm:$0xff]  ;;  %v1269_v10 = vld [vmem:[#allocation7 + $0x170] sm:$0xff]  ;;  %v1272_v11 = vld [vmem:[#allocation7 + $0x188] sm:$0xff] }
 0x14b   :  { %v3470_v20 = vpack.c.bf16 %v1233_v17, %v1231_v16  ;;  %v1274_v12 = vld [vmem:[#allocation7 + $0x198] sm:$0xff]  ;;  %v1273_v16 = vld [vmem:[#allocation7 + $0x190] sm:$0xff]  ;;  %v1276_v17 = vld [vmem:[#allocation7 + $0x1a8] sm:$0xff] }
 0x14c   :  { %3251 = vmatpush1.bf16.msra.mxu0 %v3250_v22  ;;  %v1235_v22 = vld [vmem:[#allocation7 + $0x60] sm:$0xff] }
 0x14d   :  { %3447 = vmatpush1.bf16.msra.mxu1 %v3446_v24  ;;  %3253 = vmatprep.subr.bf16.mxu0 %v3252_v25  ;;  %v1237_v24 = vld [vmem:[#allocation7 + $0x70] sm:$0xff]  ;;  %v1240_v25 = vld [vmem:[#allocation7 + $0x88] sm:$0xff] }
 0x14e   :  { %3449 = vmatprep.subr.bf16.mxu1 %v3448_v31  ;;  %v3474_v29 = vpack.c.bf16 %v1237_v24, %v1235_v22  ;;  %v3476_v30 = vpack.c.bf16 %v1242_v26, %v1240_v25  ;;  %v1239_v31 = vld [vmem:[#allocation7 + $0x80] sm:$0xff]  ;;  %v1277_v22 = vld [vmem:[#allocation7 + $0x1b0] sm:$0xff]  ;;  %v1280_v24 = vld [vmem:[#allocation7 + $0x1c8] sm:$0xff] }
 0x14f   :  { %v3478_v35 = vpack.c.bf16 %v1241_v32, %v1239_v31  ;;  %v1282_v25 = vld [vmem:[#allocation7 + $0x1d8] sm:$0xff]  ;;  %v1281_v31 = vld [vmem:[#allocation7 + $0x1d0] sm:$0xff]  ;;  %v1531_v27 = vld [vmem:[#allocation10 + $0xa0] sm:$0xff] }
 0x150   :  { %3255 = vmatpush1.bf16.msra.mxu0 %v3254_v39  ;;  %v1243_v39 = vld [vmem:[#allocation7 + $0xa0] sm:$0xff] }
 0x151   :  { %3451 = vmatpush1.bf16.msra.mxu1 %v3450_v40  ;;  %3257 = vmatprep.subr.bf16.mxu0 %v3256_v41  ;;  %v1245_v40 = vld [vmem:[#allocation7 + $0xb0] sm:$0xff]  ;;  %v1248_v41 = vld [vmem:[#allocation7 + $0xc8] sm:$0xff] }
 0x152   :  { %3453 = vmatprep.subr.bf16.mxu1 %v3452_v36  ;;  %v3482_v43 = vpack.c.bf16 %v1245_v40, %v1243_v39  ;;  %v3484_v44 = vpack.c.bf16 %v1250_v42, %v1248_v41  ;;  %v1247_v36 = vld [vmem:[#allocation7 + $0xc0] sm:$0xff]  ;;  %v1285_v39 = vld [vmem:[#allocation7 + $0x1f0] sm:$0xff]  ;;  %v1288_v41 = vld [vmem:[#allocation7 + $0x208] sm:$0xff] }
 0x153   :  { %v3486_v47 = vpack.c.bf16 %v1249_v37, %v1247_v36  ;;  %v1290_v42 = vld [vmem:[#allocation7 + $0x218] sm:$0xff]  ;;  %v1516_v36 = vld [vmem:[#allocation10 + $0x28] sm:$0xff]  ;;  %v1511_v37 = vld [vmem:[#allocation10] sm:$0xff] }
 0x154   :  { %3259 = vmatpush1.bf16.msra.mxu0 %v3258_v49  ;;  %v1251_v49 = vld [vmem:[#allocation7 + $0xe0] sm:$0xff] }
 0x155   :  { %3455 = vmatpush1.bf16.msra.mxu1 %v3454_v50  ;;  %3261 = vmatprep.subr.bf16.mxu0 %v3260_v51  ;;  %v1253_v50 = vld [vmem:[#allocation7 + $0xf0] sm:$0xff]  ;;  %v1256_v51 = vld [vmem:[#allocation7 + $0x108] sm:$0xff] }
 0x156   :  { %3457 = vmatprep.subr.bf16.mxu1 %v3456_v55  ;;  %v3490_v53 = vpack.c.bf16 %v1253_v50, %v1251_v49  ;;  %v3492_v54 = vpack.c.bf16 %v1258_v52, %v1256_v51  ;;  %v1255_v55 = vld [vmem:[#allocation7 + $0x100] sm:$0xff]  ;;  %v3590_v49 = vpack.c.bf16 %v1515_v46, %v1511_v37 }
 0x157   :  { %858 = vmatmul.mubr.f32.vlgmr.msra.gmra.mrb[0].mxu0 %v639_v28  ;;  %v1519_v51 = vld [vmem:[#allocation10 + $0x40] sm:$0xff] }
 0x158   :  { %1142 = vmatmul.mubr.f32.vlgmr.msra.gmra.mrb[0].mxu1 %v639_v28  ;;  %3263 = vmatpush1.bf16.msra.mxu0 %v3262_v60  ;;  %v3494_v28 = vpack.c.bf16 %v1257_v56, %v1255_v55  ;;  %v1261_v60 = vld [vmem:[#allocation7 + $0x130] sm:$0xff]  ;;  %v1523_v52 = vld [vmem:[#allocation10 + $0x60] sm:$0xff] }
 0x159   :  { %3459 = vmatpush1.bf16.msra.mxu1 %v3458_v61  ;;  %928 = vmatprep.mubr.f32.mxu0 %v4467_v1  ;;  %v1264_v61 = vld [vmem:[#allocation7 + $0x148] sm:$0xff]  ;;  %v3498_v63 = vpack.c.bf16 %v1261_v60, %v1259_v59  ;;  %v3594_v55 = vpack.c.bf16 %v1523_v52, %v1519_v51  ;;  %v4715_v59 = vld [vmem:[#allocation5] sm:$0xf]  ;;  %v4718_v60 = vsub.s32 1, %v4648_v7  ;;  %v1307_v46 = vld [vmem:[#allocation7 + $0x2a0] sm:$0xff] }
 0x15a   :  { %1212 = vmatprep.mubr.f32.mxu1 %v4467_v1  ;;  %3461 = vmatprep.subr.bf16.mxu0 %v3460_v62  ;;  %v1266_v62 = vld [vmem:[#allocation7 + $0x158] sm:$0xff]  ;;  %v1311_v52 = vld [vmem:[#allocation7 + $0x2c0] sm:$0xff] }
 0x15b   :  { %v3500_v0 = vpack.c.bf16 %v1266_v62, %v1264_v61  ;;  %v4721_v61 = vsub.s32 3, %v4648_v7 }
 0x15f   :  { %2989 = vmatmul.mubr.msk.f32.vlgmr.msra.gmra.mrb[0].mxu0 %vm648_vm0, %v641_v5 }
 0x160   :  { %2990 = vmatmul.mubr.msk.f32.vlgmr.msra.gmra.mrb[0].mxu1 %vm648_vm0, %v641_v5  ;;  %3463 = vmatpush1.bf16.msra.mxu0 %v3462_v6  ;;  %v3502_v5 = vpack.c.bf16 %v1265_v8, %v1263_v4  ;;  %v3504_v6 = vpack.c.bf16 %v1270_v3, %v1268_v2 }
 0x161   :  { %3465 = vmatprep.subr.bf16.mxu0 %v3464_v9  ;;  %1661 = vmatprep.mubr.f32.mxu1 %v4467_v1  ;;  %v1267_v9 = vld [vmem:[#allocation7 + $0x160] sm:$0xff] }
 0x162   :  { %v3506_v13 = vpack.c.bf16 %v1269_v10, %v1267_v9 }
 0x164   :  { %3467 = vmatpush1.bf16.msra.mxu0 %v3466_v14  ;;  %v3508_v14 = vpack.c.bf16 %v1274_v12, %v1272_v11  ;;  %v1292_v11 = vld [vmem:[#allocation7 + $0x228] sm:$0xff]  ;;  %v1294_v12 = vld [vmem:[#allocation7 + $0x238] sm:$0xff] }
 0x165   :  { %3469 = vmatprep.subr.bf16.mxu0 %v3468_v15  ;;  %v1271_v15 = vld [vmem:[#allocation7 + $0x180] sm:$0xff] }
 0x166   :  { %v3510_v19 = vpack.c.bf16 %v1273_v16, %v1271_v15 }
 0x168   :  { %3471 = vmatpush1.bf16.msra.mxu0 %v3470_v20  ;;  %v3512_v20 = vpack.c.bf16 %v1278_v18, %v1276_v17  ;;  %v3528_v17 = vpack.c.bf16 %v1294_v12, %v1292_v11  ;;  %v1291_v18 = vld [vmem:[#allocation7 + $0x220] sm:$0xff]  ;;  %v1325_v12 = vld [vmem:[#allocation7 + $0x330] sm:$0xff] }
 0x169   :  { %3473 = vmatprep.subr.bf16.mxu0 %v3472_v21  ;;  %v1275_v21 = vld [vmem:[#allocation7 + $0x1a0] sm:$0xff] }
 0x16a   :  { %v3514_v26 = vpack.c.bf16 %v1277_v22, %v1275_v21  ;;  %v1296_v21 = vld [vmem:[#allocation7 + $0x248] sm:$0xff]  ;;  %v1298_v22 = vld [vmem:[#allocation7 + $0x258] sm:$0xff]  ;;  %v1323_v11 = vld [vmem:[#allocation7 + $0x320] sm:$0xff] }
 0x16c   :  { %3475 = vmatpush1.bf16.msra.mxu0 %v3474_v29  ;;  %v3516_v29 = vpack.c.bf16 %v1282_v25, %v1280_v24  ;;  %v3532_v25 = vpack.c.bf16 %v1298_v22, %v1296_v21 }
 0x16d   :  { %3477 = vmatprep.subr.bf16.mxu0 %v3476_v30  ;;  %v1279_v30 = vld [vmem:[#allocation7 + $0x1c0] sm:$0xff] }
 0x16e   :  { %v3518_v32 = vpack.c.bf16 %v1281_v31, %v1279_v30  ;;  %v1300_v30 = vld [vmem:[#allocation7 + $0x268] sm:$0xff]  ;;  %v1302_v31 = vld [vmem:[#allocation7 + $0x278] sm:$0xff] }
 0x170   :  { %3479 = vmatpush1.bf16.msra.mxu0 %v3478_v35  ;;  %v3520_v35 = vpack.c.bf16 %v1286_v34, %v1284_v33  ;;  %v3536_v33 = vpack.c.bf16 %v1302_v31, %v1300_v30  ;;  %v1299_v34 = vld [vmem:[#allocation7 + $0x260] sm:$0xff] }
 0x171   :  { %3481 = vmatprep.subr.bf16.mxu0 %v3480_v38  ;;  %v1283_v38 = vld [vmem:[#allocation7 + $0x1e0] sm:$0xff] }
 0x172   :  { %v3522_v40 = vpack.c.bf16 %v1285_v39, %v1283_v38  ;;  %v1304_v38 = vld [vmem:[#allocation7 + $0x288] sm:$0xff]  ;;  %v1306_v39 = vld [vmem:[#allocation7 + $0x298] sm:$0xff] }
 0x174   :  { %3483 = vmatpush1.bf16.msra.mxu0 %v3482_v43  ;;  %v3524_v43 = vpack.c.bf16 %v1290_v42, %v1288_v41  ;;  %v3540_v41 = vpack.c.bf16 %v1306_v39, %v1304_v38  ;;  %v1303_v42 = vld [vmem:[#allocation7 + $0x280] sm:$0xff] }
 0x175   :  { %3485 = vmatprep.subr.bf16.mxu0 %v3484_v44  ;;  %v1512_v44 = vld [vmem:[#allocation10 + $0x8] sm:$0xff] }
 0x176   :  { %v3588_v45 = vpack.c.bf16 %v1516_v36, %v1512_v44  ;;  %v1308_v44 = vld [vmem:[#allocation7 + $0x2a8] sm:$0xff]  ;;  %v1310_v36 = vld [vmem:[#allocation7 + $0x2b8] sm:$0xff] }
 0x178   :  { %3487 = vmatpush1.bf16.msra.mxu0 %v3486_v47  ;;  %v1520_v47 = vld [vmem:[#allocation10 + $0x48] sm:$0xff]  ;;  %3589 = vmatprep.subr.bf16.mxu1 %v3588_v45  ;;  %v3544_v45 = vpack.c.bf16 %v1310_v36, %v1308_v44  ;;  %v4732_v36 = vsub.s32 2, %v4648_v7 }
 0x179   :  { %3489 = vmatprep.subr.bf16.mxu0 %v3488_v48  ;;  %v1524_v48 = vld [vmem:[#allocation10 + $0x68] sm:$0xff]  ;;  %3591 = vmatpush1.bf16.msra.mxu1 %v3590_v49  ;;  %v1314_v49 = vld [vmem:[#allocation7 + $0x2d8] sm:$0xff] }
 0x17a   :  { %v3592_v50 = vpack.c.bf16 %v1524_v48, %v1520_v47  ;;  %v1309_v47 = vld [vmem:[#allocation7 + $0x2b0] sm:$0xff]  ;;  %v1312_v48 = vld [vmem:[#allocation7 + $0x2c8] sm:$0xff] }
 0x17b   :  { %v3548_v51 = vpack.c.bf16 %v1314_v49, %v1312_v48  ;;  %v1350_v48 = vld [vmem:[#allocation7 + $0x3f8] sm:$0xff] }
 0x17c   :  { %3491 = vmatpush1.bf16.msra.mxu0 %v3490_v53  ;;  %v1528_v53 = vld [vmem:[#allocation10 + $0x88] sm:$0xff]  ;;  %3593 = vmatprep.subr.bf16.mxu1 %v3592_v50  ;;  %v3546_v50 = vpack.c.bf16 %v1309_v47, %v1307_v46 }
 0x17d   :  { %3493 = vmatprep.subr.bf16.mxu0 %v3492_v54  ;;  %v1532_v54 = vld [vmem:[#allocation10 + $0xa8] sm:$0xff]  ;;  %3595 = vmatpush1.bf16.msra.mxu1 %v3594_v55  ;;  %v1318_v55 = vld [vmem:[#allocation7 + $0x2f8] sm:$0xff] }
 0x17e   :  { %v3596_v56 = vpack.c.bf16 %v1532_v54, %v1528_v53  ;;  %v1313_v53 = vld [vmem:[#allocation7 + $0x2d0] sm:$0xff]  ;;  %v1316_v54 = vld [vmem:[#allocation7 + $0x2e8] sm:$0xff] }
 0x17f   :  { %v1345_v46 = vld [vmem:[#allocation7 + $0x3d0] sm:$0xff]  ;;  %v1348_v47 = vld [vmem:[#allocation7 + $0x3e8] sm:$0xff] }
 0x180   :  { %3495 = vmatpush1.bf16.msra.mxu0 %v3494_v28  ;;  %v3598_v28 = vpack.c.bf16 %v1531_v27, %v1527_v57  ;;  %3597 = vmatprep.subr.bf16.mxu1 %v3596_v56  ;;  %v3550_v56 = vpack.c.bf16 %v1313_v53, %v1311_v52  ;;  %v3552_v57 = vpack.c.bf16 %v1318_v55, %v1316_v54  ;;  %v1315_v27 = vld [vmem:[#allocation7 + $0x2e0] sm:$0xff]  ;;  %v1349_v53 = vld [vmem:[#allocation7 + $0x3f0] sm:$0xff] }
 0x181   :  { %3497 = vmatprep.subr.bf16.mxu0 %v3496_v58  ;;  %v4713_v58 = vsub.s32 0, %v4648_v7  ;;  %v1347_v52 = vld [vmem:[#allocation7 + $0x3e0] sm:$0xff] }
 0x182   :  { %3599 = vmatpush1.bf16.msra.mxu1 %v3598_v28  ;;  %v1317_v28 = vld [vmem:[#allocation7 + $0x2f0] sm:$0xff]  ;;  %v3586_v54 = vpack.c.bf16 %v1349_v53, %v1347_v52  ;;  %v1795_v52 = vld [vmem:[#allocation13 + $0x1a0] sm:$0xff] }
 0x183   :  { %v546_v62 = vrot.slane %v4715_v59, %v4713_v58 }
 0x184   :  { %3499 = vmatpush1.bf16.msra.mxu0 %v3498_v63  ;;  %v550_v63 = vrot.slane %v4715_v59, %v4718_v60 }
 0x185   :  { %3501 = vmatprep.subr.bf16.mxu0 %v3500_v0  ;;  %v558_v0 = vrot.slane %v4715_v59, %v4721_v61 }
 0x188   :  { %3503 = vmatpush1.bf16.msra.mxu0 %v3502_v5  ;;  %v1287_v5 = vld [vmem:[#allocation7 + $0x200] sm:$0xff] }
 0x189   :  { %3505 = vmatprep.subr.bf16.mxu0 %v3504_v6  ;;  %v1289_v6 = vld [vmem:[#allocation7 + $0x210] sm:$0xff] }
 0x18a   :  { %v3526_v15 = vpack.c.bf16 %v1289_v6, %v1287_v5  ;;  %v1324_v5 = vld [vmem:[#allocation7 + $0x328] sm:$0xff]  ;;  %v1326_v6 = vld [vmem:[#allocation7 + $0x338] sm:$0xff] }
 0x18c   :  { %3507 = vmatpush1.bf16.msra.mxu0 %v3506_v13 }
 0x18d   :  { %3509 = vmatprep.subr.bf16.mxu0 %v3508_v14 }
 0x190   :  { %3511 = vmatpush1.bf16.msra.mxu0 %v3510_v19  ;;  %v1293_v19 = vld [vmem:[#allocation7 + $0x230] sm:$0xff] }
 0x191   :  { %3513 = vmatprep.subr.bf16.mxu0 %v3512_v20  ;;  %v3530_v24 = vpack.c.bf16 %v1293_v19, %v1291_v18  ;;  %v1329_v18 = vld [vmem:[#allocation7 + $0x350] sm:$0xff]  ;;  %v1332_v19 = vld [vmem:[#allocation7 + $0x368] sm:$0xff] }
 0x194   :  { %3515 = vmatpush1.bf16.msra.mxu0 %v3514_v26  ;;  %v1295_v26 = vld [vmem:[#allocation7 + $0x240] sm:$0xff] }
 0x195   :  { %3517 = vmatprep.subr.bf16.mxu0 %v3516_v29  ;;  %v1297_v29 = vld [vmem:[#allocation7 + $0x250] sm:$0xff] }
 0x198   :  { %3519 = vmatpush1.bf16.msra.mxu0 %v3518_v32  ;;  %v3534_v32 = vpack.c.bf16 %v1297_v29, %v1295_v26  ;;  %v1336_v26 = vld [vmem:[#allocation7 + $0x388] sm:$0xff]  ;;  %v1338_v29 = vld [vmem:[#allocation7 + $0x398] sm:$0xff] }
 0x199   :  { %3521 = vmatprep.subr.bf16.mxu0 %v3520_v35  ;;  %v1301_v35 = vld [vmem:[#allocation7 + $0x270] sm:$0xff]  ;;  %v3572_v31 = vpack.c.bf16 %v1338_v29, %v1336_v26  ;;  %v1514_v26 = vld [vmem:[#allocation10 + $0x18] sm:$0xff] }
 0x19a   :  { %v1518_v29 = vld [vmem:[#allocation10 + $0x38] sm:$0xff] }
 0x19c   :  { %3523 = vmatpush1.bf16.msra.mxu0 %v3522_v40  ;;  %v3538_v40 = vpack.c.bf16 %v1301_v35, %v1299_v34  ;;  %v1340_v34 = vld [vmem:[#allocation7 + $0x3a8] sm:$0xff]  ;;  %v1342_v35 = vld [vmem:[#allocation7 + $0x3b8] sm:$0xff] }
 0x19d   :  { %3525 = vmatprep.subr.bf16.mxu0 %v3524_v43  ;;  %v1305_v43 = vld [vmem:[#allocation7 + $0x290] sm:$0xff]  ;;  %v3576_v39 = vpack.c.bf16 %v1342_v35, %v1340_v34 }
 0x19e   :  { %v3542_v37 = vpack.c.bf16 %v1305_v43, %v1303_v42  ;;  %v1344_v42 = vld [vmem:[#allocation7 + $0x3c8] sm:$0xff]  ;;  %v1346_v43 = vld [vmem:[#allocation7 + $0x3d8] sm:$0xff] }
 0x19f   :  { %v1745_v35 = vld [vmem:[#allocation13 + $0x10] sm:$0xff] }
 0x232   :  { %v930_v4 = vpop.f32.mrb[0].mxu0 }
 0x233   :  { %v4100_v8 = vadd.f32 %v930_v4, %v546_v62  ;;  %v4729_v2 = vpop.f32.mrb[0].mxu1  ;;  %v932_v3 = vpop.f32.mrb[1].mxu0  ;;  %v1320_v62 = vld [vmem:[#allocation7 + $0x308] sm:$0xff] }
 0x234   :  { %v4101_v9 = vadd.f32 %v932_v3, %v550_v63  ;;  %v1216_v10 = vpop.f32.mrb[1].mxu1  ;;  %v1322_v63 = vld [vmem:[#allocation7 + $0x318] sm:$0xff]  ;;  %v1321_v3 = vld [vmem:[#allocation7 + $0x310] sm:$0xff] }
 0x235   :  { %v4103_v13 = vadd.f32 %v1216_v10, %v558_v0  ;;  %v1219_v16 = vmax.f32 %v4100_v8, 0.0  ;;  %v3554_v0 = vpack.c.bf16 %v1317_v28, %v1315_v27  ;;  %v3556_v4 = vpack.c.bf16 %v1322_v63, %v1320_v62  ;;  %v1319_v8 = vld [vmem:[#allocation7 + $0x300] sm:$0xff]  ;;  %v1540_v27 = vld [vmem:[#allocation10 + $0xe8] sm:$0xff] }
 0x236   :  { %v1220_v14 = vmax.f32 %v4101_v9, 0.0  ;;  %v3558_v9 = vpack.c.bf16 %v1321_v3, %v1319_v8  ;;  %v3560_v10 = vpack.c.bf16 %v1326_v6, %v1324_v5  ;;  %v1535_v62 = vld [vmem:[#allocation10 + $0xc0] sm:$0xff] }
 0x237   :  { %v1222_v20 = vmax.f32 %v4103_v13, 0.0  ;;  %v1328_v13 = vld [vmem:[#allocation7 + $0x348] sm:$0xff] }
 0x238   :  { %1427 = vmatprep.mubr.f32.mxu0 %v1220_v14  ;;  %v1330_v14 = vld [vmem:[#allocation7 + $0x358] sm:$0xff]  ;;  %v1539_v63 = vld [vmem:[#allocation10 + $0xe0] sm:$0xff] }
 0x239   :  { %1428 = vmatmul.mubr.f32.vlgmr.msra.gmra.mrb[2].mxu0 %v1219_v16  ;;  %v3564_v16 = vpack.c.bf16 %v1330_v14, %v1328_v13  ;;  %v1543_v3 = vld [vmem:[#allocation10 + $0x100] sm:$0xff]  ;;  %v1560_v13 = vld [vmem:[#allocation10 + $0x188] sm:$0xff] }
 0x23a   :  { %3527 = vmatpush1.bf16.msra.mxu0 %v3526_v15  ;;  %1498 = vmatprep.mubr.f32.mxu0 %v1222_v20  ;;  %v3562_v15 = vpack.c.bf16 %v1325_v12, %v1323_v11  ;;  %v1334_v20 = vld [vmem:[#allocation7 + $0x378] sm:$0xff]  ;;  %v1547_v5 = vld [vmem:[#allocation10 + $0x120] sm:$0xff] }
 0x23b   :  { %3529 = vmatprep.subr.bf16.mxu0 %v3528_v17  ;;  %v1327_v17 = vld [vmem:[#allocation7 + $0x340] sm:$0xff]  ;;  %v3568_v22 = vpack.c.bf16 %v1334_v20, %v1332_v19  ;;  %v3606_v6 = vpack.c.bf16 %v1547_v5, %v1543_v3  ;;  %v1568_v19 = vld [vmem:[#allocation10 + $0x1c8] sm:$0xff] }
 0x23c   :  { %v3566_v21 = vpack.c.bf16 %v1329_v18, %v1327_v17  ;;  %v1551_v11 = vld [vmem:[#allocation10 + $0x140] sm:$0xff]  ;;  %v1572_v20 = vld [vmem:[#allocation10 + $0x1e8] sm:$0xff] }
 0x23d   :  { %v1555_v12 = vld [vmem:[#allocation10 + $0x160] sm:$0xff] }
 0x23e   :  { %3531 = vmatpush1.bf16.msra.mxu0 %v3530_v24  ;;  %v1331_v24 = vld [vmem:[#allocation7 + $0x360] sm:$0xff]  ;;  %v3610_v14 = vpack.c.bf16 %v1555_v12, %v1551_v11  ;;  %v1829_v11 = vld [vmem:[#allocation13 + $0x2b0] sm:$0xff]  ;;  %v1836_v12 = vld [vmem:[#allocation13 + $0x2e8] sm:$0xff] }
 0x23f   :  { %3533 = vmatprep.subr.bf16.mxu0 %v3532_v25  ;;  %v1333_v25 = vld [vmem:[#allocation7 + $0x370] sm:$0xff]  ;;  %v1563_v17 = vld [vmem:[#allocation10 + $0x1a0] sm:$0xff] }
 0x240   :  { %v3570_v30 = vpack.c.bf16 %v1333_v25, %v1331_v24  ;;  %v1567_v24 = vld [vmem:[#allocation10 + $0x1c0] sm:$0xff] }
 0x241   :  { %v1571_v25 = vld [vmem:[#allocation10 + $0x1e0] sm:$0xff] }
 0x242   :  { %3535 = vmatpush1.bf16.msra.mxu0 %v3534_v32  ;;  %v1335_v32 = vld [vmem:[#allocation7 + $0x380] sm:$0xff] }
 0x243   :  { %3537 = vmatprep.subr.bf16.mxu0 %v3536_v33  ;;  %v1337_v33 = vld [vmem:[#allocation7 + $0x390] sm:$0xff]  ;;  %v1815_v3 = vld [vmem:[#allocation13 + $0x240] sm:$0xff]  ;;  %v1822_v5 = vld [vmem:[#allocation13 + $0x278] sm:$0xff] }
 0x244   :  { %v3574_v38 = vpack.c.bf16 %v1337_v33, %v1335_v32  ;;  %v1746_v32 = vld [vmem:[#allocation13 + $0x18] sm:$0xff]  ;;  %v1753_v33 = vld [vmem:[#allocation13 + $0x50] sm:$0xff] }
 0x245   :  { %v3780_v34 = vpack.c.bf16 %v1753_v33, %v1746_v32  ;;  %v1871_v32 = vld [vmem:[#allocation13 + $0x400] sm:$0xff]  ;;  %v1878_v33 = vld [vmem:[#allocation13 + $0x438] sm:$0xff] }
 0x246   :  { %3539 = vmatpush1.bf16.msra.mxu0 %v3538_v40  ;;  %v1339_v40 = vld [vmem:[#allocation7 + $0x3a0] sm:$0xff] }
 0x247   :  { %3541 = vmatprep.subr.bf16.mxu0 %v3540_v41  ;;  %v1341_v41 = vld [vmem:[#allocation7 + $0x3b0] sm:$0xff] }
 0x248   :  { %v3578_v44 = vpack.c.bf16 %v1341_v41, %v1339_v40  ;;  %v1760_v40 = vld [vmem:[#allocation13 + $0x88] sm:$0xff]  ;;  %v1767_v41 = vld [vmem:[#allocation13 + $0xc0] sm:$0xff] }
 0x24a   :  { %3543 = vmatpush1.bf16.msra.mxu0 %v3542_v37  ;;  %v3580_v37 = vpack.c.bf16 %v1346_v43, %v1344_v42  ;;  %v3784_v42 = vpack.c.bf16 %v1767_v41, %v1760_v40  ;;  %v1759_v43 = vld [vmem:[#allocation13 + $0x80] sm:$0xff]  ;;  %v1885_v40 = vld [vmem:[#allocation13 + $0x470] sm:$0xff]  ;;  %v1892_v41 = vld [vmem:[#allocation13 + $0x4a8] sm:$0xff] }
 0x24b   :  { %3545 = vmatprep.subr.bf16.mxu0 %v3544_v45  ;;  %v1343_v45 = vld [vmem:[#allocation7 + $0x3c0] sm:$0xff] }
 0x24c   :  { %v3582_v49 = vpack.c.bf16 %v1345_v46, %v1343_v45  ;;  %v1774_v45 = vld [vmem:[#allocation13 + $0xf8] sm:$0xff]  ;;  %v1781_v46 = vld [vmem:[#allocation13 + $0x130] sm:$0xff] }
 0x24e   :  { %3547 = vmatpush1.bf16.msra.mxu0 %v3546_v50  ;;  %v554_v50 = vrot.slane %v4715_v59, %v4732_v36  ;;  %v1544_v59 = vld [vmem:[#allocation10 + $0x108] sm:$0xff] }
 0x24f   :  { %3549 = vmatprep.subr.bf16.mxu0 %v3548_v51  ;;  %v3584_v51 = vpack.c.bf16 %v1350_v48, %v1348_v47  ;;  %v3788_v47 = vpack.c.bf16 %v1781_v46, %v1774_v45  ;;  %v1773_v48 = vld [vmem:[#allocation13 + $0xf0] sm:$0xff]  ;;  %v1899_v45 = vld [vmem:[#allocation13 + $0x4e0] sm:$0xff]  ;;  %v1906_v46 = vld [vmem:[#allocation13 + $0x518] sm:$0xff] }
 0x250   :  { %v4102_v55 = vadd.f32 %v4729_v2, %v554_v50  ;;  %v1552_v2 = vld [vmem:[#allocation10 + $0x148] sm:$0xff] }
 0x252   :  { %3551 = vmatpush1.bf16.msra.mxu0 %v3550_v56  ;;  %v1221_v56 = vmax.f32 %v4102_v55, 0.0  ;;  %v1794_v55 = vld [vmem:[#allocation13 + $0x198] sm:$0xff] }
 0x253   :  { %3553 = vmatprep.subr.bf16.mxu0 %v3552_v57  ;;  %v1536_v57 = vld [vmem:[#allocation10 + $0xc8] sm:$0xff] }
 0x254   :  { %v3600_v28 = vpack.c.bf16 %v1540_v27, %v1536_v57  ;;  %v1802_v57 = vld [vmem:[#allocation13 + $0x1d8] sm:$0xff]  ;;  %v1809_v27 = vld [vmem:[#allocation13 + $0x210] sm:$0xff] }
 0x256   :  { %3555 = vmatpush1.bf16.msra.mxu0 %v3554_v0  ;;  %v3602_v0 = vpack.c.bf16 %v1539_v63, %v1535_v62  ;;  %3601 = vmatprep.subr.bf16.mxu1 %v3600_v28  ;;  %v3796_v28 = vpack.c.bf16 %v1809_v27, %v1802_v57  ;;  %v1801_v62 = vld [vmem:[#allocation13 + $0x1d0] sm:$0xff]  ;;  %v1808_v63 = vld [vmem:[#allocation13 + $0x208] sm:$0xff]  ;;  %v1927_v57 = vld [vmem:[#allocation13 + $0x5c0] sm:$0xff] }
 0x257   :  { %3557 = vmatprep.subr.bf16.mxu0 %v3556_v4  ;;  %v1548_v4 = vld [vmem:[#allocation10 + $0x128] sm:$0xff]  ;;  %v1934_v27 = vld [vmem:[#allocation13 + $0x5f8] sm:$0xff] }
 0x258   :  { %3603 = vmatpush1.bf16.msra.mxu1 %v3602_v0  ;;  %v3604_v8 = vpack.c.bf16 %v1548_v4, %v1544_v59  ;;  %v3798_v0 = vpack.c.bf16 %v1808_v63, %v1801_v62  ;;  %v1816_v59 = vld [vmem:[#allocation13 + $0x248] sm:$0xff]  ;;  %v1823_v4 = vld [vmem:[#allocation13 + $0x280] sm:$0xff]  ;;  %v1942_v62 = vld [vmem:[#allocation13 + $0x638] sm:$0xff] }
 0x259   :  { %v1949_v63 = vld [vmem:[#allocation13 + $0x670] sm:$0xff] }
 0x25a   :  { %3559 = vmatpush1.bf16.msra.mxu0 %v3558_v9  ;;  %3605 = vmatprep.subr.bf16.mxu1 %v3604_v8  ;;  %v1556_v9 = vld [vmem:[#allocation10 + $0x168] sm:$0xff]  ;;  %v3800_v8 = vpack.c.bf16 %v1823_v4, %v1816_v59  ;;  %v1941_v59 = vld [vmem:[#allocation13 + $0x630] sm:$0xff] }
 0x25b   :  { %3561 = vmatprep.subr.bf16.mxu0 %v3560_v10  ;;  %v3608_v10 = vpack.c.bf16 %v1556_v9, %v1552_v2  ;;  %v1830_v2 = vld [vmem:[#allocation13 + $0x2b8] sm:$0xff]  ;;  %v1837_v9 = vld [vmem:[#allocation13 + $0x2f0] sm:$0xff]  ;;  %v1948_v4 = vld [vmem:[#allocation13 + $0x668] sm:$0xff] }
 0x25c   :  { %3607 = vmatpush1.bf16.msra.mxu1 %v3606_v6  ;;  %v3802_v6 = vpack.c.bf16 %v1822_v5, %v1815_v3  ;;  %v1351_v3 = vld [vmem:[#allocation8] sm:$0x3] }
 0x25d   :  { %3609 = vmatprep.subr.bf16.mxu1 %v3608_v10  ;;  %v3804_v10 = vpack.c.bf16 %v1837_v9, %v1830_v2  ;;  %v1356_v5 = vrot.slane %v1351_v3, %v4713_v58 }
 0x25e   :  { %3563 = vmatpush1.bf16.msra.mxu0 %v3562_v15  ;;  %v1564_v15 = vld [vmem:[#allocation10 + $0x1a8] sm:$0xff] }
 0x25f   :  { %3565 = vmatprep.subr.bf16.mxu0 %v3564_v16  ;;  %v1559_v16 = vld [vmem:[#allocation10 + $0x180] sm:$0xff]  ;;  %v3612_v18 = vpack.c.bf16 %v1564_v15, %v1560_v13  ;;  %v3806_v13 = vpack.c.bf16 %v1836_v12, %v1829_v11 }
 0x260   :  { %3611 = vmatpush1.bf16.msra.mxu1 %v3610_v14  ;;  %v1844_v14 = vld [vmem:[#allocation13 + $0x328] sm:$0xff]  ;;  %v1851_v15 = vld [vmem:[#allocation13 + $0x360] sm:$0xff] }
 0x261   :  { %3613 = vmatprep.subr.bf16.mxu1 %v3612_v18  ;;  %v1850_v18 = vld [vmem:[#allocation13 + $0x358] sm:$0xff] }
 0x262   :  { %3567 = vmatpush1.bf16.msra.mxu0 %v3566_v21  ;;  %v3614_v21 = vpack.c.bf16 %v1563_v17, %v1559_v16  ;;  %v3808_v16 = vpack.c.bf16 %v1851_v15, %v1844_v14  ;;  %v1843_v17 = vld [vmem:[#allocation13 + $0x320] sm:$0xff]  ;;  %v1505_v14 = vld [vmem:[%s4849_s1] sm:$0xff]  ;;  %v1513_v15 = vld [vmem:[#allocation10 + $0x10] sm:$0xff] }
 0x263   :  { %3569 = vmatprep.subr.bf16.mxu0 %v3568_v22  ;;  %v3616_v22 = vpack.c.bf16 %v1572_v20, %v1568_v19  ;;  %v3810_v19 = vpack.c.bf16 %v1850_v18, %v1843_v17  ;;  %v1858_v20 = vld [vmem:[#allocation13 + $0x398] sm:$0xff] }
 0x264   :  { %3615 = vmatpush1.bf16.msra.mxu1 %v3614_v21  ;;  %v1865_v21 = vld [vmem:[#allocation13 + $0x3d0] sm:$0xff] }
 0x265   :  { %3617 = vmatprep.subr.bf16.mxu1 %v3616_v22  ;;  %v3812_v22 = vpack.c.bf16 %v1865_v21, %v1858_v20  ;;  %v1522_v18 = vld [vmem:[#allocation10 + $0x58] sm:$0xff] }
 0x266   :  { %3571 = vmatpush1.bf16.msra.mxu0 %v3570_v30  ;;  %v3618_v30 = vpack.c.bf16 %v1571_v25, %v1567_v24  ;;  %v1857_v24 = vld [vmem:[#allocation13 + $0x390] sm:$0xff]  ;;  %v1864_v25 = vld [vmem:[#allocation13 + $0x3c8] sm:$0xff] }
 0x267   :  { %3573 = vmatprep.subr.bf16.mxu0 %v3572_v31  ;;  %v3620_v31 = vpack.c.bf16 %v1518_v29, %v1514_v26  ;;  %v3814_v26 = vpack.c.bf16 %v1864_v25, %v1857_v24  ;;  %v1872_v29 = vld [vmem:[#allocation13 + $0x408] sm:$0xff] }
 0x268   :  { %3619 = vmatpush1.bf16.msra.mxu1 %v3618_v30  ;;  %v1879_v30 = vld [vmem:[#allocation13 + $0x440] sm:$0xff]  ;;  %v1521_v25 = vld [vmem:[#allocation10 + $0x50] sm:$0xff] }
 0x269   :  { %3621 = vmatprep.subr.bf16.mxu1 %v3620_v31  ;;  %v3816_v31 = vpack.c.bf16 %v1879_v30, %v1872_v29  ;;  %v1530_v29 = vld [vmem:[#allocation10 + $0x98] sm:$0xff] }
 0x26a   :  { %3575 = vmatpush1.bf16.msra.mxu0 %v3574_v38  ;;  %v1752_v38 = vld [vmem:[#allocation13 + $0x48] sm:$0xff]  ;;  %v1534_v30 = vld [vmem:[#allocation10 + $0xb8] sm:$0xff] }
 0x26b   :  { %3577 = vmatprep.subr.bf16.mxu0 %v3576_v39  ;;  %v3782_v39 = vpack.c.bf16 %v1752_v38, %v1745_v35  ;;  %v1886_v35 = vld [vmem:[#allocation13 + $0x478] sm:$0xff]  ;;  %v1893_v38 = vld [vmem:[#allocation13 + $0x4b0] sm:$0xff] }
 0x26e   :  { %3579 = vmatpush1.bf16.msra.mxu0 %v3578_v44  ;;  %v1766_v44 = vld [vmem:[#allocation13 + $0xb8] sm:$0xff] }
 0x26f   :  { %3581 = vmatprep.subr.bf16.mxu0 %v3580_v37  ;;  %v3786_v37 = vpack.c.bf16 %v1766_v44, %v1759_v43  ;;  %v1900_v43 = vld [vmem:[#allocation13 + $0x4e8] sm:$0xff]  ;;  %v1907_v44 = vld [vmem:[#allocation13 + $0x520] sm:$0xff] }
 0x272   :  { %3583 = vmatpush1.bf16.msra.mxu0 %v3582_v49  ;;  %v1780_v49 = vld [vmem:[#allocation13 + $0x128] sm:$0xff] }
 0x273   :  { %3585 = vmatprep.subr.bf16.mxu0 %v3584_v51  ;;  %v3790_v50 = vpack.c.bf16 %v1780_v49, %v1773_v48  ;;  %v1788_v51 = vld [vmem:[#allocation13 + $0x168] sm:$0xff]  ;;  %v1914_v48 = vld [vmem:[#allocation13 + $0x558] sm:$0xff]  ;;  %v1921_v49 = vld [vmem:[#allocation13 + $0x590] sm:$0xff] }
 0x274   :  { %v3792_v53 = vpack.c.bf16 %v1795_v52, %v1788_v51  ;;  %v1913_v51 = vld [vmem:[#allocation13 + $0x550] sm:$0xff]  ;;  %v1920_v52 = vld [vmem:[#allocation13 + $0x588] sm:$0xff] }
 0x276   :  { %3587 = vmatpush1.bf16.msra.mxu0 %v3586_v54  ;;  %v1787_v54 = vld [vmem:[#allocation13 + $0x160] sm:$0xff] }
 0x277   :  { %3781 = vmatprep.subr.bf16.mxu0 %v3780_v34  ;;  %v3818_v34 = vpack.c.bf16 %v1878_v33, %v1871_v32  ;;  %v3628_v32 = vpack.c.bf16 %v1534_v30, %v1530_v29  ;;  %v1529_v33 = vld [vmem:[#allocation10 + $0x90] sm:$0xff] }
 0x278   :  { %v1785_v30 = vld [vmem:[#allocation13 + $0x150] sm:$0xff] }
 0x279   :  { %1499 = vmatmul.mubr.f32.vlgmr.msra.gmra.mrb[2].mxu0 %v1221_v56  ;;  %v3794_v56 = vpack.c.bf16 %v1794_v55, %v1787_v54  ;;  %v1928_v54 = vld [vmem:[#allocation13 + $0x5c8] sm:$0xff]  ;;  %v1935_v55 = vld [vmem:[#allocation13 + $0x600] sm:$0xff] }
 0x27a   :  { %3783 = vmatpush1.bf16.msra.mxu0 %v3782_v39  ;;  %v3820_v39 = vpack.c.bf16 %v1893_v38, %v1886_v35  ;;  %v1538_v35 = vld [vmem:[#allocation10 + $0xd8] sm:$0xff] }
 0x27b   :  { %3785 = vmatprep.subr.bf16.mxu0 %v3784_v42  ;;  %v3822_v42 = vpack.c.bf16 %v1892_v41, %v1885_v40  ;;  %v1542_v38 = vld [vmem:[#allocation10 + $0xf8] sm:$0xff]  ;;  %v1537_v41 = vld [vmem:[#allocation10 + $0xd0] sm:$0xff] }
 0x27c   :  { %v3632_v40 = vpack.c.bf16 %v1542_v38, %v1538_v35  ;;  %v1799_v35 = vld [vmem:[#allocation13 + $0x1c0] sm:$0xff]  ;;  %v1806_v38 = vld [vmem:[#allocation13 + $0x1f8] sm:$0xff] }
 0x27e   :  { %3787 = vmatpush1.bf16.msra.mxu0 %v3786_v37  ;;  %v3824_v37 = vpack.c.bf16 %v1907_v44, %v1900_v43  ;;  %v1546_v43 = vld [vmem:[#allocation10 + $0x118] sm:$0xff] }
 0x27f   :  { %3789 = vmatprep.subr.bf16.mxu0 %v3788_v47  ;;  %v3826_v47 = vpack.c.bf16 %v1906_v46, %v1899_v45  ;;  %v1550_v44 = vld [vmem:[#allocation10 + $0x138] sm:$0xff]  ;;  %v1545_v46 = vld [vmem:[#allocation10 + $0x110] sm:$0xff] }
 0x280   :  { %v3636_v45 = vpack.c.bf16 %v1550_v44, %v1546_v43  ;;  %v1813_v43 = vld [vmem:[#allocation13 + $0x230] sm:$0xff]  ;;  %v1820_v44 = vld [vmem:[#allocation13 + $0x268] sm:$0xff] }
 0x282   :  { %3791 = vmatpush1.bf16.msra.mxu0 %v3790_v50  ;;  %v3828_v50 = vpack.c.bf16 %v1921_v49, %v1914_v48  ;;  %v1558_v48 = vld [vmem:[#allocation10 + $0x178] sm:$0xff] }
 0x283   :  { %3793 = vmatprep.subr.bf16.mxu0 %v3792_v53  ;;  %v3830_v53 = vpack.c.bf16 %v1920_v52, %v1913_v51  ;;  %v1553_v51 = vld [vmem:[#allocation10 + $0x150] sm:$0xff] }
 0x284   :  { %v1557_v52 = vld [vmem:[#allocation10 + $0x170] sm:$0xff] }
 0x286   :  { %3795 = vmatpush1.bf16.msra.mxu0 %v3794_v56  ;;  %v3832_v56 = vpack.c.bf16 %v1935_v55, %v1928_v54  ;;  %v1566_v54 = vld [vmem:[#allocation10 + $0x1b8] sm:$0xff]  ;;  %v3642_v55 = vpack.c.bf16 %v1557_v52, %v1553_v51 }
 0x287   :  { %3797 = vmatprep.subr.bf16.mxu0 %v3796_v28  ;;  %v3834_v28 = vpack.c.bf16 %v1934_v27, %v1927_v57  ;;  %v1561_v57 = vld [vmem:[#allocation10 + $0x190] sm:$0xff] }
 0x288   :  { %v1565_v27 = vld [vmem:[#allocation10 + $0x1b0] sm:$0xff] }
 0x28a   :  { %3799 = vmatpush1.bf16.msra.mxu0 %v3798_v0  ;;  %v3836_v0 = vpack.c.bf16 %v1949_v63, %v1942_v62  ;;  %v1574_v62 = vld [vmem:[#allocation10 + $0x1f8] sm:$0xff]  ;;  %v3646_v63 = vpack.c.bf16 %v1565_v27, %v1561_v57 }
 0x28b   :  { %3801 = vmatprep.subr.bf16.mxu0 %v3800_v8  ;;  %v3838_v8 = vpack.c.bf16 %v1948_v4, %v1941_v59  ;;  %v1569_v59 = vld [vmem:[#allocation10 + $0x1d0] sm:$0xff] }
 0x28c   :  { %v1573_v4 = vld [vmem:[#allocation10 + $0x1f0] sm:$0xff] }
 0x28e   :  { %3803 = vmatpush1.bf16.msra.mxu0 %v3802_v6  ;;  %v1360_v6 = vrot.slane %v1351_v3, %v4718_v60  ;;  %v1751_v3 = vld [vmem:[#allocation13 + $0x40] sm:$0xff] }
 0x28f   :  { %3805 = vmatprep.subr.bf16.mxu0 %v3804_v10 }
 0x292   :  { %3807 = vmatpush1.bf16.msra.mxu0 %v3806_v13 }
 0x293   :  { %3809 = vmatprep.subr.bf16.mxu0 %v3808_v16  ;;  %v1517_v16 = vld [vmem:[#allocation10 + $0x30] sm:$0xff] }
 0x294   :  { %v3622_v21 = vpack.c.bf16 %v1517_v16, %v1513_v15  ;;  %v1764_v15 = vld [vmem:[#allocation13 + $0xa8] sm:$0xff] }
 0x295   :  { %v1772_v16 = vld [vmem:[#allocation13 + $0xe8] sm:$0xff] }
 0x296   :  { %3811 = vmatpush1.bf16.msra.mxu0 %v3810_v19  ;;  %v1526_v19 = vld [vmem:[#allocation10 + $0x78] sm:$0xff] }
 0x297   :  { %3813 = vmatprep.subr.bf16.mxu0 %v3812_v22  ;;  %v3624_v24 = vpack.c.bf16 %v1526_v19, %v1522_v18 }
 0x29a   :  { %3815 = vmatpush1.bf16.msra.mxu0 %v3814_v26  ;;  %v1525_v26 = vld [vmem:[#allocation10 + $0x70] sm:$0xff] }
 0x29b   :  { %3817 = vmatprep.subr.bf16.mxu0 %v3816_v31  ;;  %v3626_v31 = vpack.c.bf16 %v1525_v26, %v1521_v25  ;;  %v1793_v25 = vld [vmem:[#allocation13 + $0x190] sm:$0xff] }
 0x29e   :  { %3819 = vmatpush1.bf16.msra.mxu0 %v3818_v34  ;;  %v1533_v34 = vld [vmem:[#allocation10 + $0xb0] sm:$0xff] }
 0x29f   :  { %3821 = vmatprep.subr.bf16.mxu0 %v3820_v39  ;;  %v3630_v39 = vpack.c.bf16 %v1533_v34, %v1529_v33  ;;  %v1807_v33 = vld [vmem:[#allocation13 + $0x200] sm:$0xff] }
 0x2a2   :  { %3823 = vmatpush1.bf16.msra.mxu0 %v3822_v42  ;;  %v1541_v42 = vld [vmem:[#allocation10 + $0xf0] sm:$0xff] }
 0x2a3   :  { %3825 = vmatprep.subr.bf16.mxu0 %v3824_v37  ;;  %v3634_v37 = vpack.c.bf16 %v1541_v42, %v1537_v41  ;;  %v3670_v41 = vpack.c.bf16 %v1806_v38, %v1799_v35 }
 0x2a6   :  { %3827 = vmatpush1.bf16.msra.mxu0 %v3826_v47  ;;  %v1554_v47 = vld [vmem:[#allocation10 + $0x158] sm:$0xff] }
 0x2a7   :  { %3829 = vmatprep.subr.bf16.mxu0 %v3828_v50  ;;  %v3640_v50 = vpack.c.bf16 %v1558_v48, %v1554_v47  ;;  %v1827_v47 = vld [vmem:[#allocation13 + $0x2a0] sm:$0xff]  ;;  %v1834_v48 = vld [vmem:[#allocation13 + $0x2d8] sm:$0xff] }
 0x2a8   :  { %v3678_v51 = vpack.c.bf16 %v1834_v48, %v1827_v47  ;;  %v1953_v48 = vld [vmem:[#allocation13 + $0x690] sm:$0xff] }
 0x2aa   :  { %3831 = vmatpush1.bf16.msra.mxu0 %v3830_v53  ;;  %v1562_v53 = vld [vmem:[#allocation10 + $0x198] sm:$0xff] }
 0x2ab   :  { %3833 = vmatprep.subr.bf16.mxu0 %v3832_v56  ;;  %v3644_v56 = vpack.c.bf16 %v1566_v54, %v1562_v53  ;;  %v1841_v53 = vld [vmem:[#allocation13 + $0x310] sm:$0xff]  ;;  %v1848_v54 = vld [vmem:[#allocation13 + $0x348] sm:$0xff] }
 0x2ac   :  { %v3682_v57 = vpack.c.bf16 %v1848_v54, %v1841_v53  ;;  %v1970_v53 = vld [vmem:[#allocation13 + $0x718] sm:$0xff]  ;;  %v1977_v54 = vld [vmem:[#allocation13 + $0x750] sm:$0xff] }
 0x2ae   :  { %3835 = vmatpush1.bf16.msra.mxu0 %v3834_v28  ;;  %v1570_v28 = vld [vmem:[#allocation10 + $0x1d8] sm:$0xff] }
 0x2af   :  { %3837 = vmatprep.subr.bf16.mxu0 %v3836_v0  ;;  %v3648_v0 = vpack.c.bf16 %v1574_v62, %v1570_v28  ;;  %v1855_v28 = vld [vmem:[#allocation13 + $0x380] sm:$0xff]  ;;  %v1862_v62 = vld [vmem:[#allocation13 + $0x3b8] sm:$0xff] }
 0x2b2   :  { %3839 = vmatpush1.bf16.msra.mxu0 %v3838_v8  ;;  %v1744_v8 = vld [vmem:[#allocation13 + $0x8] sm:$0xff] }
 0x34c   :  { %v1500_v2 = vpop.f32.mrb[2].mxu0 }
 0x34d   :  { %v4104_v9 = vadd.f32 %v1500_v2, %v1356_v5  ;;  %v1502_v10 = vpop.f32.mrb[3].mxu0  ;;  %v3650_v5 = vpack.c.bf16 %v1573_v4, %v1569_v59  ;;  %v1743_v2 = vld [vmem:[#allocation13] sm:$0xff]  ;;  %v3686_v59 = vpack.c.bf16 %v1862_v62, %v1855_v28 }
 0x34e   :  { %v4105_v11 = vadd.f32 %v1502_v10, %v1360_v6  ;;  %v3652_v6 = vpack.c.bf16 %v1751_v3, %v1744_v8  ;;  %v1758_v10 = vld [vmem:[#allocation13 + $0x78] sm:$0xff]  ;;  %v1869_v8 = vld [vmem:[#allocation13 + $0x3f0] sm:$0xff]  ;;  %v1876_v3 = vld [vmem:[#allocation13 + $0x428] sm:$0xff] }
 0x34f   :  { %2935 = vst [vmem:[#allocation17] sm:$0xff] %v4104_v9 }
 0x350   :  { %v1506_v12 = vmul.f32 0.5, %v4105_v11  ;;  %2936 = vst [vmem:[#allocation19] sm:$0xff] %v4105_v11  ;;  %v1765_v11 = vld [vmem:[#allocation13 + $0xb0] sm:$0xff] }
 0x352   :  { %v1507_v13 = vmul.f32 1.442695, %v1506_v12 }
 0x354   :  { %4166 = vpow2.f32 %v1507_v13  ;;  %v3656_v13 = vpack.c.bf16 %v1765_v11, %v1758_v10  ;;  %v1883_v10 = vld [vmem:[#allocation13 + $0x460] sm:$0xff]  ;;  %v1890_v11 = vld [vmem:[#allocation13 + $0x498] sm:$0xff] }
 0x35e   :  { %v4167_v17 = vpop.eup %4166 }
 0x35f   :  { %v1509_v20 = vmul.f32 %v4167_v17, %v1505_v14  ;;  %v1757_v14 = vld [vmem:[#allocation13 + $0x70] sm:$0xff]  ;;  %v1779_v17 = vld [vmem:[#allocation13 + $0x120] sm:$0xff] }
 0x360   :  { %v3658_v18 = vpack.c.bf16 %v1764_v15, %v1757_v14  ;;  %v3660_v19 = vpack.c.bf16 %v1779_v17, %v1772_v16  ;;  %v3694_v14 = vpack.c.bf16 %v1890_v11, %v1883_v10  ;;  %v1897_v16 = vld [vmem:[#allocation13 + $0x4d0] sm:$0xff]  ;;  %v1904_v17 = vld [vmem:[#allocation13 + $0x508] sm:$0xff]  ;;  %v1991_v11 = vld [vmem:[#allocation13 + $0x7c0] sm:$0xff] }
 0x361   :  { %v4742_v22 = vadd.f32 %v4104_v9, %v1509_v20  ;;  %v1750_v9 = vld [vmem:[#allocation13 + $0x38] sm:$0xff]  ;;  %v1771_v20 = vld [vmem:[#allocation13 + $0xe0] sm:$0xff]  ;;  %v1984_v10 = vld [vmem:[#allocation13 + $0x788] sm:$0xff] }
 0x362   :  { %v3654_v12 = vpack.c.bf16 %v1750_v9, %v1743_v2  ;;  %v3690_v2 = vpack.c.bf16 %v1876_v3, %v1869_v8  ;;  %v1969_v3 = vld [vmem:[#allocation13 + $0x710] sm:$0xff] }
 0x363   :  { %1662 = vmatmul.mubr.f32.vlgmr.msra.gmra.mrb[2].mxu1 %v4742_v22 }
 0x364   :  { %3623 = vmatpush1.bf16.msra.mxu1 %v3622_v21  ;;  %1732 = vmatprep.mubr.f32.mxu1 %v4467_v1  ;;  %v1549_v1 = vld [vmem:[#allocation10 + $0x130] sm:$0xff]  ;;  %v1778_v21 = vld [vmem:[#allocation13 + $0x118] sm:$0xff] }
 0x365   :  { %3625 = vmatprep.subr.bf16.mxu1 %v3624_v24  ;;  %v3638_v49 = vpack.c.bf16 %v1549_v1, %v1545_v46  ;;  %v1786_v24 = vld [vmem:[#allocation13 + $0x158] sm:$0xff]  ;;  %v3662_v26 = vpack.c.bf16 %v1778_v21, %v1771_v20  ;;  %v3674_v46 = vpack.c.bf16 %v1820_v44, %v1813_v43  ;;  %v3698_v20 = vpack.c.bf16 %v1904_v17, %v1897_v16  ;;  %v1956_v43 = vld [vmem:[#allocation13 + $0x6a8] sm:$0xff]  ;;  %v1963_v44 = vld [vmem:[#allocation13 + $0x6e0] sm:$0xff] }
 0x366   :  { %v3664_v29 = vpack.c.bf16 %v1793_v25, %v1786_v24  ;;  %v1911_v24 = vld [vmem:[#allocation13 + $0x540] sm:$0xff]  ;;  %v1918_v25 = vld [vmem:[#allocation13 + $0x578] sm:$0xff]  ;;  %v1988_v16 = vld [vmem:[#allocation13 + $0x7a8] sm:$0xff] }
 0x368   :  { %3627 = vmatpush1.bf16.msra.mxu1 %v3626_v31  ;;  %v1792_v31 = vld [vmem:[#allocation13 + $0x188] sm:$0xff] }
 0x369   :  { %3629 = vmatprep.subr.bf16.mxu1 %v3628_v32  ;;  %v1800_v32 = vld [vmem:[#allocation13 + $0x1c8] sm:$0xff]  ;;  %v3666_v34 = vpack.c.bf16 %v1792_v31, %v1785_v30  ;;  %v3702_v30 = vpack.c.bf16 %v1918_v25, %v1911_v24  ;;  %v2003_v25 = vld [vmem:[#allocation13 + $0x820] sm:$0xff] }
 0x36a   :  { %v1996_v24 = vld [vmem:[#allocation13 + $0x7e8] sm:$0xff] }
 0x36c   :  { %3631 = vmatpush1.bf16.msra.mxu1 %v3630_v39  ;;  %v1814_v39 = vld [vmem:[#allocation13 + $0x238] sm:$0xff] }
 0x36d   :  { %3633 = vmatprep.subr.bf16.mxu1 %v3632_v40  ;;  %v1821_v40 = vld [vmem:[#allocation13 + $0x270] sm:$0xff] }
 0x36e   :  { %v3672_v42 = vpack.c.bf16 %v1821_v40, %v1814_v39  ;;  %v1939_v39 = vld [vmem:[#allocation13 + $0x620] sm:$0xff]  ;;  %v1946_v40 = vld [vmem:[#allocation13 + $0x658] sm:$0xff] }
 0x370   :  { %3635 = vmatpush1.bf16.msra.mxu1 %v3634_v37  ;;  %v1828_v37 = vld [vmem:[#allocation13 + $0x2a8] sm:$0xff] }
 0x371   :  { %3637 = vmatprep.subr.bf16.mxu1 %v3636_v45  ;;  %v1835_v45 = vld [vmem:[#allocation13 + $0x2e0] sm:$0xff] }
 0x372   :  { %v3676_v1 = vpack.c.bf16 %v1835_v45, %v1828_v37  ;;  %v3710_v37 = vpack.c.bf16 %v1946_v40, %v1939_v39  ;;  %v3840_v45 = vpack.c.bf16 %v1963_v44, %v1956_v43  ;;  %v2010_v39 = vld [vmem:[#allocation13 + $0x858] sm:$0xff]  ;;  %v2017_v40 = vld [vmem:[#allocation13 + $0x890] sm:$0xff] }
 0x374   :  { %3639 = vmatpush1.bf16.msra.mxu1 %v3638_v49  ;;  %v1842_v49 = vld [vmem:[#allocation13 + $0x318] sm:$0xff]  ;;  %3841 = vmatprep.subr.bf16.mxu0 %v3840_v45  ;;  %v2016_v45 = vld [vmem:[#allocation13 + $0x888] sm:$0xff] }
 0x375   :  { %3641 = vmatprep.subr.bf16.mxu1 %v3640_v50  ;;  %v1849_v50 = vld [vmem:[#allocation13 + $0x350] sm:$0xff] }
 0x376   :  { %v3680_v52 = vpack.c.bf16 %v1849_v50, %v1842_v49  ;;  %v1960_v49 = vld [vmem:[#allocation13 + $0x6c8] sm:$0xff] }
 0x378   :  { %3643 = vmatpush1.bf16.msra.mxu1 %v3642_v55  ;;  %v1856_v55 = vld [vmem:[#allocation13 + $0x388] sm:$0xff] }
 0x379   :  { %3645 = vmatprep.subr.bf16.mxu1 %v3644_v56  ;;  %v1863_v56 = vld [vmem:[#allocation13 + $0x3c0] sm:$0xff] }
 0x37a   :  { %v3684_v27 = vpack.c.bf16 %v1863_v56, %v1856_v55  ;;  %v3714_v55 = vpack.c.bf16 %v1960_v49, %v1953_v48  ;;  %v3844_v56 = vpack.c.bf16 %v1977_v54, %v1970_v53  ;;  %v2018_v48 = vld [vmem:[#allocation13 + $0x898] sm:$0xff]  ;;  %v2024_v49 = vld [vmem:[#allocation13 + $0x8c8] sm:$0xff] }
 0x37c   :  { %3647 = vmatpush1.bf16.msra.mxu1 %v3646_v63  ;;  %v1870_v63 = vld [vmem:[#allocation13 + $0x3f8] sm:$0xff] }
 0x37d   :  { %3649 = vmatprep.subr.bf16.mxu1 %v3648_v0  ;;  %v1877_v0 = vld [vmem:[#allocation13 + $0x430] sm:$0xff] }
 0x37e   :  { %v3688_v4 = vpack.c.bf16 %v1877_v0, %v1870_v63  ;;  %v1967_v0 = vld [vmem:[#allocation13 + $0x700] sm:$0xff] }
 0x380   :  { %3651 = vmatpush1.bf16.msra.mxu1 %v3650_v5  ;;  %v1884_v5 = vld [vmem:[#allocation13 + $0x468] sm:$0xff] }
 0x381   :  { %3653 = vmatprep.subr.bf16.mxu1 %v3652_v6  ;;  %v1891_v6 = vld [vmem:[#allocation13 + $0x4a0] sm:$0xff] }
 0x382   :  { %v3692_v9 = vpack.c.bf16 %v1891_v6, %v1884_v5  ;;  %v1976_v5 = vld [vmem:[#allocation13 + $0x748] sm:$0xff]  ;;  %v1982_v6 = vld [vmem:[#allocation13 + $0x778] sm:$0xff] }
 0x383   :  { %1733 = vmatmul.mubr.f32.vlgmr.msra.gmra.mrb[4].mxu1 %v4742_v22  ;;  %v3668_v22 = vpack.c.bf16 %v1807_v33, %v1800_v32  ;;  %v1925_v32 = vld [vmem:[#allocation13 + $0x5b0] sm:$0xff]  ;;  %v1932_v33 = vld [vmem:[#allocation13 + $0x5e8] sm:$0xff] }
 0x384   :  { %3655 = vmatpush1.bf16.msra.mxu1 %v3654_v12  ;;  %v1898_v12 = vld [vmem:[#allocation13 + $0x4d8] sm:$0xff]  ;;  %v3706_v35 = vpack.c.bf16 %v1932_v33, %v1925_v32  ;;  %v1995_v32 = vld [vmem:[#allocation13 + $0x7e0] sm:$0xff] }
 0x385   :  { %3657 = vmatprep.subr.bf16.mxu1 %v3656_v13  ;;  %v1905_v13 = vld [vmem:[#allocation13 + $0x510] sm:$0xff]  ;;  %v2002_v33 = vld [vmem:[#allocation13 + $0x818] sm:$0xff] }
 0x386   :  { %v3696_v15 = vpack.c.bf16 %v1905_v13, %v1898_v12  ;;  %v3726_v43 = vpack.c.bf16 %v2002_v33, %v1995_v32  ;;  %v2073_v32 = vld [vmem:[#allocation13 + $0xa50] sm:$0xff]  ;;  %v2068_v33 = vld [vmem:[#allocation13 + $0xa28] sm:$0xff] }
 0x388   :  { %3659 = vmatpush1.bf16.msra.mxu1 %v3658_v18  ;;  %v1912_v18 = vld [vmem:[#allocation13 + $0x548] sm:$0xff] }
 0x389   :  { %3661 = vmatprep.subr.bf16.mxu1 %v3660_v19  ;;  %v1919_v19 = vld [vmem:[#allocation13 + $0x580] sm:$0xff] }
 0x38a   :  { %v3700_v21 = vpack.c.bf16 %v1919_v19, %v1912_v18  ;;  %v3848_v19 = vpack.c.bf16 %v1991_v11, %v1984_v10  ;;  %v2039_v11 = vld [vmem:[#allocation13 + $0x940] sm:$0xff] }
 0x38c   :  { %3663 = vmatpush1.bf16.msra.mxu1 %v3662_v26  ;;  %v1926_v26 = vld [vmem:[#allocation13 + $0x5b8] sm:$0xff] }
 0x38d   :  { %3665 = vmatprep.subr.bf16.mxu1 %v3664_v29  ;;  %v1933_v29 = vld [vmem:[#allocation13 + $0x5f0] sm:$0xff] }
 0x38e   :  { %v3704_v31 = vpack.c.bf16 %v1933_v29, %v1926_v26  ;;  %v1998_v26 = vld [vmem:[#allocation13 + $0x7f8] sm:$0xff]  ;;  %v2005_v29 = vld [vmem:[#allocation13 + $0x830] sm:$0xff] }
 0x390   :  { %3667 = vmatpush1.bf16.msra.mxu1 %v3666_v34  ;;  %v1940_v34 = vld [vmem:[#allocation13 + $0x628] sm:$0xff] }
 0x391   :  { %3669 = vmatprep.subr.bf16.mxu1 %v3668_v22  ;;  %v1947_v22 = vld [vmem:[#allocation13 + $0x660] sm:$0xff] }
 0x392   :  { %v3708_v38 = vpack.c.bf16 %v1947_v22, %v1940_v34  ;;  %v3724_v34 = vpack.c.bf16 %v2003_v25, %v1996_v24  ;;  %v3852_v22 = vpack.c.bf16 %v2005_v29, %v1998_v26  ;;  %v2058_v24 = vld [vmem:[#allocation13 + $0x9d8] sm:$0xff]  ;;  %v2053_v29 = vld [vmem:[#allocation13 + $0x9b0] sm:$0xff] }
 0x394   :  { %3671 = vmatpush1.bf16.msra.mxu1 %v3670_v41  ;;  %v1954_v41 = vld [vmem:[#allocation13 + $0x698] sm:$0xff] }
 0x395   :  { %3673 = vmatprep.subr.bf16.mxu1 %v3672_v42  ;;  %v1961_v42 = vld [vmem:[#allocation13 + $0x6d0] sm:$0xff] }
 0x396   :  { %v3712_v47 = vpack.c.bf16 %v1961_v42, %v1954_v41  ;;  %v2012_v41 = vld [vmem:[#allocation13 + $0x868] sm:$0xff]  ;;  %v2019_v42 = vld [vmem:[#allocation13 + $0x8a0] sm:$0xff] }
 0x398   :  { %3675 = vmatpush1.bf16.msra.mxu1 %v3674_v46  ;;  %v1955_v46 = vld [vmem:[#allocation13 + $0x6a0] sm:$0xff] }
 0x399   :  { %3677 = vmatprep.subr.bf16.mxu1 %v3676_v1  ;;  %v1962_v1 = vld [vmem:[#allocation13 + $0x6d8] sm:$0xff] }
 0x39a   :  { %v3842_v50 = vpack.c.bf16 %v1962_v1, %v1955_v46  ;;  %v3728_v46 = vpack.c.bf16 %v2017_v40, %v2010_v39  ;;  %v3856_v1 = vpack.c.bf16 %v2019_v42, %v2012_v41  ;;  %v2072_v39 = vld [vmem:[#allocation13 + $0xa48] sm:$0xff]  ;;  %v2067_v42 = vld [vmem:[#allocation13 + $0xa20] sm:$0xff] }
 0x39c   :  { %3679 = vmatpush1.bf16.msra.mxu1 %v3678_v51  ;;  %v1968_v51 = vld [vmem:[#allocation13 + $0x708] sm:$0xff]  ;;  %3843 = vmatpush1.bf16.msra.mxu0 %v3842_v50  ;;  %v2031_v50 = vld [vmem:[#allocation13 + $0x900] sm:$0xff] }
 0x39d   :  { %3681 = vmatprep.subr.bf16.mxu1 %v3680_v52  ;;  %v1975_v52 = vld [vmem:[#allocation13 + $0x740] sm:$0xff]  ;;  %3845 = vmatprep.subr.bf16.mxu0 %v3844_v56  ;;  %v2030_v56 = vld [vmem:[#allocation13 + $0x8f8] sm:$0xff] }
 0x3a0   :  { %3683 = vmatpush1.bf16.msra.mxu1 %v3682_v57  ;;  %v3716_v57 = vpack.c.bf16 %v1975_v52, %v1968_v51  ;;  %v2026_v51 = vld [vmem:[#allocation13 + $0x8d8] sm:$0xff]  ;;  %v2033_v52 = vld [vmem:[#allocation13 + $0x910] sm:$0xff] }
 0x3a1   :  { %3685 = vmatprep.subr.bf16.mxu1 %v3684_v27  ;;  %v4747_v27 = vld [vmem:[#allocation11] sm:$0xf] }
 0x3a2   :  { %v1580_v28 = vrot.slane %v4747_v27, %v4713_v58  ;;  %v1584_v62 = vrot.slane %v4747_v27, %v4718_v60 }
 0x3a4   :  { %3687 = vmatpush1.bf16.msra.mxu1 %v3686_v59  ;;  %v1974_v59 = vld [vmem:[#allocation13 + $0x738] sm:$0xff] }
 0x3a5   :  { %3689 = vmatprep.subr.bf16.mxu1 %v3688_v4  ;;  %v3718_v13 = vpack.c.bf16 %v1974_v59, %v1967_v0  ;;  %v2038_v0 = vld [vmem:[#allocation13 + $0x938] sm:$0xff]  ;;  %v2045_v59 = vld [vmem:[#allocation13 + $0x970] sm:$0xff] }
 0x3a8   :  { %3691 = vmatpush1.bf16.msra.mxu1 %v3690_v2 }
 0x3a9   :  { %3693 = vmatprep.subr.bf16.mxu1 %v3692_v9  ;;  %v1989_v9 = vld [vmem:[#allocation13 + $0x7b0] sm:$0xff] }
 0x3aa   :  { %v3720_v18 = vpack.c.bf16 %v1989_v9, %v1982_v6  ;;  %v2037_v6 = vld [vmem:[#allocation13 + $0x930] sm:$0xff]  ;;  %v3736_v9 = vpack.c.bf16 %v2045_v59, %v2038_v0  ;;  %v2103_v0 = vld [vmem:[#allocation13 + $0xb40] sm:$0xff] }
 0x3ac   :  { %3695 = vmatpush1.bf16.msra.mxu1 %v3694_v14  ;;  %v3846_v14 = vpack.c.bf16 %v1976_v5, %v1969_v3 }
 0x3ad   :  { %3697 = vmatprep.subr.bf16.mxu1 %v3696_v15  ;;  %v1981_v15 = vld [vmem:[#allocation13 + $0x770] sm:$0xff] }
 0x3b0   :  { %3699 = vmatpush1.bf16.msra.mxu1 %v3698_v20  ;;  %v1983_v20 = vld [vmem:[#allocation13 + $0x780] sm:$0xff] }
 0x3b1   :  { %3701 = vmatprep.subr.bf16.mxu1 %v3700_v21  ;;  %v1990_v21 = vld [vmem:[#allocation13 + $0x7b8] sm:$0xff] }
 0x3b4   :  { %3703 = vmatpush1.bf16.msra.mxu1 %v3702_v30  ;;  %v3722_v30 = vpack.c.bf16 %v1988_v16, %v1981_v15  ;;  %v2059_v15 = vld [vmem:[#allocation13 + $0x9e0] sm:$0xff]  ;;  %v2054_v16 = vld [vmem:[#allocation13 + $0x9b8] sm:$0xff] }
 0x3b5   :  { %3705 = vmatprep.subr.bf16.mxu1 %v3704_v31  ;;  %v3850_v31 = vpack.c.bf16 %v1990_v21, %v1983_v20  ;;  %v2051_v21 = vld [vmem:[#allocation13 + $0x9a0] sm:$0xff] }
 0x3b8   :  { %3707 = vmatpush1.bf16.msra.mxu1 %v3706_v35  ;;  %v1997_v35 = vld [vmem:[#allocation13 + $0x7f0] sm:$0xff] }
 0x3b9   :  { %3709 = vmatprep.subr.bf16.mxu1 %v3708_v38  ;;  %v2004_v38 = vld [vmem:[#allocation13 + $0x828] sm:$0xff] }
 0x3ba   :  { %v3854_v44 = vpack.c.bf16 %v2004_v38, %v1997_v35  ;;  %v2065_v38 = vld [vmem:[#allocation13 + $0xa10] sm:$0xff] }
 0x3bc   :  { %3711 = vmatpush1.bf16.msra.mxu1 %v3710_v37  ;;  %v2009_v37 = vld [vmem:[#allocation13 + $0x850] sm:$0xff] }
 0x3bd   :  { %3713 = vmatprep.subr.bf16.mxu1 %v3712_v47  ;;  %v2011_v47 = vld [vmem:[#allocation13 + $0x860] sm:$0xff]  ;;  %v3730_v53 = vpack.c.bf16 %v2016_v45, %v2009_v37  ;;  %v1592_v37 = vrot.slane %v4747_v27, %v4721_v61 }
 0x3be   :  { %v3858_v54 = vpack.c.bf16 %v2018_v48, %v2011_v47  ;;  %v2087_v45 = vld [vmem:[#allocation13 + $0xac0] sm:$0xff]  ;;  %v3746_v48 = vpack.c.bf16 %v2072_v39, %v2065_v38 }
 0x3c0   :  { %3715 = vmatpush1.bf16.msra.mxu1 %v3714_v55  ;;  %v2023_v55 = vld [vmem:[#allocation13 + $0x8c0] sm:$0xff] }
 0x3c1   :  { %3717 = vmatprep.subr.bf16.mxu1 %v3716_v57  ;;  %v3732_v57 = vpack.c.bf16 %v2031_v50, %v2024_v49  ;;  %v3734_v3 = vpack.c.bf16 %v2030_v56, %v2023_v55  ;;  %v2079_v50 = vld [vmem:[#allocation13 + $0xa80] sm:$0xff]  ;;  %v2081_v55 = vld [vmem:[#allocation13 + $0xa90] sm:$0xff]  ;;  %v2088_v56 = vld [vmem:[#allocation13 + $0xac8] sm:$0xff] }
 0x436   :  { %v1663_v63 = vpop.f32.mrb[2].mxu1 }
 0x437   :  { %v1664_v4 = vadd.f32 %v1663_v63, %v1580_v28  ;;  %v1665_v8 = vpop.f32.mrb[3].mxu1  ;;  %v3860_v28 = vpack.c.bf16 %v2033_v52, %v2026_v51  ;;  %v2032_v63 = vld [vmem:[#allocation13 + $0x908] sm:$0xff]  ;;  %v2086_v51 = vld [vmem:[#allocation13 + $0xab8] sm:$0xff] }
 0x438   :  { %v1666_v2 = vadd.f32 %v1665_v8, %v1584_v62  ;;  %v2025_v62 = vld [vmem:[#allocation13 + $0x8d0] sm:$0xff]  ;;  %v2047_v8 = vld [vmem:[#allocation13 + $0x980] sm:$0xff] }
 0x439   :  { %v4755_v17 = vmax.f32 %v1664_v4, 0.0  ;;  %v2040_v4 = vld [vmem:[#allocation13 + $0x948] sm:$0xff]  ;;  %v3862_v5 = vpack.c.bf16 %v2032_v63, %v2025_v62  ;;  %v2101_v62 = vld [vmem:[#allocation13 + $0xb30] sm:$0xff] }
 0x43a   :  { %v4753_v12 = vmax.f32 %v1666_v2, 0.0  ;;  %v2044_v2 = vld [vmem:[#allocation13 + $0x968] sm:$0xff]  ;;  %v3864_v10 = vpack.c.bf16 %v2047_v8, %v2040_v4  ;;  %v3750_v4 = vpack.c.bf16 %v2086_v51, %v2079_v50  ;;  %v3878_v8 = vpack.c.bf16 %v2088_v56, %v2081_v55  ;;  %v2137_v51 = vld [vmem:[#allocation13 + $0xc50] sm:$0xff]  ;;  %v2159_v56 = vld [vmem:[#allocation13 + $0xd00] sm:$0xff] }
 0x43b   :  { %v2096_v63 = vld [vmem:[#allocation13 + $0xb08] sm:$0xff] }
 0x43c   :  { %2292 = vmatprep.mubr.f32.mxu1 %v4753_v12  ;;  %2434 = vmatprep.mubr.f32.mxu0 %v4753_v12  ;;  %v2152_v55 = vld [vmem:[#allocation13 + $0xcc8] sm:$0xff] }
 0x43d   :  { %2293 = vmatmul.mubr.f32.vlgmr.msra.gmra.mrb[6].mxu1 %v4755_v17  ;;  %2435 = vmatmul.mubr.f32.vlgmr.msra.gmra.mrb[4].mxu0 %v4755_v17 }
 0x43e   :  { %3719 = vmatpush1.bf16.msra.mxu1 %v3718_v13  ;;  %3847 = vmatpush1.bf16.msra.mxu0 %v3846_v14  ;;  %v2046_v13 = vld [vmem:[#allocation13 + $0x978] sm:$0xff]  ;;  %v2052_v14 = vld [vmem:[#allocation13 + $0x9a8] sm:$0xff] }
 0x43f   :  { %3721 = vmatprep.subr.bf16.mxu1 %v3720_v18  ;;  %3849 = vmatprep.subr.bf16.mxu0 %v3848_v19  ;;  %v2061_v18 = vld [vmem:[#allocation13 + $0x9f0] sm:$0xff]  ;;  %v3738_v19 = vpack.c.bf16 %v2044_v2, %v2037_v6  ;;  %v3866_v20 = vpack.c.bf16 %v2046_v13, %v2039_v11  ;;  %v3740_v25 = vpack.c.bf16 %v2059_v15, %v2052_v14  ;;  %v2108_v11 = vld [vmem:[#allocation13 + $0xb68] sm:$0xff]  ;;  %v2115_v13 = vld [vmem:[#allocation13 + $0xba0] sm:$0xff] }
 0x440   :  { %v3868_v26 = vpack.c.bf16 %v2061_v18, %v2054_v16  ;;  %v3880_v2 = vpack.c.bf16 %v2103_v0, %v2096_v63  ;;  %v2110_v14 = vld [vmem:[#allocation13 + $0xb78] sm:$0xff]  ;;  %v2117_v15 = vld [vmem:[#allocation13 + $0xbb0] sm:$0xff]  ;;  %v2156_v63 = vld [vmem:[#allocation13 + $0xce8] sm:$0xff] }
 0x442   :  { %3723 = vmatpush1.bf16.msra.mxu1 %v3722_v30  ;;  %3851 = vmatpush1.bf16.msra.mxu0 %v3850_v31  ;;  %v2060_v30 = vld [vmem:[#allocation13 + $0x9e8] sm:$0xff]  ;;  %v2066_v31 = vld [vmem:[#allocation13 + $0xa18] sm:$0xff] }
 0x443   :  { %3725 = vmatprep.subr.bf16.mxu1 %v3724_v34  ;;  %3853 = vmatprep.subr.bf16.mxu0 %v3852_v22  ;;  %v2075_v34 = vld [vmem:[#allocation13 + $0xa60] sm:$0xff]  ;;  %v3742_v22 = vpack.c.bf16 %v2058_v24, %v2051_v21  ;;  %v3870_v35 = vpack.c.bf16 %v2060_v30, %v2053_v29  ;;  %v3744_v40 = vpack.c.bf16 %v2073_v32, %v2066_v31  ;;  %v2122_v29 = vld [vmem:[#allocation13 + $0xbd8] sm:$0xff]  ;;  %v2129_v30 = vld [vmem:[#allocation13 + $0xc10] sm:$0xff] }
 0x444   :  { %v3872_v41 = vpack.c.bf16 %v2075_v34, %v2068_v33  ;;  %v3756_v21 = vpack.c.bf16 %v2115_v13, %v2108_v11  ;;  %v3884_v24 = vpack.c.bf16 %v2117_v15, %v2110_v14  ;;  %v2124_v31 = vld [vmem:[#allocation13 + $0xbe8] sm:$0xff]  ;;  %v2131_v32 = vld [vmem:[#allocation13 + $0xc20] sm:$0xff]  ;;  %v3760_v38 = vpack.c.bf16 %v2129_v30, %v2122_v29  ;;  %v2170_v14 = vld [vmem:[#allocation13 + $0xd58] sm:$0xff] }
 0x445   :  { %v3888_v39 = vpack.c.bf16 %v2131_v32, %v2124_v31  ;;  %v2163_v13 = vld [vmem:[#allocation13 + $0xd20] sm:$0xff]  ;;  %v2177_v30 = vld [vmem:[#allocation13 + $0xd90] sm:$0xff]  ;;  %v2184_v31 = vld [vmem:[#allocation13 + $0xdc8] sm:$0xff]  ;;  %v1588_v32 = vrot.slane %v4747_v27, %v4732_v36 }
 0x446   :  { %3727 = vmatpush1.bf16.msra.mxu1 %v3726_v43  ;;  %3855 = vmatpush1.bf16.msra.mxu0 %v3854_v44  ;;  %v2074_v43 = vld [vmem:[#allocation13 + $0xa58] sm:$0xff]  ;;  %v2080_v44 = vld [vmem:[#allocation13 + $0xa88] sm:$0xff] }
 0x447   :  { %3729 = vmatprep.subr.bf16.mxu1 %v3728_v46  ;;  %3857 = vmatprep.subr.bf16.mxu0 %v3856_v1  ;;  %v2082_v46 = vld [vmem:[#allocation13 + $0xa98] sm:$0xff]  ;;  %v2089_v1 = vld [vmem:[#allocation13 + $0xad0] sm:$0xff]  ;;  %v3874_v49 = vpack.c.bf16 %v2074_v43, %v2067_v42  ;;  %v2136_v42 = vld [vmem:[#allocation13 + $0xc48] sm:$0xff] }
 0x448   :  { %v2143_v43 = vld [vmem:[#allocation13 + $0xc80] sm:$0xff] }
 0x44a   :  { %3731 = vmatpush1.bf16.msra.mxu1 %v3730_v53  ;;  %3859 = vmatpush1.bf16.msra.mxu0 %v3858_v54  ;;  %v3748_v53 = vpack.c.bf16 %v2087_v45, %v2080_v44  ;;  %v3876_v54 = vpack.c.bf16 %v2089_v1, %v2082_v46  ;;  %v2138_v44 = vld [vmem:[#allocation13 + $0xc58] sm:$0xff]  ;;  %v2135_v1 = vld [vmem:[#allocation13 + $0xc40] sm:$0xff] }
 0x44b   :  { %3733 = vmatprep.subr.bf16.mxu1 %v3732_v57  ;;  %3861 = vmatprep.subr.bf16.mxu0 %v3860_v28  ;;  %v2094_v57 = vld [vmem:[#allocation13 + $0xaf8] sm:$0xff] }
 0x44c   :  { %v3752_v6 = vpack.c.bf16 %v2101_v62, %v2094_v57  ;;  %v2149_v62 = vld [vmem:[#allocation13 + $0xcb0] sm:$0xff] }
 0x44e   :  { %3735 = vmatpush1.bf16.msra.mxu1 %v3734_v3  ;;  %3863 = vmatpush1.bf16.msra.mxu0 %v3862_v5  ;;  %v2093_v3 = vld [vmem:[#allocation13 + $0xaf0] sm:$0xff]  ;;  %v2100_v5 = vld [vmem:[#allocation13 + $0xb28] sm:$0xff] }
 0x44f   :  { %3737 = vmatprep.subr.bf16.mxu1 %v3736_v9  ;;  %3865 = vmatprep.subr.bf16.mxu0 %v3864_v10  ;;  %v2095_v9 = vld [vmem:[#allocation13 + $0xb00] sm:$0xff]  ;;  %v2102_v10 = vld [vmem:[#allocation13 + $0xb38] sm:$0xff]  ;;  %v3754_v16 = vpack.c.bf16 %v2100_v5, %v2093_v3  ;;  %v2164_v5 = vld [vmem:[#allocation13 + $0xd28] sm:$0xff] }
 0x450   :  { %v3882_v18 = vpack.c.bf16 %v2102_v10, %v2095_v9  ;;  %v2158_v3 = vld [vmem:[#allocation13 + $0xcf8] sm:$0xff]  ;;  %v2173_v9 = vld [vmem:[#allocation13 + $0xd70] sm:$0xff]  ;;  %v3770_v10 = vpack.c.bf16 %v2156_v63, %v2149_v62 }
 0x451   :  { %v1770_v63 = vld [vmem:[#allocation13 + $0xd8] sm:$0xff] }
 0x452   :  { %3739 = vmatpush1.bf16.msra.mxu1 %v3738_v19  ;;  %3867 = vmatpush1.bf16.msra.mxu0 %v3866_v20  ;;  %v2107_v19 = vld [vmem:[#allocation13 + $0xb60] sm:$0xff]  ;;  %v2114_v20 = vld [vmem:[#allocation13 + $0xb98] sm:$0xff] }
 0x453   :  { %3741 = vmatprep.subr.bf16.mxu1 %v3740_v25  ;;  %3869 = vmatprep.subr.bf16.mxu0 %v3868_v26  ;;  %v2109_v25 = vld [vmem:[#allocation13 + $0xb70] sm:$0xff]  ;;  %v2116_v26 = vld [vmem:[#allocation13 + $0xba8] sm:$0xff]  ;;  %v3758_v33 = vpack.c.bf16 %v2114_v20, %v2107_v19  ;;  %v2178_v20 = vld [vmem:[#allocation13 + $0xd98] sm:$0xff] }
 0x454   :  { %v3886_v34 = vpack.c.bf16 %v2116_v26, %v2109_v25  ;;  %v2172_v19 = vld [vmem:[#allocation13 + $0xd68] sm:$0xff]  ;;  %v2187_v25 = vld [vmem:[#allocation13 + $0xde0] sm:$0xff]  ;;  %v3774_v26 = vpack.c.bf16 %v2170_v14, %v2163_v13 }
 0x455   :  { %v1784_v14 = vld [vmem:[#allocation13 + $0x148] sm:$0xff] }
 0x456   :  { %v4763_v47 = vpop.f32.mrb[4].mxu1  ;;  %3743 = vmatpush1.bf16.msra.mxu1 %v3742_v22  ;;  %3871 = vmatpush1.bf16.msra.mxu0 %v3870_v35  ;;  %v2121_v22 = vld [vmem:[#allocation13 + $0xbd0] sm:$0xff]  ;;  %v2128_v35 = vld [vmem:[#allocation13 + $0xc08] sm:$0xff] }
 0x457   :  { %v1736_v52 = vpop.f32.mrb[5].mxu1  ;;  %3745 = vmatprep.subr.bf16.mxu1 %v3744_v40  ;;  %3873 = vmatprep.subr.bf16.mxu0 %v3872_v41  ;;  %v2123_v40 = vld [vmem:[#allocation13 + $0xbe0] sm:$0xff]  ;;  %v2130_v41 = vld [vmem:[#allocation13 + $0xc18] sm:$0xff]  ;;  %v3762_v45 = vpack.c.bf16 %v2128_v35, %v2121_v22 }
 0x458   :  { %v1737_v28 = vadd.f32 %v1736_v52, %v1592_v37  ;;  %v2145_v37 = vld [vmem:[#allocation13 + $0xc90] sm:$0xff]  ;;  %v3890_v46 = vpack.c.bf16 %v2130_v41, %v2123_v40  ;;  %v2144_v52 = vld [vmem:[#allocation13 + $0xc88] sm:$0xff]  ;;  %v2179_v22 = vld [vmem:[#allocation13 + $0xda0] sm:$0xff] }
 0x459   :  { %v3892_v50 = vpack.c.bf16 %v2145_v37, %v2138_v44  ;;  %v2186_v35 = vld [vmem:[#allocation13 + $0xdd8] sm:$0xff]  ;;  %v1861_v40 = vld [vmem:[#allocation13 + $0x3b0] sm:$0xff]  ;;  %v1868_v41 = vld [vmem:[#allocation13 + $0x3e8] sm:$0xff]  ;;  %v1735_v44 = vadd.f32 %v4763_v47, %v1588_v32 }
 0x45a   :  { %v4765_v59 = vmax.f32 %v1737_v28, 0.0  ;;  %3747 = vmatpush1.bf16.msra.mxu1 %v3746_v48  ;;  %3875 = vmatpush1.bf16.msra.mxu0 %v3874_v49  ;;  %v2142_v48 = vld [vmem:[#allocation13 + $0xc78] sm:$0xff]  ;;  %v3764_v49 = vpack.c.bf16 %v2143_v43, %v2136_v42  ;;  %v3894_v28 = vpack.c.bf16 %v2144_v52, %v2137_v51  ;;  %v3778_v42 = vpack.c.bf16 %v2184_v31, %v2177_v30  ;;  %v1875_v51 = vld [vmem:[#allocation13 + $0x420] sm:$0xff]  ;;  %v1804_v31 = vld [vmem:[#allocation13 + $0x1e8] sm:$0xff] }
 0x45b   :  { %3749 = vmatprep.subr.bf16.mxu1 %v3748_v53  ;;  %3877 = vmatprep.subr.bf16.mxu0 %v3876_v54  ;;  %v2150_v53 = vld [vmem:[#allocation13 + $0xcb8] sm:$0xff]  ;;  %v2157_v54 = vld [vmem:[#allocation13 + $0xcf0] sm:$0xff]  ;;  %v3766_v57 = vpack.c.bf16 %v2142_v48, %v2135_v1  ;;  %v3906_v43 = vpack.c.bf16 %v2186_v35, %v2179_v22  ;;  %v4036_v27 = vpack.c.bf16 %v1868_v41, %v1861_v40  ;;  %v1756_v48 = vld [vmem:[#allocation13 + $0x68] sm:$0xff] }
 0x45c   :  { %2363 = vmatprep.mubr.f32.mxu1 %v4765_v59  ;;  %2505 = vmatprep.mubr.f32.mxu0 %v4765_v59  ;;  %v3768_v0 = vpack.c.bf16 %v2157_v54, %v2150_v53  ;;  %v1749_v1 = vld [vmem:[#allocation13 + $0x30] sm:$0xff]  ;;  %v1882_v52 = vld [vmem:[#allocation13 + $0x458] sm:$0xff]  ;;  %v4772_v54 = vmax.f32 %v1735_v44, 0.0  ;;  %v1811_v32 = vld [vmem:[#allocation13 + $0x220] sm:$0xff] }
 0x45d   :  { %v4038_v47 = vpack.c.bf16 %v1756_v48, %v1749_v1  ;;  %v4040_v62 = vpack.c.bf16 %v1882_v52, %v1875_v51  ;;  %v1798_v30 = vld [vmem:[#allocation13 + $0x1b8] sm:$0xff]  ;;  %v1805_v41 = vld [vmem:[#allocation13 + $0x1f0] sm:$0xff]  ;;  %v1819_v51 = vld [vmem:[#allocation13 + $0x260] sm:$0xff] }
 0x45e   :  { %3751 = vmatpush1.bf16.msra.mxu1 %v3750_v4  ;;  %3879 = vmatpush1.bf16.msra.mxu0 %v3878_v8  ;;  %v3896_v4 = vpack.c.bf16 %v2159_v56, %v2152_v55  ;;  %v2151_v8 = vld [vmem:[#allocation13 + $0xcc0] sm:$0xff]  ;;  %v1761_v55 = vld [vmem:[#allocation13 + $0x90] sm:$0xff]  ;;  %v1768_v56 = vld [vmem:[#allocation13 + $0xc8] sm:$0xff] }
 0x45f   :  { %3753 = vmatprep.subr.bf16.mxu1 %v3752_v6  ;;  %3881 = vmatprep.subr.bf16.mxu0 %v3880_v2  ;;  %v2171_v6 = vld [vmem:[#allocation13 + $0xd60] sm:$0xff]  ;;  %v2166_v2 = vld [vmem:[#allocation13 + $0xd38] sm:$0xff]  ;;  %v3898_v11 = vpack.c.bf16 %v2158_v3, %v2151_v8  ;;  %v1889_v8 = vld [vmem:[#allocation13 + $0x490] sm:$0xff] }
 0x460   :  { %v3772_v15 = vpack.c.bf16 %v2171_v6, %v2164_v5  ;;  %v1896_v3 = vld [vmem:[#allocation13 + $0x4c8] sm:$0xff]  ;;  %v3914_v5 = vpack.c.bf16 %v1768_v56, %v1761_v55  ;;  %v1810_v40 = vld [vmem:[#allocation13 + $0x218] sm:$0xff]  ;;  %v1839_v55 = vld [vmem:[#allocation13 + $0x300] sm:$0xff] }
 0x461   :  { %v4044_v13 = vpack.c.bf16 %v1896_v3, %v1889_v8  ;;  %v1818_v44 = vld [vmem:[#allocation13 + $0x258] sm:$0xff]  ;;  %v1945_v56 = vld [vmem:[#allocation13 + $0x650] sm:$0xff] }
 0x462   :  { %3755 = vmatpush1.bf16.msra.mxu1 %v3754_v16  ;;  %3883 = vmatpush1.bf16.msra.mxu0 %v3882_v18  ;;  %v3900_v16 = vpack.c.bf16 %v2173_v9, %v2166_v2  ;;  %v2165_v18 = vld [vmem:[#allocation13 + $0xd30] sm:$0xff]  ;;  %v1775_v9 = vld [vmem:[#allocation13 + $0x100] sm:$0xff] }
 0x463   :  { %3757 = vmatprep.subr.bf16.mxu1 %v3756_v21  ;;  %3885 = vmatprep.subr.bf16.mxu0 %v3884_v24  ;;  %v2185_v21 = vld [vmem:[#allocation13 + $0xdd0] sm:$0xff]  ;;  %v2180_v24 = vld [vmem:[#allocation13 + $0xda8] sm:$0xff]  ;;  %v3902_v29 = vpack.c.bf16 %v2172_v19, %v2165_v18  ;;  %v1903_v18 = vld [vmem:[#allocation13 + $0x500] sm:$0xff] }
 0x464   :  { %v1910_v19 = vld [vmem:[#allocation13 + $0x538] sm:$0xff]  ;;  %v1833_v8 = vld [vmem:[#allocation13 + $0x2d0] sm:$0xff] }
 0x466   :  { %3759 = vmatpush1.bf16.msra.mxu1 %v3758_v33  ;;  %3887 = vmatpush1.bf16.msra.mxu0 %v3886_v34  ;;  %v3776_v33 = vpack.c.bf16 %v2185_v21, %v2178_v20  ;;  %v3904_v34 = vpack.c.bf16 %v2187_v25, %v2180_v24  ;;  %v1796_v25 = vld [vmem:[#allocation13 + $0x1a8] sm:$0xff] }
 0x467   :  { %3761 = vmatprep.subr.bf16.mxu1 %v3760_v38  ;;  %3889 = vmatprep.subr.bf16.mxu0 %v3888_v39  ;;  %v1748_v38 = vld [vmem:[#allocation13 + $0x28] sm:$0xff]  ;;  %v1755_v39 = vld [vmem:[#allocation13 + $0x60] sm:$0xff] }
 0x468   :  { %v3908_v37 = vpack.c.bf16 %v1755_v39, %v1748_v38  ;;  %v3924_v38 = vpack.c.bf16 %v1811_v32, %v1804_v31  ;;  %v1803_v39 = vld [vmem:[#allocation13 + $0x1e0] sm:$0xff]  ;;  %v1866_v32 = vld [vmem:[#allocation13 + $0x3d8] sm:$0xff] }
 0x469   :  { %v1859_v31 = vld [vmem:[#allocation13 + $0x3a0] sm:$0xff] }
 0x46a   :  { %3763 = vmatpush1.bf16.msra.mxu1 %v3762_v45  ;;  %3891 = vmatpush1.bf16.msra.mxu0 %v3890_v46  ;;  %v1747_v45 = vld [vmem:[#allocation13 + $0x20] sm:$0xff]  ;;  %v1754_v46 = vld [vmem:[#allocation13 + $0x58] sm:$0xff] }
 0x46b   :  { %3765 = vmatprep.subr.bf16.mxu1 %v3764_v49  ;;  %3893 = vmatprep.subr.bf16.mxu0 %v3892_v50  ;;  %v1762_v49 = vld [vmem:[#allocation13 + $0x98] sm:$0xff]  ;;  %v1769_v50 = vld [vmem:[#allocation13 + $0xd0] sm:$0xff]  ;;  %v3910_v53 = vpack.c.bf16 %v1754_v46, %v1747_v45  ;;  %v3926_v46 = vpack.c.bf16 %v1810_v40, %v1803_v39  ;;  %v2099_v39 = vld [vmem:[#allocation13 + $0xb20] sm:$0xff] }
 0x46c   :  { %v1938_v45 = vld [vmem:[#allocation13 + $0x618] sm:$0xff] }
 0x46d   :  { %v2106_v40 = vld [vmem:[#allocation13 + $0xb58] sm:$0xff] }
 0x46e   :  { %3767 = vmatpush1.bf16.msra.mxu1 %v3766_v57  ;;  %3895 = vmatpush1.bf16.msra.mxu0 %v3894_v28  ;;  %v1763_v57 = vld [vmem:[#allocation13 + $0xa0] sm:$0xff]  ;;  %v3912_v28 = vpack.c.bf16 %v1769_v50, %v1762_v49  ;;  %v1817_v49 = vld [vmem:[#allocation13 + $0x250] sm:$0xff]  ;;  %v1824_v50 = vld [vmem:[#allocation13 + $0x288] sm:$0xff] }
 0x46f   :  { %3769 = vmatprep.subr.bf16.mxu1 %v3768_v0  ;;  %3897 = vmatprep.subr.bf16.mxu0 %v3896_v4  ;;  %v1776_v0 = vld [vmem:[#allocation13 + $0x108] sm:$0xff]  ;;  %v1783_v4 = vld [vmem:[#allocation13 + $0x140] sm:$0xff]  ;;  %v4042_v6 = vpack.c.bf16 %v1770_v63, %v1763_v57 }
 0x470   :  { %v3916_v2 = vpack.c.bf16 %v1783_v4, %v1776_v0  ;;  %v1952_v57 = vld [vmem:[#allocation13 + $0x688] sm:$0xff]  ;;  %v1831_v0 = vld [vmem:[#allocation13 + $0x2c0] sm:$0xff]  ;;  %v1838_v4 = vld [vmem:[#allocation13 + $0x2f8] sm:$0xff] }
 0x471   :  { %v4060_v3 = vpack.c.bf16 %v1952_v57, %v1945_v56  ;;  %v2001_v56 = vld [vmem:[#allocation13 + $0x810] sm:$0xff] }
 0x472   :  { %3771 = vmatpush1.bf16.msra.mxu1 %v3770_v10  ;;  %3899 = vmatpush1.bf16.msra.mxu0 %v3898_v11  ;;  %v1782_v10 = vld [vmem:[#allocation13 + $0x138] sm:$0xff]  ;;  %v1777_v11 = vld [vmem:[#allocation13 + $0x110] sm:$0xff] }
 0x473   :  { %3773 = vmatprep.subr.bf16.mxu1 %v3772_v15  ;;  %3901 = vmatprep.subr.bf16.mxu0 %v3900_v16  ;;  %v1790_v15 = vld [vmem:[#allocation13 + $0x178] sm:$0xff]  ;;  %v1797_v16 = vld [vmem:[#allocation13 + $0x1b0] sm:$0xff]  ;;  %v3918_v20 = vpack.c.bf16 %v1782_v10, %v1775_v9  ;;  %v4046_v21 = vpack.c.bf16 %v1784_v14, %v1777_v11  ;;  %v1959_v9 = vld [vmem:[#allocation13 + $0x6c0] sm:$0xff]  ;;  %v3934_v11 = vpack.c.bf16 %v1838_v4, %v1831_v0 }
 0x474   :  { %v3920_v24 = vpack.c.bf16 %v1797_v16, %v1790_v15  ;;  %v1966_v10 = vld [vmem:[#allocation13 + $0x6f8] sm:$0xff]  ;;  %v1845_v15 = vld [vmem:[#allocation13 + $0x330] sm:$0xff]  ;;  %v1852_v16 = vld [vmem:[#allocation13 + $0x368] sm:$0xff] }
 0x475   :  { %v2127_v0 = vld [vmem:[#allocation13 + $0xc00] sm:$0xff]  ;;  %v2134_v4 = vld [vmem:[#allocation13 + $0xc38] sm:$0xff] }
 0x476   :  { %3775 = vmatpush1.bf16.msra.mxu1 %v3774_v26  ;;  %3903 = vmatpush1.bf16.msra.mxu0 %v3902_v29  ;;  %v1791_v26 = vld [vmem:[#allocation13 + $0x180] sm:$0xff]  ;;  %v4048_v29 = vpack.c.bf16 %v1910_v19, %v1903_v18  ;;  %v4064_v19 = vpack.c.bf16 %v1966_v10, %v1959_v9  ;;  %v4080_v10 = vpack.c.bf16 %v2134_v4, %v2127_v0 }
 0x477   :  { %3777 = vmatprep.subr.bf16.mxu1 %v3776_v33  ;;  %3905 = vmatprep.subr.bf16.mxu0 %v3904_v34  ;;  %v1917_v33 = vld [vmem:[#allocation13 + $0x570] sm:$0xff]  ;;  %v1924_v34 = vld [vmem:[#allocation13 + $0x5a8] sm:$0xff]  ;;  %v4050_v35 = vpack.c.bf16 %v1798_v30, %v1791_v26  ;;  %v1847_v18 = vld [vmem:[#allocation13 + $0x340] sm:$0xff]  ;;  %v3938_v26 = vpack.c.bf16 %v1852_v16, %v1845_v15 }
 0x478   :  { %v2015_v9 = vld [vmem:[#allocation13 + $0x880] sm:$0xff]  ;;  %v2141_v15 = vld [vmem:[#allocation13 + $0xc70] sm:$0xff]  ;;  %v2148_v16 = vld [vmem:[#allocation13 + $0xca8] sm:$0xff] }
 0x479   :  { %v2071_v0 = vld [vmem:[#allocation13 + $0xa40] sm:$0xff] }
 0x47a   :  { %3779 = vmatpush1.bf16.msra.mxu1 %v3778_v42  ;;  %3907 = vmatpush1.bf16.msra.mxu0 %v3906_v43  ;;  %v4052_v42 = vpack.c.bf16 %v1924_v34, %v1917_v33  ;;  %v1812_v43 = vld [vmem:[#allocation13 + $0x228] sm:$0xff]  ;;  %v1973_v34 = vld [vmem:[#allocation13 + $0x730] sm:$0xff] }
 0x47b   :  { %3909 = vmatprep.subr.bf16.mxu1 %v3908_v37  ;;  %4037 = vmatprep.subr.bf16.mxu0 %v4036_v27  ;;  %v1825_v37 = vld [vmem:[#allocation13 + $0x290] sm:$0xff]  ;;  %v1931_v27 = vld [vmem:[#allocation13 + $0x5e0] sm:$0xff]  ;;  %v4054_v1 = vpack.c.bf16 %v1812_v43, %v1805_v41  ;;  %v3942_v41 = vpack.c.bf16 %v1866_v32, %v1859_v31  ;;  %v2162_v32 = vld [vmem:[#allocation13 + $0xd18] sm:$0xff] }
 0x47c   :  { %v3928_v48 = vpack.c.bf16 %v1825_v37, %v1818_v44  ;;  %v4056_v52 = vpack.c.bf16 %v1938_v45, %v1931_v27  ;;  %v1873_v43 = vld [vmem:[#allocation13 + $0x410] sm:$0xff]  ;;  %v1880_v44 = vld [vmem:[#allocation13 + $0x448] sm:$0xff]  ;;  %v1987_v37 = vld [vmem:[#allocation13 + $0x7a0] sm:$0xff]  ;;  %v4072_v45 = vpack.c.bf16 %v2106_v40, %v2099_v39 }
 0x47d   :  { %2364 = vmatmul.mubr.f32.vlgmr.msra.gmra.mrb[6].mxu1 %v4772_v54  ;;  %2506 = vmatmul.mubr.f32.vlgmr.msra.gmra.mrb[4].mxu0 %v4772_v54  ;;  %v2155_v31 = vld [vmem:[#allocation13 + $0xce0] sm:$0xff] }
 0x47e   :  { %3911 = vmatpush1.bf16.msra.mxu1 %v3910_v53  ;;  %2576 = vmatprep.mubr.f32.mxu1 %v4753_v12  ;;  %v1826_v53 = vld [vmem:[#allocation13 + $0x298] sm:$0xff]  ;;  %v2043_v39 = vld [vmem:[#allocation13 + $0x960] sm:$0xff]  ;;  %v4088_v40 = vpack.c.bf16 %v2162_v32, %v2155_v31 }
 0x47f   :  { %4039 = vmatpush3.bf16.msra.mxu0 %v4038_v47  ;;  %2718 = vmatprep.mubr.f32.mxu0 %v4753_v12  ;;  %v1789_v12 = vld [vmem:[#allocation13 + $0x170] sm:$0xff]  ;;  %v1832_v47 = vld [vmem:[#allocation13 + $0x2c8] sm:$0xff] }
 0x480   :  { %3913 = vmatprep.subr.bf16.mxu1 %v3912_v28  ;;  %4041 = vmatprep.subr.bf16.mxu0 %v4040_v62  ;;  %v3922_v22 = vpack.c.bf16 %v1796_v25, %v1789_v12  ;;  %v3930_v28 = vpack.c.bf16 %v1824_v50, %v1817_v49  ;;  %v4058_v62 = vpack.c.bf16 %v1826_v53, %v1819_v51  ;;  %v2085_v12 = vld [vmem:[#allocation13 + $0xab0] sm:$0xff]  ;;  %v2092_v25 = vld [vmem:[#allocation13 + $0xae8] sm:$0xff] }
 0x481   :  { %v3932_v63 = vpack.c.bf16 %v1839_v55, %v1832_v47  ;;  %v4068_v33 = vpack.c.bf16 %v2092_v25, %v2085_v12  ;;  %v2113_v49 = vld [vmem:[#allocation13 + $0xb90] sm:$0xff]  ;;  %v2120_v50 = vld [vmem:[#allocation13 + $0xbc8] sm:$0xff]  ;;  %v3946_v51 = vpack.c.bf16 %v1880_v44, %v1873_v43  ;;  %v1887_v47 = vld [vmem:[#allocation13 + $0x480] sm:$0xff]  ;;  %v4084_v25 = vpack.c.bf16 %v2148_v16, %v2141_v15 }
 0x482   :  { %3915 = vmatpush1.bf16.msra.mxu1 %v3914_v5  ;;  %v1840_v5 = vld [vmem:[#allocation13 + $0x308] sm:$0xff]  ;;  %v1894_v55 = vld [vmem:[#allocation13 + $0x4b8] sm:$0xff]  ;;  %v4076_v57 = vpack.c.bf16 %v2120_v50, %v2113_v49  ;;  %v2029_v12 = vld [vmem:[#allocation13 + $0x8f0] sm:$0xff] }
 0x483   :  { %4043 = vmatpush3.bf16.msra.mxu0 %v4042_v6  ;;  %3917 = vmatprep.subr.bf16.mxu1 %v3916_v2  ;;  %v1846_v6 = vld [vmem:[#allocation13 + $0x338] sm:$0xff]  ;;  %v1853_v2 = vld [vmem:[#allocation13 + $0x370] sm:$0xff]  ;;  %v1951_v43 = vld [vmem:[#allocation13 + $0x680] sm:$0xff] }
 0x484   :  { %4045 = vmatprep.subr.bf16.mxu0 %v4044_v13  ;;  %v4062_v13 = vpack.c.bf16 %v1840_v5, %v1833_v8  ;;  %v3936_v14 = vpack.c.bf16 %v1853_v2, %v1846_v6  ;;  %v3950_v8 = vpack.c.bf16 %v1894_v55, %v1887_v47  ;;  %v1901_v6 = vld [vmem:[#allocation13 + $0x4f0] sm:$0xff]  ;;  %v1908_v2 = vld [vmem:[#allocation13 + $0x528] sm:$0xff]  ;;  %v2183_v47 = vld [vmem:[#allocation13 + $0xdc0] sm:$0xff] }
 0x485   :  { %v2169_v44 = vld [vmem:[#allocation13 + $0xd50] sm:$0xff]  ;;  %v2190_v55 = vld [vmem:[#allocation13 + $0xdf8] sm:$0xff] }
 0x486   :  { %3919 = vmatpush1.bf16.msra.mxu1 %v3918_v20  ;;  %v1854_v20 = vld [vmem:[#allocation13 + $0x378] sm:$0xff]  ;;  %v2057_v49 = vld [vmem:[#allocation13 + $0x9d0] sm:$0xff]  ;;  %v4096_v4 = vpack.c.bf16 %v2190_v55, %v2183_v47  ;;  %v2076_v55 = vld [vmem:[#allocation13 + $0xa68] sm:$0xff] }
 0x487   :  { %4047 = vmatpush3.bf16.msra.mxu0 %v4046_v21  ;;  %3921 = vmatprep.subr.bf16.mxu1 %v3920_v24  ;;  %v1860_v21 = vld [vmem:[#allocation13 + $0x3a8] sm:$0xff]  ;;  %v1867_v24 = vld [vmem:[#allocation13 + $0x3e0] sm:$0xff]  ;;  %v2069_v47 = vld [vmem:[#allocation13 + $0xa30] sm:$0xff] }
 0x488   :  { %4049 = vmatprep.subr.bf16.mxu0 %v4048_v29  ;;  %v4066_v29 = vpack.c.bf16 %v1854_v20, %v1847_v18  ;;  %v3940_v30 = vpack.c.bf16 %v1867_v24, %v1860_v21  ;;  %v3954_v18 = vpack.c.bf16 %v1908_v2, %v1901_v6  ;;  %v1915_v21 = vld [vmem:[#allocation13 + $0x560] sm:$0xff]  ;;  %v1922_v24 = vld [vmem:[#allocation13 + $0x598] sm:$0xff] }
 0x48a   :  { %3923 = vmatpush1.bf16.msra.mxu1 %v3922_v22  ;;  %v1980_v22 = vld [vmem:[#allocation13 + $0x768] sm:$0xff] }
 0x48b   :  { %4051 = vmatpush3.bf16.msra.mxu0 %v4050_v35  ;;  %3925 = vmatprep.subr.bf16.mxu1 %v3924_v38  ;;  %v1874_v35 = vld [vmem:[#allocation13 + $0x418] sm:$0xff]  ;;  %v1881_v38 = vld [vmem:[#allocation13 + $0x450] sm:$0xff] }
 0x48c   :  { %4053 = vmatprep.subr.bf16.mxu0 %v4052_v42  ;;  %v4070_v42 = vpack.c.bf16 %v1980_v22, %v1973_v34  ;;  %v3944_v27 = vpack.c.bf16 %v1881_v38, %v1874_v35  ;;  %v1929_v35 = vld [vmem:[#allocation13 + $0x5d0] sm:$0xff]  ;;  %v1936_v38 = vld [vmem:[#allocation13 + $0x608] sm:$0xff] }
 0x48e   :  { %3927 = vmatpush1.bf16.msra.mxu1 %v3926_v46  ;;  %v1994_v46 = vld [vmem:[#allocation13 + $0x7d8] sm:$0xff] }
 0x48f   :  { %4055 = vmatpush3.bf16.msra.mxu0 %v4054_v1  ;;  %3929 = vmatprep.subr.bf16.mxu1 %v3928_v48  ;;  %v1888_v1 = vld [vmem:[#allocation13 + $0x488] sm:$0xff]  ;;  %v1895_v48 = vld [vmem:[#allocation13 + $0x4c0] sm:$0xff] }
 0x490   :  { %4057 = vmatprep.subr.bf16.mxu0 %v4056_v52  ;;  %v4074_v52 = vpack.c.bf16 %v1994_v46, %v1987_v37  ;;  %v3948_v53 = vpack.c.bf16 %v1895_v48, %v1888_v1  ;;  %v2176_v37 = vld [vmem:[#allocation13 + $0xd88] sm:$0xff]  ;;  %v1943_v1 = vld [vmem:[#allocation13 + $0x640] sm:$0xff]  ;;  %v1950_v48 = vld [vmem:[#allocation13 + $0x678] sm:$0xff] }
 0x491   :  { %v4092_v50 = vpack.c.bf16 %v2176_v37, %v2169_v44  ;;  %v2041_v44 = vld [vmem:[#allocation13 + $0x950] sm:$0xff]  ;;  %v2048_v37 = vld [vmem:[#allocation13 + $0x988] sm:$0xff] }
 0x492   :  { %3931 = vmatpush1.bf16.msra.mxu1 %v3930_v28  ;;  %v2008_v28 = vld [vmem:[#allocation13 + $0x848] sm:$0xff] }
 0x493   :  { %4059 = vmatpush3.bf16.msra.mxu0 %v4058_v62  ;;  %3933 = vmatprep.subr.bf16.mxu1 %v3932_v63  ;;  %v1902_v62 = vld [vmem:[#allocation13 + $0x4f8] sm:$0xff]  ;;  %v1909_v63 = vld [vmem:[#allocation13 + $0x530] sm:$0xff] }
 0x494   :  { %4061 = vmatprep.subr.bf16.mxu0 %v4060_v3  ;;  %v4078_v3 = vpack.c.bf16 %v2008_v28, %v2001_v56  ;;  %v3952_v5 = vpack.c.bf16 %v1909_v63, %v1902_v62  ;;  %v3966_v56 = vpack.c.bf16 %v1950_v48, %v1943_v1  ;;  %v1957_v62 = vld [vmem:[#allocation13 + $0x6b0] sm:$0xff]  ;;  %v1964_v63 = vld [vmem:[#allocation13 + $0x6e8] sm:$0xff]  ;;  %v2055_v48 = vld [vmem:[#allocation13 + $0x9c0] sm:$0xff] }
 0x495   :  { %v3970_v6 = vpack.c.bf16 %v1964_v63, %v1957_v62  ;;  %v2083_v63 = vld [vmem:[#allocation13 + $0xaa0] sm:$0xff] }
 0x496   :  { %3935 = vmatpush1.bf16.msra.mxu1 %v3934_v11  ;;  %v2022_v11 = vld [vmem:[#allocation13 + $0x8b8] sm:$0xff] }
 0x497   :  { %4063 = vmatpush3.bf16.msra.mxu0 %v4062_v13  ;;  %3937 = vmatprep.subr.bf16.mxu1 %v3936_v14  ;;  %v1916_v13 = vld [vmem:[#allocation13 + $0x568] sm:$0xff]  ;;  %v1923_v14 = vld [vmem:[#allocation13 + $0x5a0] sm:$0xff] }
 0x498   :  { %4065 = vmatprep.subr.bf16.mxu0 %v4064_v19  ;;  %v4082_v19 = vpack.c.bf16 %v2022_v11, %v2015_v9  ;;  %v3956_v20 = vpack.c.bf16 %v1923_v14, %v1916_v13  ;;  %v1978_v11 = vld [vmem:[#allocation13 + $0x758] sm:$0xff]  ;;  %v1993_v14 = vld [vmem:[#allocation13 + $0x7d0] sm:$0xff] }
 0x499   :  { %v1986_v13 = vld [vmem:[#allocation13 + $0x798] sm:$0xff] }
 0x49a   :  { %3939 = vmatpush1.bf16.msra.mxu1 %v3938_v26  ;;  %v2036_v26 = vld [vmem:[#allocation13 + $0x928] sm:$0xff]  ;;  %v3976_v16 = vpack.c.bf16 %v1993_v14, %v1986_v13  ;;  %v2111_v14 = vld [vmem:[#allocation13 + $0xb80] sm:$0xff] }
 0x49b   :  { %4067 = vmatpush3.bf16.msra.mxu0 %v4066_v29  ;;  %3941 = vmatprep.subr.bf16.mxu1 %v3940_v30  ;;  %v1930_v29 = vld [vmem:[#allocation13 + $0x5d8] sm:$0xff]  ;;  %v1937_v30 = vld [vmem:[#allocation13 + $0x610] sm:$0xff]  ;;  %v4086_v34 = vpack.c.bf16 %v2036_v26, %v2029_v12 }
 0x49c   :  { %4069 = vmatprep.subr.bf16.mxu0 %v4068_v33  ;;  %v3958_v33 = vpack.c.bf16 %v1922_v24, %v1915_v21  ;;  %v3960_v22 = vpack.c.bf16 %v1937_v30, %v1930_v29  ;;  %v2007_v21 = vld [vmem:[#allocation13 + $0x840] sm:$0xff]  ;;  %v2006_v26 = vld [vmem:[#allocation13 + $0x838] sm:$0xff]  ;;  %v2021_v30 = vld [vmem:[#allocation13 + $0x8b0] sm:$0xff] }
 0x49d   :  { %v2014_v29 = vld [vmem:[#allocation13 + $0x878] sm:$0xff] }
 0x49e   :  { %2719 = vmatmul.mubr.f32.vlgmr.msra.gmra.mrb[6].mxu0 %v4755_v17  ;;  %3943 = vmatpush1.bf16.msra.mxu1 %v3942_v41  ;;  %v2050_v41 = vld [vmem:[#allocation13 + $0x998] sm:$0xff]  ;;  %v3984_v32 = vpack.c.bf16 %v2021_v30, %v2014_v29  ;;  %v2139_v30 = vld [vmem:[#allocation13 + $0xc60] sm:$0xff] }
 0x49f   :  { %4071 = vmatpush3.bf16.msra.mxu0 %v4070_v42  ;;  %2788 = vmatprep.mubr.f32.mxu0 %v4765_v59  ;;  %v1944_v42 = vld [vmem:[#allocation13 + $0x648] sm:$0xff] }
 0x4a0   :  { %3945 = vmatprep.subr.bf16.mxu1 %v3944_v27  ;;  %4073 = vmatprep.subr.bf16.mxu0 %v4072_v45  ;;  %v3962_v27 = vpack.c.bf16 %v1936_v38, %v1929_v35  ;;  %v4090_v45 = vpack.c.bf16 %v2050_v41, %v2043_v39  ;;  %v3964_v46 = vpack.c.bf16 %v1951_v43, %v1944_v42  ;;  %v2027_v39 = vld [vmem:[#allocation13 + $0x8e0] sm:$0xff]  ;;  %v2049_v41 = vld [vmem:[#allocation13 + $0x990] sm:$0xff] }
 0x4a2   :  { %3947 = vmatpush1.bf16.msra.mxu1 %v3946_v51  ;;  %v2064_v51 = vld [vmem:[#allocation13 + $0xa08] sm:$0xff] }
 0x4a3   :  { %4075 = vmatpush3.bf16.msra.mxu0 %v4074_v52  ;;  %3949 = vmatprep.subr.bf16.mxu1 %v3948_v53  ;;  %v1958_v52 = vld [vmem:[#allocation13 + $0x6b8] sm:$0xff]  ;;  %v1965_v53 = vld [vmem:[#allocation13 + $0x6f0] sm:$0xff] }
 0x4a4   :  { %4077 = vmatprep.subr.bf16.mxu0 %v4076_v57  ;;  %v4094_v57 = vpack.c.bf16 %v2064_v51, %v2057_v49  ;;  %v3968_v28 = vpack.c.bf16 %v1965_v53, %v1958_v52  ;;  %v2062_v49 = vld [vmem:[#allocation13 + $0x9f8] sm:$0xff]  ;;  %v2077_v51 = vld [vmem:[#allocation13 + $0xa70] sm:$0xff] }
 0x4a5   :  { %v3998_v52 = vpack.c.bf16 %v2062_v49, %v2055_v48  ;;  %v4784_v48 = vld [vmem:[#allocation14] sm:$0xff] }
 0x4a6   :  { %3951 = vmatpush1.bf16.msra.mxu1 %v3950_v8  ;;  %v2078_v8 = vld [vmem:[#allocation13 + $0xa78] sm:$0xff]  ;;  %v2196_v49 = vrot.slane %v4784_v48, %v4713_v58 }
 0x4a7   :  { %4079 = vmatpush3.bf16.msra.mxu0 %v4078_v3  ;;  %3953 = vmatprep.subr.bf16.mxu1 %v3952_v5  ;;  %v1972_v3 = vld [vmem:[#allocation13 + $0x728] sm:$0xff]  ;;  %v1979_v5 = vld [vmem:[#allocation13 + $0x760] sm:$0xff]  ;;  %v4098_v2 = vpack.c.bf16 %v2078_v8, %v2071_v0  ;;  %v2090_v0 = vld [vmem:[#allocation13 + $0xad8] sm:$0xff] }
 0x4a8   :  { %4081 = vmatprep.subr.bf16.mxu0 %v4080_v10  ;;  %v3972_v9 = vpack.c.bf16 %v1979_v5, %v1972_v3  ;;  %v1971_v10 = vld [vmem:[#allocation13 + $0x720] sm:$0xff]  ;;  %v2105_v8 = vld [vmem:[#allocation13 + $0xb50] sm:$0xff]  ;;  %v4006_v3 = vpack.c.bf16 %v2090_v0, %v2083_v63 }
 0x4a9   :  { %v3974_v15 = vpack.c.bf16 %v1978_v11, %v1971_v10  ;;  %v2119_v10 = vld [vmem:[#allocation13 + $0xbc0] sm:$0xff] }
 0x4aa   :  { %3955 = vmatpush1.bf16.msra.mxu1 %v3954_v18  ;;  %v1985_v18 = vld [vmem:[#allocation13 + $0x790] sm:$0xff] }
 0x4ab   :  { %4083 = vmatpush3.bf16.msra.mxu0 %v4082_v19  ;;  %3957 = vmatprep.subr.bf16.mxu1 %v3956_v20  ;;  %v1992_v19 = vld [vmem:[#allocation13 + $0x7c8] sm:$0xff] }
 0x4ac   :  { %4085 = vmatprep.subr.bf16.mxu0 %v4084_v25  ;;  %v2000_v20 = vld [vmem:[#allocation13 + $0x808] sm:$0xff]  ;;  %v3978_v24 = vpack.c.bf16 %v1992_v19, %v1985_v18  ;;  %v1999_v25 = vld [vmem:[#allocation13 + $0x800] sm:$0xff]  ;;  %v2133_v18 = vld [vmem:[#allocation13 + $0xc30] sm:$0xff] }
 0x4ad   :  { %v3980_v12 = vpack.c.bf16 %v2007_v21, %v2000_v20  ;;  %v3982_v31 = vpack.c.bf16 %v2006_v26, %v1999_v25  ;;  %v2125_v21 = vld [vmem:[#allocation13 + $0xbf0] sm:$0xff]  ;;  %v2147_v25 = vld [vmem:[#allocation13 + $0xca0] sm:$0xff] }
 0x4ae   :  { %3959 = vmatpush1.bf16.msra.mxu1 %v3958_v33  ;;  %v2013_v33 = vld [vmem:[#allocation13 + $0x870] sm:$0xff] }
 0x4af   :  { %4087 = vmatpush3.bf16.msra.mxu0 %v4086_v34  ;;  %3961 = vmatprep.subr.bf16.mxu1 %v3960_v22  ;;  %v2020_v34 = vld [vmem:[#allocation13 + $0x8a8] sm:$0xff] }
 0x4b0   :  { %4089 = vmatprep.subr.bf16.mxu0 %v4088_v40  ;;  %v2028_v22 = vld [vmem:[#allocation13 + $0x8e8] sm:$0xff]  ;;  %v3986_v35 = vpack.c.bf16 %v2020_v34, %v2013_v33  ;;  %v2042_v40 = vld [vmem:[#allocation13 + $0x958] sm:$0xff]  ;;  %v2161_v33 = vld [vmem:[#allocation13 + $0xd10] sm:$0xff] }
 0x4b1   :  { %v3992_v43 = vpack.c.bf16 %v2049_v41, %v2042_v40  ;;  %v2167_v41 = vld [vmem:[#allocation13 + $0xd40] sm:$0xff] }
 0x4b2   :  { %3963 = vmatpush1.bf16.msra.mxu1 %v3962_v27  ;;  %v2056_v27 = vld [vmem:[#allocation13 + $0x9c8] sm:$0xff] }
 0x4b3   :  { %4091 = vmatpush3.bf16.msra.mxu0 %v4090_v45  ;;  %3965 = vmatprep.subr.bf16.mxu1 %v3964_v46  ;;  %v2063_v45 = vld [vmem:[#allocation13 + $0xa00] sm:$0xff]  ;;  %v3994_v46 = vpack.c.bf16 %v2048_v37, %v2041_v44  ;;  %v2189_v44 = vld [vmem:[#allocation13 + $0xdf0] sm:$0xff] }
 0x4b4   :  { %4093 = vmatprep.subr.bf16.mxu0 %v4092_v50  ;;  %v3996_v1 = vpack.c.bf16 %v2063_v45, %v2056_v27  ;;  %v2070_v50 = vld [vmem:[#allocation13 + $0xa38] sm:$0xff]  ;;  %v2181_v45 = vld [vmem:[#allocation13 + $0xdb0] sm:$0xff] }
 0x4b5   :  { %v4000_v53 = vpack.c.bf16 %v2077_v51, %v2070_v50  ;;  %v2204_v50 = vrot.slane %v4784_v48, %v4732_v36  ;;  %v2200_v51 = vrot.slane %v4784_v48, %v4718_v60 }
 0x4b6   :  { %3967 = vmatpush1.bf16.msra.mxu1 %v3966_v56  ;;  %v2084_v56 = vld [vmem:[#allocation13 + $0xaa8] sm:$0xff] }
 0x4b7   :  { %4095 = vmatpush3.bf16.msra.mxu0 %v4094_v57  ;;  %3969 = vmatprep.subr.bf16.mxu1 %v3968_v28  ;;  %v2091_v57 = vld [vmem:[#allocation13 + $0xae0] sm:$0xff]  ;;  %v4002_v28 = vpack.c.bf16 %v2076_v55, %v2069_v47 }
 0x4b8   :  { %4097 = vmatprep.subr.bf16.mxu0 %v4096_v4  ;;  %v4004_v62 = vpack.c.bf16 %v2091_v57, %v2084_v56  ;;  %v2098_v4 = vld [vmem:[#allocation13 + $0xb18] sm:$0xff] }
 0x4b9   :  { %v4008_v5 = vpack.c.bf16 %v2105_v8, %v2098_v4 }
 0x4ba   :  { %3971 = vmatpush1.bf16.msra.mxu1 %v3970_v6  ;;  %v2097_v6 = vld [vmem:[#allocation13 + $0xb10] sm:$0xff] }
 0x4bb   :  { %4099 = vmatpush3.bf16.msra.mxu0 %v4098_v2  ;;  %3973 = vmatprep.subr.bf16.mxu1 %v3972_v9  ;;  %v2104_v2 = vld [vmem:[#allocation13 + $0xb48] sm:$0xff] }
 0x4bc   :  { %v2112_v9 = vld [vmem:[#allocation13 + $0xb88] sm:$0xff]  ;;  %v4010_v11 = vpack.c.bf16 %v2104_v2, %v2097_v6 }
 0x4bd   :  { %2577 = vmatmul.mubr.f32.vlgmr.msra.gmra.mrb[8].mxu1 %v4755_v17  ;;  %v2035_v17 = vld [vmem:[#allocation13 + $0x920] sm:$0xff]  ;;  %v4012_v13 = vpack.c.bf16 %v2119_v10, %v2112_v9 }
 0x4be   :  { %2789 = vmatmul.mubr.f32.vlgmr.msra.gmra.mrb[8].mxu0 %v4772_v54  ;;  %3975 = vmatpush1.bf16.msra.mxu1 %v3974_v15  ;;  %v3988_v38 = vpack.c.bf16 %v2035_v17, %v2028_v22  ;;  %v2118_v15 = vld [vmem:[#allocation13 + $0xbb8] sm:$0xff]  ;;  %v2153_v17 = vld [vmem:[#allocation13 + $0xcd0] sm:$0xff] }
 0x4bf   :  { %2647 = vmatprep.mubr.f32.mxu1 %v4765_v59  ;;  %3977 = vmatprep.subr.bf16.mxu1 %v3976_v16  ;;  %v2034_v59 = vld [vmem:[#allocation13 + $0x918] sm:$0xff]  ;;  %v4014_v19 = vpack.c.bf16 %v2118_v15, %v2111_v14 }
 0x4c0   :  { %v3990_v42 = vpack.c.bf16 %v2034_v59, %v2027_v39  ;;  %v2126_v16 = vld [vmem:[#allocation13 + $0xbf8] sm:$0xff]  ;;  %v2175_v39 = vld [vmem:[#allocation13 + $0xd80] sm:$0xff] }
 0x4c1   :  { %v4016_v20 = vpack.c.bf16 %v2133_v18, %v2126_v16 }
 0x4c2   :  { %3979 = vmatpush1.bf16.msra.mxu1 %v3978_v24  ;;  %v2132_v24 = vld [vmem:[#allocation13 + $0xc28] sm:$0xff] }
 0x4c3   :  { %3981 = vmatprep.subr.bf16.mxu1 %v3980_v12  ;;  %v2140_v12 = vld [vmem:[#allocation13 + $0xc68] sm:$0xff]  ;;  %v4018_v26 = vpack.c.bf16 %v2132_v24, %v2125_v21 }
 0x4c4   :  { %v4020_v29 = vpack.c.bf16 %v2147_v25, %v2140_v12 }
 0x4c6   :  { %3983 = vmatpush1.bf16.msra.mxu1 %v3982_v31  ;;  %v2146_v31 = vld [vmem:[#allocation13 + $0xc98] sm:$0xff] }
 0x4c7   :  { %3985 = vmatprep.subr.bf16.mxu1 %v3984_v32  ;;  %v2154_v32 = vld [vmem:[#allocation13 + $0xcd8] sm:$0xff]  ;;  %v4022_v34 = vpack.c.bf16 %v2146_v31, %v2139_v30 }
 0x4c8   :  { %v4024_v22 = vpack.c.bf16 %v2161_v33, %v2154_v32  ;;  %v2219_v33 = vsub.s32 6, %v4648_v7 }
 0x4ca   :  { %3987 = vmatpush1.bf16.msra.mxu1 %v3986_v35  ;;  %v2160_v35 = vld [vmem:[#allocation13 + $0xd08] sm:$0xff] }
 0x4cb   :  { %3989 = vmatprep.subr.bf16.mxu1 %v3988_v38  ;;  %v2168_v38 = vld [vmem:[#allocation13 + $0xd48] sm:$0xff]  ;;  %v4026_v59 = vpack.c.bf16 %v2160_v35, %v2153_v17 }
 0x4cc   :  { %v4028_v40 = vpack.c.bf16 %v2175_v39, %v2168_v38 }
 0x4ce   :  { %3991 = vmatpush1.bf16.msra.mxu1 %v3990_v42  ;;  %v2174_v42 = vld [vmem:[#allocation13 + $0xd78] sm:$0xff] }
 0x4cf   :  { %3993 = vmatprep.subr.bf16.mxu1 %v3992_v43  ;;  %v2182_v43 = vld [vmem:[#allocation13 + $0xdb8] sm:$0xff]  ;;  %v4030_v37 = vpack.c.bf16 %v2174_v42, %v2167_v41  ;;  %v2215_v41 = vsub.s32 5, %v4648_v7 }
 0x4d0   :  { %v4032_v27 = vpack.c.bf16 %v2189_v44, %v2182_v43 }
 0x4d1   :  { %v2216_v43 = vrot.slane %v4784_v48, %v2215_v41 }
 0x4d2   :  { %3995 = vmatpush1.bf16.msra.mxu1 %v3994_v46  ;;  %v2188_v46 = vld [vmem:[#allocation13 + $0xde8] sm:$0xff] }
 0x4d3   :  { %3997 = vmatprep.subr.bf16.mxu1 %v3996_v1  ;;  %v4034_v1 = vpack.c.bf16 %v2188_v46, %v2181_v45 }
 0x4d6   :  { %3999 = vmatpush1.bf16.msra.mxu1 %v3998_v52  ;;  %v2208_v52 = vrot.slane %v4784_v48, %v4721_v61 }
 0x4d7   :  { %4001 = vmatprep.subr.bf16.mxu1 %v4000_v53 }
 0x4da   :  { %4003 = vmatpush1.bf16.msra.mxu1 %v4002_v28 }
 0x4db   :  { %4005 = vmatprep.subr.bf16.mxu1 %v4004_v62 }
 0x4de   :  { %4007 = vmatpush1.bf16.msra.mxu1 %v4006_v3 }
 0x4df   :  { %4009 = vmatprep.subr.bf16.mxu1 %v4008_v5 }
 0x4e2   :  { %4011 = vmatpush1.bf16.msra.mxu1 %v4010_v11 }
 0x4e3   :  { %4013 = vmatprep.subr.bf16.mxu1 %v4012_v13 }
 0x4e6   :  { %4015 = vmatpush1.bf16.msra.mxu1 %v4014_v19 }
 0x4e7   :  { %4017 = vmatprep.subr.bf16.mxu1 %v4016_v20 }
 0x4ea   :  { %4019 = vmatpush1.bf16.msra.mxu1 %v4018_v26 }
 0x4eb   :  { %4021 = vmatprep.subr.bf16.mxu1 %v4020_v29 }
 0x4ee   :  { %4023 = vmatpush1.bf16.msra.mxu1 %v4022_v34  ;;  %v2220_v34 = vrot.slane %v4784_v48, %v2219_v33 }
 0x4ef   :  { %4025 = vmatprep.subr.bf16.mxu1 %v4024_v22 }
 0x4f2   :  { %4027 = vmatpush1.bf16.msra.mxu1 %v4026_v59  ;;  %v2211_v59 = vsub.s32 4, %v4648_v7 }
 0x4f3   :  { %4029 = vmatprep.subr.bf16.mxu1 %v4028_v40 }
 0x4f4   :  { %v2212_v42 = vrot.slane %v4784_v48, %v2211_v59 }
 0x4f6   :  { %4031 = vmatpush1.bf16.msra.mxu1 %v4030_v37 }
 0x4f7   :  { %4033 = vmatprep.subr.bf16.mxu1 %v4032_v27 }
 0x4fa   :  { %4035 = vmatpush1.bf16.msra.mxu1 %v4034_v1 }
 0x4fd   :  { %2648 = vmatmul.mubr.f32.vlgmr.msra.gmra.mrb[8].mxu1 %v4772_v54 }
 0x550   :  { %v2365_v53 = vpop.f32.mrb[6].mxu1  ;;  %v2507_v47 = vpop.f32.mrb[4].mxu0 }
 0x551   :  { %v4106_v55 = vadd.f32 %v2365_v53, %v2196_v49  ;;  %v4108_v56 = vadd.f32 %v2507_v47, %v2204_v50  ;;  %v2367_v57 = vpop.f32.mrb[7].mxu1  ;;  %v2509_v54 = vpop.f32.mrb[5].mxu0 }
 0x552   :  { %v4107_v28 = vadd.f32 %v2367_v57, %v2200_v51  ;;  %v4109_v62 = vadd.f32 %v2509_v54, %v2208_v52 }
 0x553   :  { %v2991_v63 = vmul.f32 -1.442695, %v4106_v55  ;;  %v2993_v0 = vmul.f32 -1.442695, %v4108_v56 }
 0x554   :  { %v2992_v58 = vmul.f32 -1.442695, %v4107_v28  ;;  %v2994_v4 = vmul.f32 -1.442695, %v4109_v62 }
 0x555   :  { %4168 = vpow2.f32 %v2991_v63 }
 0x556   :  { %4170 = vpow2.f32 %v2993_v0 }
 0x557   :  { %4172 = vpow2.f32 %v2992_v58 }
 0x558   :  { %4174 = vpow2.f32 %v2994_v4 }
 0x55f   :  { %v4169_v60 = vpop.eup %4168 }
 0x560   :  { %v4171_v36 = vpop.eup %4170  ;;  %v2815_v8 = vadd.f32 1.0, %v4169_v60 }
 0x561   :  { %v4173_v61 = vpop.eup %4172  ;;  %v2817_v3 = vadd.f32 1.0, %v4171_v36 }
 0x562   :  { %v4175_v5 = vpop.eup %4174  ;;  %4176 = vrcp.f32 %v2815_v8  ;;  %v2816_v6 = vadd.f32 1.0, %v4173_v61 }
 0x563   :  { %4178 = vrcp.f32 %v2817_v3  ;;  %v2818_v2 = vadd.f32 1.0, %v4175_v5 }
 0x564   :  { %4180 = vrcp.f32 %v2816_v6 }
 0x565   :  { %4182 = vrcp.f32 %v2818_v2 }
 0x56c   :  { %v4177_v9 = vpop.eup %4176 }
 0x56d   :  { %v4179_v10 = vpop.eup %4178 }
 0x56e   :  { %v4181_v11 = vpop.eup %4180 }
 0x56f   :  { %v4183_v13 = vpop.eup %4182  ;;  %v2843_v14 = vcombine.low %v4177_v9, %v4181_v11  ;;  %v2844_v15 = vcombine.high %v4177_v9, %v4181_v11 }
 0x570   :  { %v2845_v16 = vcombine.low %v4179_v10, %v4183_v13  ;;  %v2846_v18 = vcombine.high %v4179_v10, %v4183_v13 }
 0x571   :  { %v2853_v19 = vrot.slane %v2843_v14, %v4651_v23  ;;  %v2860_v20 = vrot.slane %v2844_v15, %v4651_v23  ;;  %v3030_v21 = vpop.f32.mrb[6].mxu0 }
 0x572   :  { %v2867_v24 = vrot.slane %v2845_v16, %v4651_v23  ;;  %v2874_v12 = vrot.slane %v2846_v18, %v4651_v23  ;;  %v3031_v25 = vpop.f32.mrb[7].mxu0 }
 0x573   :  { %v3032_v26 = vadd.f32 %v3031_v25, %v3030_v21 }
 0x574   :  { %v2875_v29 = vcombine.low %v2853_v19, %v2867_v24  ;;  %v2876_v30 = vcombine.high %v2853_v19, %v2867_v24  ;;  %v2877_v31 = vcombine.low %v2860_v20, %v2874_v12  ;;  %v2878_v32 = vcombine.high %v2860_v20, %v2874_v12 }
 0x575   :  { %v2721_v35 = vadd.f32 %v3032_v26, %v2220_v34 }
 0x576   :  { %2922 = vst [vmem:[#allocation16] sm:$0xff] %v2875_v29  ;;  %2929 = vst [vmem:[#allocation16 + $0xe] sm:$0xff] %v2876_v30 }
 0x577   :  { %2931 = vst [vmem:[#allocation16 + $0x1c] sm:$0xff] %v2877_v31  ;;  %2933 = vst [vmem:[#allocation16 + $0x2a] sm:$0xff] %v2878_v32 }
 0x591   :  { %v3065_v22 = vpop.f32.mrb[8].mxu0 }
 0x592   :  { %v3066_v17 = vpop.f32.mrb[9].mxu0 }
 0x593   :  { %v3067_v38 = vadd.f32 %v3066_v17, %v3065_v22 }
 0x595   :  { %v2791_v39 = vadd.f32 %v3067_v38, %v2721_v35 }
 0x597   :  { %v2997_v40 = vmul.f32 -1.442695, %v2791_v39 }
 0x599   :  { %4184 = vpow2.f32 %v2997_v40 }
 0x5a3   :  { %v4185_v49 = vpop.eup %4184 }
 0x5a4   :  { %v2821_v50 = vadd.f32 1.0, %v4185_v49 }
 0x5d0   :  { %v2649_v44 = vpop.f32.mrb[8].mxu1 }
 0x5d1   :  { %v4110_v37 = vadd.f32 %v2649_v44, %v2212_v42  ;;  %v2651_v27 = vpop.f32.mrb[9].mxu1 }
 0x5d2   :  { %v4111_v45 = vadd.f32 %v2651_v27, %v2216_v43 }
 0x5d3   :  { %v2995_v46 = vmul.f32 -1.442695, %v4110_v37 }
 0x5d4   :  { %v2996_v1 = vmul.f32 -1.442695, %v4111_v45 }
 0x5d5   :  { %4186 = vpow2.f32 %v2995_v46 }
 0x5d6   :  { %4188 = vpow2.f32 %v2996_v1 }
 0x5d7   :  { %4190 = vrcp.f32 %v2821_v50 }
 0x5df   :  { %v4187_v51 = vpop.eup %4186 }
 0x5e0   :  { %v4189_v52 = vpop.eup %4188  ;;  %v2819_v53 = vadd.f32 1.0, %v4187_v51 }
 0x5e1   :  { %v2820_v7 = vadd.f32 1.0, %v4189_v52  ;;  %v4191_v47 = vpop.eup %4190 }
 0x5e2   :  { %4192 = vrcp.f32 %v2819_v53  ;;  %v2881_v55 = vcombine.high %v4191_v47, %v4191_v47  ;;  %v2902_v28 = vrot.slane %v4191_v47, %v4651_v23 }
 0x5e3   :  { %4194 = vrcp.f32 %v2820_v7 }
 0x5e4   :  { %v2909_v62 = vrot.slane %v2881_v55, %v4651_v23 }
 0x5ec   :  { %v4193_v48 = vpop.eup %4192 }
 0x5ed   :  { %v4195_v56 = vpop.eup %4194 }
 0x5ee   :  { %v2879_v57 = vcombine.low %v4193_v48, %v4195_v56  ;;  %v2880_v54 = vcombine.high %v4193_v48, %v4195_v56 }
 0x5f0   :  { %v2888_v63 = vrot.slane %v2879_v57, %v4651_v23  ;;  %v2895_v0 = vrot.slane %v2880_v54, %v4651_v23 }
 0x5f2   :  { %v2910_v58 = vcombine.low %v2888_v63, %v2902_v28  ;;  %v2911_v4 = vcombine.high %v2888_v63, %v2902_v28  ;;  %v2912_v60 = vcombine.low %v2895_v0, %v2909_v62  ;;  %v2913_v36 = vcombine.high %v2895_v0, %v2909_v62 }
 0x5f4   :  { %2928 = vst.msk [vmem:[#allocation16 + $0x8] sm:$0x3f] %vm2927_vm5, %v2910_v58  ;;  %2930 = vst.msk [vmem:[#allocation16 + $0x16] sm:$0x3f] %vm2927_vm5, %v2911_v4 }
 0x5f5   :  { %2932 = vst.msk [vmem:[#allocation16 + $0x24] sm:$0x3f] %vm2927_vm5, %v2912_v60  ;;  %2934 = vst.msk [vmem:[#allocation16 + $0x32] sm:$0x3f] %vm2927_vm5, %v2913_v36 }
 0x5f6   :  { %2941 = vsyncadd [#allocation4], 672  ;;  %s4468_s1 = smov [#allocation16]  }
 0x5f7   :  { %s2942_s19 = sshll.u32 %s4468_s1, 4  ;;  %s2943_s19 = int_to_ptr.vmem [resolvable:$true] %s2942_s19 }
 0x5f8   :  { %s4372_s5 = scalar_lea.vmem %s2943_s19, 224  ;;  %s4376_s4 = scalar_lea.vmem %s2943_s19, 896 }
 0x5f9   :  { %p4373_p8 = scmp.ne.s32.totalorder %s2943_s19, %s4372_s5  ;;  %p4377_p9 = scmp.lt.s32.totalorder %s2943_s19, %s2943_s19 }
 0x5fa   :  { %p4378_p10 = scmp.lt.s32.totalorder %s4376_s4, %s4372_s5 }
 0x5fc   :  { %p4379_p11 = por %p4378_p10, %p4377_p9 }
 0x5fe   :  { %p4380_p12 = pnand %p4379_p11, %p4373_p8 }
 0x600   :  { %4383 = shalt.err (!%p4380_p12)
}
 0x601   :  { %s4384_s8 = scalar_lea.hbm %s4858_s10, 224 }
 0x602   :  { %p4385_p13 = scmp.ne.s32.totalorder %s4858_s10, %s4384_s8  ;;  %p4388_p0 = scmp.lt.u32.totalorder %s4384_s8, %s4858_s10 }
 0x604   :  { %p4390_p1 = pnand %p4388_p0, %p4385_p13 }
 0x606   :  { %4393 = shalt.err (!%p4390_p1)
}
 0x607   :  { %s4469_s23 = smov 224   ;;  %s4470_s2 = smov 14  }
 0x608   :  { %2948 = dma.vmem_to_hbm [thread:$0]  %s2943_s19, 224, %s4858_s10, [#allocation4], %s4469_s23, %s4469_s23, %s4470_s2  }
 0x609   :  { %2953 = vsyncadd [#allocation18], 96  ;;  %s4471_s26 = smov [#allocation17]  }
 0x60a   :  { %s2954_s3 = sshll.u32 %s4471_s26, 4  ;;  %s2955_s3 = int_to_ptr.vmem [resolvable:$true] %s2954_s3 }
 0x60b   :  { %s4394_s6 = scalar_lea.vmem %s2955_s3, 32  ;;  %s4398_s7 = scalar_lea.vmem %s2955_s3, 128 }
 0x60c   :  { %p4395_p2 = scmp.ne.s32.totalorder %s2955_s3, %s4394_s6  ;;  %p4399_p3 = scmp.lt.s32.totalorder %s2955_s3, %s2955_s3 }
 0x60d   :  { %p4400_p4 = scmp.lt.s32.totalorder %s4398_s7, %s4394_s6 }
 0x60f   :  { %p4401_p5 = por %p4400_p4, %p4399_p3 }
 0x611   :  { %p4402_p6 = pnand %p4401_p5, %p4395_p2 }
 0x613   :  { %4405 = shalt.err (!%p4402_p6)
}
 0x614   :  { %s4406_s13 = scalar_lea.hbm %s4859_s11, 32 }
 0x615   :  { %p4407_p7 = scmp.ne.s32.totalorder %s4859_s11, %s4406_s13  ;;  %p4410_p8 = scmp.lt.u32.totalorder %s4406_s13, %s4859_s11 }
 0x617   :  { %p4412_p9 = pnand %p4410_p8, %p4407_p7 }
 0x619   :  { %4415 = shalt.err (!%p4412_p9)
}
 0x61a   :  { %s4472_s0 = smov 2  }
 0x61b   :  { %2960 = dma.vmem_to_hbm [thread:$0]  %s2955_s3, 32, %s4859_s11, [#allocation18], %s4457_s28, %s4457_s28, %s4472_s0  }
 0x61c   :  { %2965 = vsyncadd [#allocation18], 96  ;;  %s4473_s19 = smov [#allocation19]  }
 0x61d   :  { %s2966_s5 = sshll.u32 %s4473_s19, 4  ;;  %s2967_s5 = int_to_ptr.vmem [resolvable:$true] %s2966_s5 }
 0x61e   :  { %s4416_s4 = scalar_lea.vmem %s2967_s5, 32  ;;  %s4420_s16 = scalar_lea.vmem %s2967_s5, 128 }
 0x61f   :  { %p4417_p10 = scmp.ne.s32.totalorder %s2967_s5, %s4416_s4  ;;  %p4421_p11 = scmp.lt.s32.totalorder %s2967_s5, %s2967_s5 }
 0x620   :  { %p4422_p12 = scmp.lt.s32.totalorder %s4420_s16, %s4416_s4 }
 0x622   :  { %p4423_p13 = por %p4422_p12, %p4421_p11 }
 0x624   :  { %p4424_p0 = pnand %p4423_p13, %p4417_p10 }
 0x626   :  { %4427 = shalt.err (!%p4424_p0)
}
 0x627   :  { %s4428_s29 = scalar_lea.hbm %s4860_s12, 32 }
 0x628   :  { %p4429_p1 = scmp.ne.s32.totalorder %s4860_s12, %s4428_s29  ;;  %p4432_p2 = scmp.lt.u32.totalorder %s4428_s29, %s4860_s12 }
 0x62a   :  { %p4434_p3 = pnand %p4432_p2, %p4429_p1 }
 0x62c   :  { %4437 = shalt.err (!%p4434_p3)
}
 0x62d   :  { %2972 = dma.vmem_to_hbm [thread:$0]  %s2967_s5, 32, %s4860_s12, [#allocation18], %s4457_s28, %s4457_s28, %s4472_s0  }
 0x62e   :  { %4448 = dma.done.wait [#allocation4], 896  }
 0x62f   :  { %4449 = vsyncadd [#allocation4], 4294966400 }
 0x630   :  { %4450 = dma.done.wait [#allocation18], 256  }
 0x631   :  { %4451 = vsyncadd [#allocation18], 4294967040 }
 0x632   :  { %2982 = vsyncpa [#allocation3], 1 }
 0x633   :  { %2983 = vsyncpa [#allocation6], 1 }
 0x634   :  { %2984 = vsyncpa [#allocation9], 1 }
 0x635   :  { %2985 = vsyncpa [#allocation12], 1 }
 0x636   :  { %2986 = vsyncpa [#allocation15], 1 }
 0x637   :  { %2987 = vsyncpa [#allocation4], 1 }
 0x638   :  { %2988 = vsyncpa [#allocation18], 1 }

</bundles_post_ra>
